<compile_context>
chip_gen: v7x
topology: tpu7x:2x2x1
jax: 0.10.0
libtpu: 0.0.40
codegen_flags: <defaults>
</compile_context>

<pallas_src>
import functools

import jax
import jax.numpy as jnp
from jax.experimental import pallas as pl
from jax.experimental.pallas import tpu as pltpu

# ---- problem sizes (match the PyTorch module's implicit globals) ------------
H = 16
W = 16
NUM_CLASSES = 10
BATCH = 2

OH1, OW1 = H - 2, W - 2           # 14, 14  conv1 output
OH2, OW2 = OH1 - 2, OW1 - 2       # 12, 12  conv2 output
PH, PW = OH2 // 2, OW2 // 2       # 6, 6    pooled
C = 32                            # conv channels
L1 = OW1 * C                      # 448     conv1 row width: lane = ow1*32 + c
L2 = OW2 * C                      # 384     conv2 row width: lane = ow2*32 + c
L3 = 2 * C * (PW - 1) + C         # 352     pooled-row window fed to fc1
FC1 = 128
FLAT = C * PH * PW                # 1152


# ------------------------------ fused kernel ---------------------------------
def _fused_cnn_kernel(x_ref, w1_ref, b1_ref, w2_ref, b2_ref,
                      w3_ref, b3_ref, w4_ref, b4_ref, out_ref,
                      h1_ref, h2_ref, *, batch):
    f32 = jnp.float32
    bf16 = jnp.bfloat16

    for bi in range(batch):                              # tiny static batch -> unroll
        # ---------- conv1 + relu : 3 block-banded MXU matmuls ----------------
        # h1[oh1, ow1*32+c] = relu(b1[c] + sum_{kh,kw} x[oh1+kh, ow1+kw]*W1[c,kh,kw])
        acc1 = jnp.zeros((OH1, L1), f32)
        for kh in range(3):
            xk = x_ref[pl.ds(bi * H + kh, OH1), :].astype(bf16)       # (14, 16)
            acc1 = acc1 + jnp.dot(xk, w1_ref[kh],
                                  preferred_element_type=f32)         # (14, 448)
        h1_ref[...] = jnp.maximum(acc1 + b1_ref[...], 0.0).astype(bf16)

        # ---------- conv2 + relu : 3 block-banded MXU matmuls ----------------
        acc2 = jnp.zeros((OH2, L2), f32)
        for kh in range(3):
            hk = h1_ref[pl.ds(kh, OH2), :]                            # (12, 448) bf16
            acc2 = acc2 + jnp.dot(hk, w2_ref[kh],
                                  preferred_element_type=f32)         # (12, 384)
        h2_ref[...] = jnp.maximum(acc2 + b2_ref[...], 0.0)            # (12, 384) f32

        # ---------- 2x2 max-pool fused with fc1 ------------------------------
        # pooled row for ph: lane 64*pw + c holds max over the 2x2 window;
        # the "odd" 32-lane blocks are pool garbage and hit zero rows of w3.
        acc3 = jnp.zeros((1, FC1), f32)
        for ph in range(PH):
            r0, r1 = 2 * ph, 2 * ph + 1
            p00 = h2_ref[pl.ds(r0, 1), pl.ds(0, L3)]
            p01 = h2_ref[pl.ds(r0, 1), pl.ds(C, L3)]
            p10 = h2_ref[pl.ds(r1, 1), pl.ds(0, L3)]
            p11 = h2_ref[pl.ds(r1, 1), pl.ds(C, L3)]
            pooled = jnp.maximum(jnp.maximum(p00, p01),
                                 jnp.maximum(p10, p11)).astype(bf16)  # (1, 352)
            acc3 = acc3 + jnp.dot(pooled, w3_ref[ph],
                                  preferred_element_type=f32)         # (1, 128)
        h3 = jnp.maximum(acc3 + b3_ref[...], 0.0).astype(bf16)        # (1, 128)

        # ---------- fc2 -------------------------------------------------------
        logits = (jnp.dot(h3, w4_ref[...], preferred_element_type=f32)
                  + b4_ref[...])                                      # (1, 10)
        out_ref[pl.ds(bi, 1), :] = logits


# ------------------------------ wrapper ---------------------------------------
def cnn_classifier_forward(x, prep):
    """x: anything reshapeable to (-1, 1, H, W), like the PyTorch .view."""
    xb = x.reshape(-1, 1, H, W).astype(jnp.float32)
    batch = xb.shape[0]
    x2 = xb.reshape(batch * H, W)          # rows = (n, h), lanes = w (free reshape)

    kernel = functools.partial(_fused_cnn_kernel, batch=batch)
    return pl.pallas_call(
        kernel,
        out_shape=jax.ShapeDtypeStruct((batch, NUM_CLASSES), jnp.float32),
        in_specs=[
            pl.BlockSpec((batch * H, W), lambda: (0, 0)),          # x
            pl.BlockSpec((3, W, L1), lambda: (0, 0, 0)),           # conv1 weights
            pl.BlockSpec((1, L1), lambda: (0, 0)),                 # conv1 bias
            pl.BlockSpec((3, L1, L2), lambda: (0, 0, 0)),          # conv2 weights
            pl.BlockSpec((1, L2), lambda: (0, 0)),                 # conv2 bias
            pl.BlockSpec((PH, L3, FC1), lambda: (0, 0, 0)),        # fc1 weights
            pl.BlockSpec((1, FC1), lambda: (0, 0)),                # fc1 bias
            pl.BlockSpec((FC1, NUM_CLASSES), lambda: (0, 0)),      # fc2 weights
            pl.BlockSpec((1, NUM_CLASSES), lambda: (0, 0)),        # fc2 bias
        ],
        out_specs=pl.BlockSpec((batch, NUM_CLASSES), lambda: (0, 0)),
        scratch_shapes=[
            pltpu.VMEM((OH1, L1), jnp.bfloat16),   # conv1 output (channels-last rows)
            pltpu.VMEM((OH2, L2), jnp.float32),    # conv2 output
        ],
    )(x2, prep["w1"], prep["b1"], prep["w2"], prep["b2"],
      prep["w3"], prep["b3"], prep["w4"], prep["b4"])


# --------------------- one-time parameter re-layout ----------------------------
def prepare_params(p):
    """Convert PyTorch-layout params into the kernel's layouts (done once)."""
    f32, bf16 = jnp.float32, jnp.bfloat16
    c1 = p["conv1_w"].astype(f32)          # (32, 1, 3, 3)  [cout, cin, kh, kw]
    c2 = p["conv2_w"].astype(f32)          # (32, 32, 3, 3)

    # conv1: W1[kh][w, ow1*32 + c] = c1[c, 0, kh, w - ow1]   (block-banded)
    w1 = jnp.stack([
        sum(jnp.kron(jnp.eye(W, OW1, -kw, dtype=f32),
                     c1[:, 0, kh, kw].reshape(1, C))
            for kw in range(3))
        for kh in range(3)])               # (3, 16, 448)

    # conv2: W2[kh][ow1*32 + cin, ow2*32 + cout] = c2[cout, cin, kh, ow1 - ow2]
    w2 = jnp.stack([
        sum(jnp.kron(jnp.eye(OW1, OW2, -kw, dtype=f32),
                     c2[:, :, kh, kw].T)
            for kw in range(3))
        for kh in range(3)])               # (3, 448, 384)

    b1 = jnp.tile(p["conv1_b"].astype(f32), OW1).reshape(1, L1)
    b2 = jnp.tile(p["conv2_b"].astype(f32), OW2).reshape(1, L2)

    # fc1: fold PyTorch's (c, ph, pw) flatten order and the pooled-row lane
    # layout (lane = 64*pw + c; odd 32-lane blocks are pool garbage -> zeros).
    fw1 = p["fc1_w"].astype(f32).reshape(FC1, C, PH, PW)   # [j, c, ph, pw]
    w3 = jnp.zeros((PH, L3, FC1), f32)
    for ph in range(PH):
        for pw in range(PW):
            w3 = w3.at[ph, 2 * C * pw:2 * C * pw + C, :].set(fw1[:, :, ph, pw].T)
    b3 = p["fc1_b"].astype(f32).reshape(1, FC1)

    w4 = p["fc2_w"].astype(f32).T                          # (128, num_classes)
    b4 = p["fc2_b"].astype(f32).reshape(1, NUM_CLASSES)

    return {"w1": w1.astype(bf16), "b1": b1,
            "w2": w2.astype(bf16), "b2": b2,
            "w3": w3.astype(bf16), "b3": b3,
            "w4": w4.astype(bf16), "b4": b4}


# ------------------------------ reference & init -------------------------------
def reference_forward(x, params):
    """Pure-JAX/XLA reference matching the PyTorch module (f32 weights)."""
    xb = x.reshape(-1, 1, H, W).astype(jnp.float32)
    y = jax.lax.conv_general_dilated(
        xb, params["conv1_w"], window_strides=(1, 1), padding="VALID",
        dimension_numbers=("NCHW", "OIHW", "NCHW"))
    y = jax.nn.relu(y + params["conv1_b"].reshape(1, -1, 1, 1))
    y = jax.lax.conv_general_dilated(
        y, params["conv2_w"], window_strides=(1, 1), padding="VALID",
        dimension_numbers=("NCHW", "OIHW", "NCHW"))
    y = jax.nn.relu(y + params["conv2_b"].reshape(1, -1, 1, 1))
    y = jax.lax.reduce_window(y, -jnp.inf, jax.lax.max,
                              (1, 1, 2, 2), (1, 1, 2, 2), "VALID")
    y = y.reshape(y.shape[0], -1)
    y = jax.nn.relu(y @ params["fc1_w"].T + params["fc1_b"])
    return y @ params["fc2_w"].T + params["fc2_b"]


def init_params(key):
    ks = jax.random.split(key, 8)
    s = 0.05
    return {
        "conv1_w": s * jax.random.normal(ks[0], (C, 1, 3, 3), jnp.float32),
        "conv1_b": s * jax.random.normal(ks[1], (C,), jnp.float32),
        "conv2_w": s * jax.random.normal(ks[2], (C, C, 3, 3), jnp.float32),
        "conv2_b": s * jax.random.normal(ks[3], (C,), jnp.float32),
        # PyTorch Linear stores weight as (out_features, in_features)
        "fc1_w": s * jax.random.normal(ks[4], (FC1, FLAT), jnp.float32),
        "fc1_b": s * jax.random.normal(ks[5], (FC1,), jnp.float32),
        "fc2_w": s * jax.random.normal(ks[6], (NUM_CLASSES, FC1), jnp.float32),
        "fc2_b": s * jax.random.normal(ks[7], (NUM_CLASSES,), jnp.float32),
    }


if __name__ == "__main__":
    key = jax.random.PRNGKey(0)
    pkey, xkey = jax.random.split(key)
    params = init_params(pkey)
    prep = prepare_params(params)                # one-time weight re-layout
    x = jax.random.normal(xkey, (BATCH, 1, H, W), jnp.float32)

    fwd = jax.jit(cnn_classifier_forward)
    logits = jax.block_until_ready(fwd(x, prep))
    assert logits.shape == (BATCH, NUM_CLASSES), logits.shape
    assert bool(jnp.all(jnp.isfinite(logits)))

    ref = jax.jit(reference_forward)(x, params)
    err = float(jnp.max(jnp.abs(logits - ref)))
    assert err < 2e-2, f"max abs err vs reference: {err}"
    print("KERNEL_OK")
</pallas_src>

<mosaic_0001>
module attributes {stable_mosaic.version = 11 : i64} {
  func.func @_fused_cnn_kernel(%arg0: memref<32x16xf32, #tpu.memory_space<vmem>>, %arg1: memref<3x16x448xbf16, #tpu.memory_space<vmem>>, %arg2: memref<1x448xf32, #tpu.memory_space<vmem>>, %arg3: memref<3x448x384xbf16, #tpu.memory_space<vmem>>, %arg4: memref<1x384xf32, #tpu.memory_space<vmem>>, %arg5: memref<6x352x128xbf16, #tpu.memory_space<vmem>>, %arg6: memref<1x128xf32, #tpu.memory_space<vmem>>, %arg7: memref<128x10xbf16, #tpu.memory_space<vmem>>, %arg8: memref<1x10xf32, #tpu.memory_space<vmem>>, %arg9: memref<2x10xf32, #tpu.memory_space<vmem>>, %arg10: memref<14x448xbf16, #tpu.memory_space<vmem>>, %arg11: memref<12x384xf32, #tpu.memory_space<vmem>>) attributes {dimension_semantics = [], scalar_prefetch = 0 : i64, scratch_operands = 2 : i64, tpu.core_type = #tpu.core_type<tc>} {
    %cst = arith.constant 0.000000e+00 : f32
    %0 = vector.broadcast %cst : f32 to vector<14x448xf32>
    %c0 = arith.constant 0 : index
    %c0_0 = arith.constant 0 : index
    %1 = vector.load %arg0[%c0, %c0_0] : memref<32x16xf32, #tpu.memory_space<vmem>>, vector<14x16xf32>
    %2 = arith.truncf %1 : vector<14x16xf32> to vector<14x16xbf16>
    %c0_1 = arith.constant 0 : index
    %c0_2 = arith.constant 0 : index
    %c0_3 = arith.constant 0 : index
    %3 = vector.load %arg1[%c0_1, %c0_2, %c0_3] : memref<3x16x448xbf16, #tpu.memory_space<vmem>>, vector<1x16x448xbf16>
    %4 = vector.shape_cast %3 : vector<1x16x448xbf16> to vector<16x448xbf16>
    %cst_4 = arith.constant dense<0.000000e+00> : vector<14x448xf32>
    %5 = tpu.matmul %2, %4, %cst_4 {dimension_numbers = #tpu.dot_dimension_numbers<[1], [0], [0], [1], [0, 0, 1, 1], [], []>} : vector<14x16xbf16>, vector<16x448xbf16>, vector<14x448xf32> -> vector<14x448xf32>
    %6 = arith.addf %0, %5 : vector<14x448xf32>
    %c1 = arith.constant 1 : index
    %c0_5 = arith.constant 0 : index
    %7 = vector.load %arg0[%c1, %c0_5] : memref<32x16xf32, #tpu.memory_space<vmem>>, vector<14x16xf32>
    %8 = arith.truncf %7 : vector<14x16xf32> to vector<14x16xbf16>
    %c1_6 = arith.constant 1 : index
    %c0_7 = arith.constant 0 : index
    %c0_8 = arith.constant 0 : index
    %9 = vector.load %arg1[%c1_6, %c0_7, %c0_8] : memref<3x16x448xbf16, #tpu.memory_space<vmem>>, vector<1x16x448xbf16>
    %10 = vector.shape_cast %9 : vector<1x16x448xbf16> to vector<16x448xbf16>
    %cst_9 = arith.constant dense<0.000000e+00> : vector<14x448xf32>
    %11 = tpu.matmul %8, %10, %cst_9 {dimension_numbers = #tpu.dot_dimension_numbers<[1], [0], [0], [1], [0, 0, 1, 1], [], []>} : vector<14x16xbf16>, vector<16x448xbf16>, vector<14x448xf32> -> vector<14x448xf32>
    %12 = arith.addf %6, %11 : vector<14x448xf32>
    %c2 = arith.constant 2 : index
    %c0_10 = arith.constant 0 : index
    %13 = vector.load %arg0[%c2, %c0_10] : memref<32x16xf32, #tpu.memory_space<vmem>>, vector<14x16xf32>
    %14 = arith.truncf %13 : vector<14x16xf32> to vector<14x16xbf16>
    %c2_11 = arith.constant 2 : index
    %c0_12 = arith.constant 0 : index
    %c0_13 = arith.constant 0 : index
    %15 = vector.load %arg1[%c2_11, %c0_12, %c0_13] : memref<3x16x448xbf16, #tpu.memory_space<vmem>>, vector<1x16x448xbf16>
    %16 = vector.shape_cast %15 : vector<1x16x448xbf16> to vector<16x448xbf16>
    %cst_14 = arith.constant dense<0.000000e+00> : vector<14x448xf32>
    %17 = tpu.matmul %14, %16, %cst_14 {dimension_numbers = #tpu.dot_dimension_numbers<[1], [0], [0], [1], [0, 0, 1, 1], [], []>} : vector<14x16xbf16>, vector<16x448xbf16>, vector<14x448xf32> -> vector<14x448xf32>
    %18 = arith.addf %12, %17 : vector<14x448xf32>
    %c0_15 = arith.constant 0 : index
    %c0_16 = arith.constant 0 : index
    %19 = vector.load %arg2[%c0_15, %c0_16] : memref<1x448xf32, #tpu.memory_space<vmem>>, vector<1x448xf32>
    %20 = vector.broadcast %19 : vector<1x448xf32> to vector<14x448xf32>
    %21 = arith.addf %18, %20 : vector<14x448xf32>
    %cst_17 = arith.constant 0.000000e+00 : f32
    %22 = vector.broadcast %cst_17 : f32 to vector<14x448xf32>
    %23 = arith.maximumf %21, %22 : vector<14x448xf32>
    %24 = arith.truncf %23 : vector<14x448xf32> to vector<14x448xbf16>
    %c0_18 = arith.constant 0 : index
    %c0_19 = arith.constant 0 : index
    %25 = vector.load %arg10[%c0_18, %c0_19] : memref<14x448xbf16, #tpu.memory_space<vmem>>, vector<14x448xbf16>
    tpu.vector_store %arg10[%c0_18, %c0_19], %24 {strides = array<i32>} : memref<14x448xbf16, #tpu.memory_space<vmem>>, vector<14x448xbf16>,
    %cst_20 = arith.constant 0.000000e+00 : f32
    %26 = vector.broadcast %cst_20 : f32 to vector<12x384xf32>
    %c0_21 = arith.constant 0 : index
    %c0_22 = arith.constant 0 : index
    %27 = vector.load %arg10[%c0_21, %c0_22] : memref<14x448xbf16, #tpu.memory_space<vmem>>, vector<12x448xbf16>
    %c0_23 = arith.constant 0 : index
    %c0_24 = arith.constant 0 : index
    %c0_25 = arith.constant 0 : index
    %28 = vector.load %arg3[%c0_23, %c0_24, %c0_25] : memref<3x448x384xbf16, #tpu.memory_space<vmem>>, vector<1x448x384xbf16>
    %29 = vector.shape_cast %28 : vector<1x448x384xbf16> to vector<448x384xbf16>
    %cst_26 = arith.constant dense<0.000000e+00> : vector<12x384xf32>
    %30 = tpu.matmul %27, %29, %cst_26 {dimension_numbers = #tpu.dot_dimension_numbers<[1], [0], [0], [1], [0, 0, 1, 1], [], []>} : vector<12x448xbf16>, vector<448x384xbf16>, vector<12x384xf32> -> vector<12x384xf32>
    %31 = arith.addf %26, %30 : vector<12x384xf32>
    %c1_27 = arith.constant 1 : index
    %c0_28 = arith.constant 0 : index
    %32 = vector.load %arg10[%c1_27, %c0_28] : memref<14x448xbf16, #tpu.memory_space<vmem>>, vector<12x448xbf16>
    %c1_29 = arith.constant 1 : index
    %c0_30 = arith.constant 0 : index
    %c0_31 = arith.constant 0 : index
    %33 = vector.load %arg3[%c1_29, %c0_30, %c0_31] : memref<3x448x384xbf16, #tpu.memory_space<vmem>>, vector<1x448x384xbf16>
    %34 = vector.shape_cast %33 : vector<1x448x384xbf16> to vector<448x384xbf16>
    %cst_32 = arith.constant dense<0.000000e+00> : vector<12x384xf32>
    %35 = tpu.matmul %32, %34, %cst_32 {dimension_numbers = #tpu.dot_dimension_numbers<[1], [0], [0], [1], [0, 0, 1, 1], [], []>} : vector<12x448xbf16>, vector<448x384xbf16>, vector<12x384xf32> -> vector<12x384xf32>
    %36 = arith.addf %31, %35 : vector<12x384xf32>
    %c2_33 = arith.constant 2 : index
    %c0_34 = arith.constant 0 : index
    %37 = vector.load %arg10[%c2_33, %c0_34] : memref<14x448xbf16, #tpu.memory_space<vmem>>, vector<12x448xbf16>
    %c2_35 = arith.constant 2 : index
    %c0_36 = arith.constant 0 : index
    %c0_37 = arith.constant 0 : index
    %38 = vector.load %arg3[%c2_35, %c0_36, %c0_37] : memref<3x448x384xbf16, #tpu.memory_space<vmem>>, vector<1x448x384xbf16>
    %39 = vector.shape_cast %38 : vector<1x448x384xbf16> to vector<448x384xbf16>
    %cst_38 = arith.constant dense<0.000000e+00> : vector<12x384xf32>
    %40 = tpu.matmul %37, %39, %cst_38 {dimension_numbers = #tpu.dot_dimension_numbers<[1], [0], [0], [1], [0, 0, 1, 1], [], []>} : vector<12x448xbf16>, vector<448x384xbf16>, vector<12x384xf32> -> vector<12x384xf32>
    %41 = arith.addf %36, %40 : vector<12x384xf32>
    %c0_39 = arith.constant 0 : index
    %c0_40 = arith.constant 0 : index
    %42 = vector.load %arg4[%c0_39, %c0_40] : memref<1x384xf32, #tpu.memory_space<vmem>>, vector<1x384xf32>
    %43 = vector.broadcast %42 : vector<1x384xf32> to vector<12x384xf32>
    %44 = arith.addf %41, %43 : vector<12x384xf32>
    %cst_41 = arith.constant 0.000000e+00 : f32
    %45 = vector.broadcast %cst_41 : f32 to vector<12x384xf32>
    %46 = arith.maximumf %44, %45 : vector<12x384xf32>
    %c0_42 = arith.constant 0 : index
    %c0_43 = arith.constant 0 : index
    %47 = vector.load %arg11[%c0_42, %c0_43] : memref<12x384xf32, #tpu.memory_space<vmem>>, vector<12x384xf32>
    tpu.vector_store %arg11[%c0_42, %c0_43], %46 {strides = array<i32>} : memref<12x384xf32, #tpu.memory_space<vmem>>, vector<12x384xf32>,
    %cst_44 = arith.constant 0.000000e+00 : f32
    %48 = vector.broadcast %cst_44 : f32 to vector<1x128xf32>
    %c0_45 = arith.constant 0 : index
    %c0_46 = arith.constant 0 : index
    %49 = vector.load %arg11[%c0_45, %c0_46] : memref<12x384xf32, #tpu.memory_space<vmem>>, vector<1x352xf32>
    %c0_47 = arith.constant 0 : index
    %c32 = arith.constant 32 : index
    %50 = vector.load %arg11[%c0_47, %c32] : memref<12x384xf32, #tpu.memory_space<vmem>>, vector<1x352xf32>
    %c1_48 = arith.constant 1 : index
    %c0_49 = arith.constant 0 : index
    %51 = vector.load %arg11[%c1_48, %c0_49] : memref<12x384xf32, #tpu.memory_space<vmem>>, vector<1x352xf32>
    %c1_50 = arith.constant 1 : index
    %c32_51 = arith.constant 32 : index
    %52 = vector.load %arg11[%c1_50, %c32_51] : memref<12x384xf32, #tpu.memory_space<vmem>>, vector<1x352xf32>
    %53 = arith.maximumf %49, %50 : vector<1x352xf32>
    %54 = arith.maximumf %51, %52 : vector<1x352xf32>
    %55 = arith.maximumf %53, %54 : vector<1x352xf32>
    %56 = arith.truncf %55 : vector<1x352xf32> to vector<1x352xbf16>
    %c0_52 = arith.constant 0 : index
    %c0_53 = arith.constant 0 : index
    %c0_54 = arith.constant 0 : index
    %57 = vector.load %arg5[%c0_52, %c0_53, %c0_54] : memref<6x352x128xbf16, #tpu.memory_space<vmem>>, vector<1x352x128xbf16>
    %58 = vector.shape_cast %57 : vector<1x352x128xbf16> to vector<352x128xbf16>
    %cst_55 = arith.constant dense<0.000000e+00> : vector<1x128xf32>
    %59 = tpu.matmul %56, %58, %cst_55 {dimension_numbers = #tpu.dot_dimension_numbers<[1], [0], [0], [1], [0, 0, 1, 1], [], []>} : vector<1x352xbf16>, vector<352x128xbf16>, vector<1x128xf32> -> vector<1x128xf32>
    %60 = arith.addf %48, %59 : vector<1x128xf32>
    %c2_56 = arith.constant 2 : index
    %c0_57 = arith.constant 0 : index
    %61 = vector.load %arg11[%c2_56, %c0_57] : memref<12x384xf32, #tpu.memory_space<vmem>>, vector<1x352xf32>
    %c2_58 = arith.constant 2 : index
    %c32_59 = arith.constant 32 : index
    %62 = vector.load %arg11[%c2_58, %c32_59] : memref<12x384xf32, #tpu.memory_space<vmem>>, vector<1x352xf32>
    %c3 = arith.constant 3 : index
    %c0_60 = arith.constant 0 : index
    %63 = vector.load %arg11[%c3, %c0_60] : memref<12x384xf32, #tpu.memory_space<vmem>>, vector<1x352xf32>
    %c3_61 = arith.constant 3 : index
    %c32_62 = arith.constant 32 : index
    %64 = vector.load %arg11[%c3_61, %c32_62] : memref<12x384xf32, #tpu.memory_space<vmem>>, vector<1x352xf32>
    %65 = arith.maximumf %61, %62 : vector<1x352xf32>
    %66 = arith.maximumf %63, %64 : vector<1x352xf32>
    %67 = arith.maximumf %65, %66 : vector<1x352xf32>
    %68 = arith.truncf %67 : vector<1x352xf32> to vector<1x352xbf16>
    %c1_63 = arith.constant 1 : index
    %c0_64 = arith.constant 0 : index
    %c0_65 = arith.constant 0 : index
    %69 = vector.load %arg5[%c1_63, %c0_64, %c0_65] : memref<6x352x128xbf16, #tpu.memory_space<vmem>>, vector<1x352x128xbf16>
    %70 = vector.shape_cast %69 : vector<1x352x128xbf16> to vector<352x128xbf16>
    %cst_66 = arith.constant dense<0.000000e+00> : vector<1x128xf32>
    %71 = tpu.matmul %68, %70, %cst_66 {dimension_numbers = #tpu.dot_dimension_numbers<[1], [0], [0], [1], [0, 0, 1, 1], [], []>} : vector<1x352xbf16>, vector<352x128xbf16>, vector<1x128xf32> -> vector<1x128xf32>
    %72 = arith.addf %60, %71 : vector<1x128xf32>
    %c4 = arith.constant 4 : index
    %c0_67 = arith.constant 0 : index
    %73 = vector.load %arg11[%c4, %c0_67] : memref<12x384xf32, #tpu.memory_space<vmem>>, vector<1x352xf32>
    %c4_68 = arith.constant 4 : index
    %c32_69 = arith.constant 32 : index
    %74 = vector.load %arg11[%c4_68, %c32_69] : memref<12x384xf32, #tpu.memory_space<vmem>>, vector<1x352xf32>
    %c5 = arith.constant 5 : index
    %c0_70 = arith.constant 0 : index
    %75 = vector.load %arg11[%c5, %c0_70] : memref<12x384xf32, #tpu.memory_space<vmem>>, vector<1x352xf32>
    %c5_71 = arith.constant 5 : index
    %c32_72 = arith.constant 32 : index
    %76 = vector.load %arg11[%c5_71, %c32_72] : memref<12x384xf32, #tpu.memory_space<vmem>>, vector<1x352xf32>
    %77 = arith.maximumf %73, %74 : vector<1x352xf32>
    %78 = arith.maximumf %75, %76 : vector<1x352xf32>
    %79 = arith.maximumf %77, %78 : vector<1x352xf32>
    %80 = arith.truncf %79 : vector<1x352xf32> to vector<1x352xbf16>
    %c2_73 = arith.constant 2 : index
    %c0_74 = arith.constant 0 : index
    %c0_75 = arith.constant 0 : index
    %81 = vector.load %arg5[%c2_73, %c0_74, %c0_75] : memref<6x352x128xbf16, #tpu.memory_space<vmem>>, vector<1x352x128xbf16>
    %82 = vector.shape_cast %81 : vector<1x352x128xbf16> to vector<352x128xbf16>
    %cst_76 = arith.constant dense<0.000000e+00> : vector<1x128xf32>
    %83 = tpu.matmul %80, %82, %cst_76 {dimension_numbers = #tpu.dot_dimension_numbers<[1], [0], [0], [1], [0, 0, 1, 1], [], []>} : vector<1x352xbf16>, vector<352x128xbf16>, vector<1x128xf32> -> vector<1x128xf32>
    %84 = arith.addf %72, %83 : vector<1x128xf32>
    %c6 = arith.constant 6 : index
    %c0_77 = arith.constant 0 : index
    %85 = vector.load %arg11[%c6, %c0_77] : memref<12x384xf32, #tpu.memory_space<vmem>>, vector<1x352xf32>
    %c6_78 = arith.constant 6 : index
    %c32_79 = arith.constant 32 : index
    %86 = vector.load %arg11[%c6_78, %c32_79] : memref<12x384xf32, #tpu.memory_space<vmem>>, vector<1x352xf32>
    %c7 = arith.constant 7 : index
    %c0_80 = arith.constant 0 : index
    %87 = vector.load %arg11[%c7, %c0_80] : memref<12x384xf32, #tpu.memory_space<vmem>>, vector<1x352xf32>
    %c7_81 = arith.constant 7 : index
    %c32_82 = arith.constant 32 : index
    %88 = vector.load %arg11[%c7_81, %c32_82] : memref<12x384xf32, #tpu.memory_space<vmem>>, vector<1x352xf32>
    %89 = arith.maximumf %85, %86 : vector<1x352xf32>
    %90 = arith.maximumf %87, %88 : vector<1x352xf32>
    %91 = arith.maximumf %89, %90 : vector<1x352xf32>
    %92 = arith.truncf %91 : vector<1x352xf32> to vector<1x352xbf16>
    %c3_83 = arith.constant 3 : index
    %c0_84 = arith.constant 0 : index
    %c0_85 = arith.constant 0 : index
    %93 = vector.load %arg5[%c3_83, %c0_84, %c0_85] : memref<6x352x128xbf16, #tpu.memory_space<vmem>>, vector<1x352x128xbf16>
    %94 = vector.shape_cast %93 : vector<1x352x128xbf16> to vector<352x128xbf16>
    %cst_86 = arith.constant dense<0.000000e+00> : vector<1x128xf32>
    %95 = tpu.matmul %92, %94, %cst_86 {dimension_numbers = #tpu.dot_dimension_numbers<[1], [0], [0], [1], [0, 0, 1, 1], [], []>} : vector<1x352xbf16>, vector<352x128xbf16>, vector<1x128xf32> -> vector<1x128xf32>
    %96 = arith.addf %84, %95 : vector<1x128xf32>
    %c8 = arith.constant 8 : index
    %c0_87 = arith.constant 0 : index
    %97 = vector.load %arg11[%c8, %c0_87] : memref<12x384xf32, #tpu.memory_space<vmem>>, vector<1x352xf32>
    %c8_88 = arith.constant 8 : index
    %c32_89 = arith.constant 32 : index
    %98 = vector.load %arg11[%c8_88, %c32_89] : memref<12x384xf32, #tpu.memory_space<vmem>>, vector<1x352xf32>
    %c9 = arith.constant 9 : index
    %c0_90 = arith.constant 0 : index
    %99 = vector.load %arg11[%c9, %c0_90] : memref<12x384xf32, #tpu.memory_space<vmem>>, vector<1x352xf32>
    %c9_91 = arith.constant 9 : index
    %c32_92 = arith.constant 32 : index
    %100 = vector.load %arg11[%c9_91, %c32_92] : memref<12x384xf32, #tpu.memory_space<vmem>>, vector<1x352xf32>
    %101 = arith.maximumf %97, %98 : vector<1x352xf32>
    %102 = arith.maximumf %99, %100 : vector<1x352xf32>
    %103 = arith.maximumf %101, %102 : vector<1x352xf32>
    %104 = arith.truncf %103 : vector<1x352xf32> to vector<1x352xbf16>
    %c4_93 = arith.constant 4 : index
    %c0_94 = arith.constant 0 : index
    %c0_95 = arith.constant 0 : index
    %105 = vector.load %arg5[%c4_93, %c0_94, %c0_95] : memref<6x352x128xbf16, #tpu.memory_space<vmem>>, vector<1x352x128xbf16>
    %106 = vector.shape_cast %105 : vector<1x352x128xbf16> to vector<352x128xbf16>
    %cst_96 = arith.constant dense<0.000000e+00> : vector<1x128xf32>
    %107 = tpu.matmul %104, %106, %cst_96 {dimension_numbers = #tpu.dot_dimension_numbers<[1], [0], [0], [1], [0, 0, 1, 1], [], []>} : vector<1x352xbf16>, vector<352x128xbf16>, vector<1x128xf32> -> vector<1x128xf32>
    %108 = arith.addf %96, %107 : vector<1x128xf32>
    %c10 = arith.constant 10 : index
    %c0_97 = arith.constant 0 : index
    %109 = vector.load %arg11[%c10, %c0_97] : memref<12x384xf32, #tpu.memory_space<vmem>>, vector<1x352xf32>
    %c10_98 = arith.constant 10 : index
    %c32_99 = arith.constant 32 : index
    %110 = vector.load %arg11[%c10_98, %c32_99] : memref<12x384xf32, #tpu.memory_space<vmem>>, vector<1x352xf32>
    %c11 = arith.constant 11 : index
    %c0_100 = arith.constant 0 : index
    %111 = vector.load %arg11[%c11, %c0_100] : memref<12x384xf32, #tpu.memory_space<vmem>>, vector<1x352xf32>
    %c11_101 = arith.constant 11 : index
    %c32_102 = arith.constant 32 : index
    %112 = vector.load %arg11[%c11_101, %c32_102] : memref<12x384xf32, #tpu.memory_space<vmem>>, vector<1x352xf32>
    %113 = arith.maximumf %109, %110 : vector<1x352xf32>
    %114 = arith.maximumf %111, %112 : vector<1x352xf32>
    %115 = arith.maximumf %113, %114 : vector<1x352xf32>
    %116 = arith.truncf %115 : vector<1x352xf32> to vector<1x352xbf16>
    %c5_103 = arith.constant 5 : index
    %c0_104 = arith.constant 0 : index
    %c0_105 = arith.constant 0 : index
    %117 = vector.load %arg5[%c5_103, %c0_104, %c0_105] : memref<6x352x128xbf16, #tpu.memory_space<vmem>>, vector<1x352x128xbf16>
    %118 = vector.shape_cast %117 : vector<1x352x128xbf16> to vector<352x128xbf16>
    %cst_106 = arith.constant dense<0.000000e+00> : vector<1x128xf32>
    %119 = tpu.matmul %116, %118, %cst_106 {dimension_numbers = #tpu.dot_dimension_numbers<[1], [0], [0], [1], [0, 0, 1, 1], [], []>} : vector<1x352xbf16>, vector<352x128xbf16>, vector<1x128xf32> -> vector<1x128xf32>
    %120 = arith.addf %108, %119 : vector<1x128xf32>
    %c0_107 = arith.constant 0 : index
    %c0_108 = arith.constant 0 : index
    %121 = vector.load %arg6[%c0_107, %c0_108] : memref<1x128xf32, #tpu.memory_space<vmem>>, vector<1x128xf32>
    %122 = arith.addf %120, %121 : vector<1x128xf32>
    %cst_109 = arith.constant 0.000000e+00 : f32
    %123 = vector.broadcast %cst_109 : f32 to vector<1x128xf32>
    %124 = arith.maximumf %122, %123 : vector<1x128xf32>
    %125 = arith.truncf %124 : vector<1x128xf32> to vector<1x128xbf16>
    %c0_110 = arith.constant 0 : index
    %c0_111 = arith.constant 0 : index
    %126 = vector.load %arg7[%c0_110, %c0_111] : memref<128x10xbf16, #tpu.memory_space<vmem>>, vector<128x10xbf16>
    %cst_112 = arith.constant dense<0.000000e+00> : vector<1x10xf32>
    %127 = tpu.matmul %125, %126, %cst_112 {dimension_numbers = #tpu.dot_dimension_numbers<[1], [0], [0], [1], [0, 0, 1, 1], [], []>} : vector<1x128xbf16>, vector<128x10xbf16>, vector<1x10xf32> -> vector<1x10xf32>
    %c0_113 = arith.constant 0 : index
    %c0_114 = arith.constant 0 : index
    %128 = vector.load %arg8[%c0_113, %c0_114] : memref<1x10xf32, #tpu.memory_space<vmem>>, vector<1x10xf32>
    %129 = arith.addf %127, %128 : vector<1x10xf32>
    %c0_115 = arith.constant 0 : index
    %c0_116 = arith.constant 0 : index
    %130 = vector.load %arg9[%c0_115, %c0_116] : memref<2x10xf32, #tpu.memory_space<vmem>>, vector<1x10xf32>
    tpu.vector_store %arg9[%c0_115, %c0_116], %129 {strides = array<i32>} : memref<2x10xf32, #tpu.memory_space<vmem>>, vector<1x10xf32>,
    %cst_117 = arith.constant 0.000000e+00 : f32
    %131 = vector.broadcast %cst_117 : f32 to vector<14x448xf32>
    %c16 = arith.constant 16 : index
    %c0_118 = arith.constant 0 : index
    %132 = vector.load %arg0[%c16, %c0_118] : memref<32x16xf32, #tpu.memory_space<vmem>>, vector<14x16xf32>
    %133 = arith.truncf %132 : vector<14x16xf32> to vector<14x16xbf16>
    %c0_119 = arith.constant 0 : index
    %c0_120 = arith.constant 0 : index
    %c0_121 = arith.constant 0 : index
    %134 = vector.load %arg1[%c0_119, %c0_120, %c0_121] : memref<3x16x448xbf16, #tpu.memory_space<vmem>>, vector<1x16x448xbf16>
    %135 = vector.shape_cast %134 : vector<1x16x448xbf16> to vector<16x448xbf16>
    %cst_122 = arith.constant dense<0.000000e+00> : vector<14x448xf32>
    %136 = tpu.matmul %133, %135, %cst_122 {dimension_numbers = #tpu.dot_dimension_numbers<[1], [0], [0], [1], [0, 0, 1, 1], [], []>} : vector<14x16xbf16>, vector<16x448xbf16>, vector<14x448xf32> -> vector<14x448xf32>
    %137 = arith.addf %131, %136 : vector<14x448xf32>
    %c17 = arith.constant 17 : index
    %c0_123 = arith.constant 0 : index
    %138 = vector.load %arg0[%c17, %c0_123] : memref<32x16xf32, #tpu.memory_space<vmem>>, vector<14x16xf32>
    %139 = arith.truncf %138 : vector<14x16xf32> to vector<14x16xbf16>
    %c1_124 = arith.constant 1 : index
    %c0_125 = arith.constant 0 : index
    %c0_126 = arith.constant 0 : index
    %140 = vector.load %arg1[%c1_124, %c0_125, %c0_126] : memref<3x16x448xbf16, #tpu.memory_space<vmem>>, vector<1x16x448xbf16>
    %141 = vector.shape_cast %140 : vector<1x16x448xbf16> to vector<16x448xbf16>
    %cst_127 = arith.constant dense<0.000000e+00> : vector<14x448xf32>
    %142 = tpu.matmul %139, %141, %cst_127 {dimension_numbers = #tpu.dot_dimension_numbers<[1], [0], [0], [1], [0, 0, 1, 1], [], []>} : vector<14x16xbf16>, vector<16x448xbf16>, vector<14x448xf32> -> vector<14x448xf32>
    %143 = arith.addf %137, %142 : vector<14x448xf32>
    %c18 = arith.constant 18 : index
    %c0_128 = arith.constant 0 : index
    %144 = vector.load %arg0[%c18, %c0_128] : memref<32x16xf32, #tpu.memory_space<vmem>>, vector<14x16xf32>
    %145 = arith.truncf %144 : vector<14x16xf32> to vector<14x16xbf16>
    %c2_129 = arith.constant 2 : index
    %c0_130 = arith.constant 0 : index
    %c0_131 = arith.constant 0 : index
    %146 = vector.load %arg1[%c2_129, %c0_130, %c0_131] : memref<3x16x448xbf16, #tpu.memory_space<vmem>>, vector<1x16x448xbf16>
    %147 = vector.shape_cast %146 : vector<1x16x448xbf16> to vector<16x448xbf16>
    %cst_132 = arith.constant dense<0.000000e+00> : vector<14x448xf32>
    %148 = tpu.matmul %145, %147, %cst_132 {dimension_numbers = #tpu.dot_dimension_numbers<[1], [0], [0], [1], [0, 0, 1, 1], [], []>} : vector<14x16xbf16>, vector<16x448xbf16>, vector<14x448xf32> -> vector<14x448xf32>
    %149 = arith.addf %143, %148 : vector<14x448xf32>
    %c0_133 = arith.constant 0 : index
    %c0_134 = arith.constant 0 : index
    %150 = vector.load %arg2[%c0_133, %c0_134] : memref<1x448xf32, #tpu.memory_space<vmem>>, vector<1x448xf32>
    %151 = vector.broadcast %150 : vector<1x448xf32> to vector<14x448xf32>
    %152 = arith.addf %149, %151 : vector<14x448xf32>
    %cst_135 = arith.constant 0.000000e+00 : f32
    %153 = vector.broadcast %cst_135 : f32 to vector<14x448xf32>
    %154 = arith.maximumf %152, %153 : vector<14x448xf32>
    %155 = arith.truncf %154 : vector<14x448xf32> to vector<14x448xbf16>
    %c0_136 = arith.constant 0 : index
    %c0_137 = arith.constant 0 : index
    %156 = vector.load %arg10[%c0_136, %c0_137] : memref<14x448xbf16, #tpu.memory_space<vmem>>, vector<14x448xbf16>
    tpu.vector_store %arg10[%c0_136, %c0_137], %155 {strides = array<i32>} : memref<14x448xbf16, #tpu.memory_space<vmem>>, vector<14x448xbf16>,
    %cst_138 = arith.constant 0.000000e+00 : f32
    %157 = vector.broadcast %cst_138 : f32 to vector<12x384xf32>
    %c0_139 = arith.constant 0 : index
    %c0_140 = arith.constant 0 : index
    %158 = vector.load %arg10[%c0_139, %c0_140] : memref<14x448xbf16, #tpu.memory_space<vmem>>, vector<12x448xbf16>
    %c0_141 = arith.constant 0 : index
    %c0_142 = arith.constant 0 : index
    %c0_143 = arith.constant 0 : index
    %159 = vector.load %arg3[%c0_141, %c0_142, %c0_143] : memref<3x448x384xbf16, #tpu.memory_space<vmem>>, vector<1x448x384xbf16>
    %160 = vector.shape_cast %159 : vector<1x448x384xbf16> to vector<448x384xbf16>
    %cst_144 = arith.constant dense<0.000000e+00> : vector<12x384xf32>
    %161 = tpu.matmul %158, %160, %cst_144 {dimension_numbers = #tpu.dot_dimension_numbers<[1], [0], [0], [1], [0, 0, 1, 1], [], []>} : vector<12x448xbf16>, vector<448x384xbf16>, vector<12x384xf32> -> vector<12x384xf32>
    %162 = arith.addf %157, %161 : vector<12x384xf32>
    %c1_145 = arith.constant 1 : index
    %c0_146 = arith.constant 0 : index
    %163 = vector.load %arg10[%c1_145, %c0_146] : memref<14x448xbf16, #tpu.memory_space<vmem>>, vector<12x448xbf16>
    %c1_147 = arith.constant 1 : index
    %c0_148 = arith.constant 0 : index
    %c0_149 = arith.constant 0 : index
    %164 = vector.load %arg3[%c1_147, %c0_148, %c0_149] : memref<3x448x384xbf16, #tpu.memory_space<vmem>>, vector<1x448x384xbf16>
    %165 = vector.shape_cast %164 : vector<1x448x384xbf16> to vector<448x384xbf16>
    %cst_150 = arith.constant dense<0.000000e+00> : vector<12x384xf32>
    %166 = tpu.matmul %163, %165, %cst_150 {dimension_numbers = #tpu.dot_dimension_numbers<[1], [0], [0], [1], [0, 0, 1, 1], [], []>} : vector<12x448xbf16>, vector<448x384xbf16>, vector<12x384xf32> -> vector<12x384xf32>
    %167 = arith.addf %162, %166 : vector<12x384xf32>
    %c2_151 = arith.constant 2 : index
    %c0_152 = arith.constant 0 : index
    %168 = vector.load %arg10[%c2_151, %c0_152] : memref<14x448xbf16, #tpu.memory_space<vmem>>, vector<12x448xbf16>
    %c2_153 = arith.constant 2 : index
    %c0_154 = arith.constant 0 : index
    %c0_155 = arith.constant 0 : index
    %169 = vector.load %arg3[%c2_153, %c0_154, %c0_155] : memref<3x448x384xbf16, #tpu.memory_space<vmem>>, vector<1x448x384xbf16>
    %170 = vector.shape_cast %169 : vector<1x448x384xbf16> to vector<448x384xbf16>
    %cst_156 = arith.constant dense<0.000000e+00> : vector<12x384xf32>
    %171 = tpu.matmul %168, %170, %cst_156 {dimension_numbers = #tpu.dot_dimension_numbers<[1], [0], [0], [1], [0, 0, 1, 1], [], []>} : vector<12x448xbf16>, vector<448x384xbf16>, vector<12x384xf32> -> vector<12x384xf32>
    %172 = arith.addf %167, %171 : vector<12x384xf32>
    %c0_157 = arith.constant 0 : index
    %c0_158 = arith.constant 0 : index
    %173 = vector.load %arg4[%c0_157, %c0_158] : memref<1x384xf32, #tpu.memory_space<vmem>>, vector<1x384xf32>
    %174 = vector.broadcast %173 : vector<1x384xf32> to vector<12x384xf32>
    %175 = arith.addf %172, %174 : vector<12x384xf32>
    %cst_159 = arith.constant 0.000000e+00 : f32
    %176 = vector.broadcast %cst_159 : f32 to vector<12x384xf32>
    %177 = arith.maximumf %175, %176 : vector<12x384xf32>
    %c0_160 = arith.constant 0 : index
    %c0_161 = arith.constant 0 : index
    %178 = vector.load %arg11[%c0_160, %c0_161] : memref<12x384xf32, #tpu.memory_space<vmem>>, vector<12x384xf32>
    tpu.vector_store %arg11[%c0_160, %c0_161], %177 {strides = array<i32>} : memref<12x384xf32, #tpu.memory_space<vmem>>, vector<12x384xf32>,
    %cst_162 = arith.constant 0.000000e+00 : f32
    %179 = vector.broadcast %cst_162 : f32 to vector<1x128xf32>
    %c0_163 = arith.constant 0 : index
    %c0_164 = arith.constant 0 : index
    %180 = vector.load %arg11[%c0_163, %c0_164] : memref<12x384xf32, #tpu.memory_space<vmem>>, vector<1x352xf32>
    %c0_165 = arith.constant 0 : index
    %c32_166 = arith.constant 32 : index
    %181 = vector.load %arg11[%c0_165, %c32_166] : memref<12x384xf32, #tpu.memory_space<vmem>>, vector<1x352xf32>
    %c1_167 = arith.constant 1 : index
    %c0_168 = arith.constant 0 : index
    %182 = vector.load %arg11[%c1_167, %c0_168] : memref<12x384xf32, #tpu.memory_space<vmem>>, vector<1x352xf32>
    %c1_169 = arith.constant 1 : index
    %c32_170 = arith.constant 32 : index
    %183 = vector.load %arg11[%c1_169, %c32_170] : memref<12x384xf32, #tpu.memory_space<vmem>>, vector<1x352xf32>
    %184 = arith.maximumf %180, %181 : vector<1x352xf32>
    %185 = arith.maximumf %182, %183 : vector<1x352xf32>
    %186 = arith.maximumf %184, %185 : vector<1x352xf32>
    %187 = arith.truncf %186 : vector<1x352xf32> to vector<1x352xbf16>
    %c0_171 = arith.constant 0 : index
    %c0_172 = arith.constant 0 : index
    %c0_173 = arith.constant 0 : index
    %188 = vector.load %arg5[%c0_171, %c0_172, %c0_173] : memref<6x352x128xbf16, #tpu.memory_space<vmem>>, vector<1x352x128xbf16>
    %189 = vector.shape_cast %188 : vector<1x352x128xbf16> to vector<352x128xbf16>
    %cst_174 = arith.constant dense<0.000000e+00> : vector<1x128xf32>
    %190 = tpu.matmul %187, %189, %cst_174 {dimension_numbers = #tpu.dot_dimension_numbers<[1], [0], [0], [1], [0, 0, 1, 1], [], []>} : vector<1x352xbf16>, vector<352x128xbf16>, vector<1x128xf32> -> vector<1x128xf32>
    %191 = arith.addf %179, %190 : vector<1x128xf32>
    %c2_175 = arith.constant 2 : index
    %c0_176 = arith.constant 0 : index
    %192 = vector.load %arg11[%c2_175, %c0_176] : memref<12x384xf32, #tpu.memory_space<vmem>>, vector<1x352xf32>
    %c2_177 = arith.constant 2 : index
    %c32_178 = arith.constant 32 : index
    %193 = vector.load %arg11[%c2_177, %c32_178] : memref<12x384xf32, #tpu.memory_space<vmem>>, vector<1x352xf32>
    %c3_179 = arith.constant 3 : index
    %c0_180 = arith.constant 0 : index
    %194 = vector.load %arg11[%c3_179, %c0_180] : memref<12x384xf32, #tpu.memory_space<vmem>>, vector<1x352xf32>
    %c3_181 = arith.constant 3 : index
    %c32_182 = arith.constant 32 : index
    %195 = vector.load %arg11[%c3_181, %c32_182] : memref<12x384xf32, #tpu.memory_space<vmem>>, vector<1x352xf32>
    %196 = arith.maximumf %192, %193 : vector<1x352xf32>
    %197 = arith.maximumf %194, %195 : vector<1x352xf32>
    %198 = arith.maximumf %196, %197 : vector<1x352xf32>
    %199 = arith.truncf %198 : vector<1x352xf32> to vector<1x352xbf16>
    %c1_183 = arith.constant 1 : index
    %c0_184 = arith.constant 0 : index
    %c0_185 = arith.constant 0 : index
    %200 = vector.load %arg5[%c1_183, %c0_184, %c0_185] : memref<6x352x128xbf16, #tpu.memory_space<vmem>>, vector<1x352x128xbf16>
    %201 = vector.shape_cast %200 : vector<1x352x128xbf16> to vector<352x128xbf16>
    %cst_186 = arith.constant dense<0.000000e+00> : vector<1x128xf32>
    %202 = tpu.matmul %199, %201, %cst_186 {dimension_numbers = #tpu.dot_dimension_numbers<[1], [0], [0], [1], [0, 0, 1, 1], [], []>} : vector<1x352xbf16>, vector<352x128xbf16>, vector<1x128xf32> -> vector<1x128xf32>
    %203 = arith.addf %191, %202 : vector<1x128xf32>
    %c4_187 = arith.constant 4 : index
    %c0_188 = arith.constant 0 : index
    %204 = vector.load %arg11[%c4_187, %c0_188] : memref<12x384xf32, #tpu.memory_space<vmem>>, vector<1x352xf32>
    %c4_189 = arith.constant 4 : index
    %c32_190 = arith.constant 32 : index
    %205 = vector.load %arg11[%c4_189, %c32_190] : memref<12x384xf32, #tpu.memory_space<vmem>>, vector<1x352xf32>
    %c5_191 = arith.constant 5 : index
    %c0_192 = arith.constant 0 : index
    %206 = vector.load %arg11[%c5_191, %c0_192] : memref<12x384xf32, #tpu.memory_space<vmem>>, vector<1x352xf32>
    %c5_193 = arith.constant 5 : index
    %c32_194 = arith.constant 32 : index
    %207 = vector.load %arg11[%c5_193, %c32_194] : memref<12x384xf32, #tpu.memory_space<vmem>>, vector<1x352xf32>
    %208 = arith.maximumf %204, %205 : vector<1x352xf32>
    %209 = arith.maximumf %206, %207 : vector<1x352xf32>
    %210 = arith.maximumf %208, %209 : vector<1x352xf32>
    %211 = arith.truncf %210 : vector<1x352xf32> to vector<1x352xbf16>
    %c2_195 = arith.constant 2 : index
    %c0_196 = arith.constant 0 : index
    %c0_197 = arith.constant 0 : index
    %212 = vector.load %arg5[%c2_195, %c0_196, %c0_197] : memref<6x352x128xbf16, #tpu.memory_space<vmem>>, vector<1x352x128xbf16>
    %213 = vector.shape_cast %212 : vector<1x352x128xbf16> to vector<352x128xbf16>
    %cst_198 = arith.constant dense<0.000000e+00> : vector<1x128xf32>
    %214 = tpu.matmul %211, %213, %cst_198 {dimension_numbers = #tpu.dot_dimension_numbers<[1], [0], [0], [1], [0, 0, 1, 1], [], []>} : vector<1x352xbf16>, vector<352x128xbf16>, vector<1x128xf32> -> vector<1x128xf32>
    %215 = arith.addf %203, %214 : vector<1x128xf32>
    %c6_199 = arith.constant 6 : index
    %c0_200 = arith.constant 0 : index
    %216 = vector.load %arg11[%c6_199, %c0_200] : memref<12x384xf32, #tpu.memory_space<vmem>>, vector<1x352xf32>
    %c6_201 = arith.constant 6 : index
    %c32_202 = arith.constant 32 : index
    %217 = vector.load %arg11[%c6_201, %c32_202] : memref<12x384xf32, #tpu.memory_space<vmem>>, vector<1x352xf32>
    %c7_203 = arith.constant 7 : index
    %c0_204 = arith.constant 0 : index
    %218 = vector.load %arg11[%c7_203, %c0_204] : memref<12x384xf32, #tpu.memory_space<vmem>>, vector<1x352xf32>
    %c7_205 = arith.constant 7 : index
    %c32_206 = arith.constant 32 : index
    %219 = vector.load %arg11[%c7_205, %c32_206] : memref<12x384xf32, #tpu.memory_space<vmem>>, vector<1x352xf32>
    %220 = arith.maximumf %216, %217 : vector<1x352xf32>
    %221 = arith.maximumf %218, %219 : vector<1x352xf32>
    %222 = arith.maximumf %220, %221 : vector<1x352xf32>
    %223 = arith.truncf %222 : vector<1x352xf32> to vector<1x352xbf16>
    %c3_207 = arith.constant 3 : index
    %c0_208 = arith.constant 0 : index
    %c0_209 = arith.constant 0 : index
    %224 = vector.load %arg5[%c3_207, %c0_208, %c0_209] : memref<6x352x128xbf16, #tpu.memory_space<vmem>>, vector<1x352x128xbf16>
    %225 = vector.shape_cast %224 : vector<1x352x128xbf16> to vector<352x128xbf16>
    %cst_210 = arith.constant dense<0.000000e+00> : vector<1x128xf32>
    %226 = tpu.matmul %223, %225, %cst_210 {dimension_numbers = #tpu.dot_dimension_numbers<[1], [0], [0], [1], [0, 0, 1, 1], [], []>} : vector<1x352xbf16>, vector<352x128xbf16>, vector<1x128xf32> -> vector<1x128xf32>
    %227 = arith.addf %215, %226 : vector<1x128xf32>
    %c8_211 = arith.constant 8 : index
    %c0_212 = arith.constant 0 : index
    %228 = vector.load %arg11[%c8_211, %c0_212] : memref<12x384xf32, #tpu.memory_space<vmem>>, vector<1x352xf32>
    %c8_213 = arith.constant 8 : index
    %c32_214 = arith.constant 32 : index
    %229 = vector.load %arg11[%c8_213, %c32_214] : memref<12x384xf32, #tpu.memory_space<vmem>>, vector<1x352xf32>
    %c9_215 = arith.constant 9 : index
    %c0_216 = arith.constant 0 : index
    %230 = vector.load %arg11[%c9_215, %c0_216] : memref<12x384xf32, #tpu.memory_space<vmem>>, vector<1x352xf32>
    %c9_217 = arith.constant 9 : index
    %c32_218 = arith.constant 32 : index
    %231 = vector.load %arg11[%c9_217, %c32_218] : memref<12x384xf32, #tpu.memory_space<vmem>>, vector<1x352xf32>
    %232 = arith.maximumf %228, %229 : vector<1x352xf32>
    %233 = arith.maximumf %230, %231 : vector<1x352xf32>
    %234 = arith.maximumf %232, %233 : vector<1x352xf32>
    %235 = arith.truncf %234 : vector<1x352xf32> to vector<1x352xbf16>
    %c4_219 = arith.constant 4 : index
    %c0_220 = arith.constant 0 : index
    %c0_221 = arith.constant 0 : index
    %236 = vector.load %arg5[%c4_219, %c0_220, %c0_221] : memref<6x352x128xbf16, #tpu.memory_space<vmem>>, vector<1x352x128xbf16>
    %237 = vector.shape_cast %236 : vector<1x352x128xbf16> to vector<352x128xbf16>
    %cst_222 = arith.constant dense<0.000000e+00> : vector<1x128xf32>
    %238 = tpu.matmul %235, %237, %cst_222 {dimension_numbers = #tpu.dot_dimension_numbers<[1], [0], [0], [1], [0, 0, 1, 1], [], []>} : vector<1x352xbf16>, vector<352x128xbf16>, vector<1x128xf32> -> vector<1x128xf32>
    %239 = arith.addf %227, %238 : vector<1x128xf32>
    %c10_223 = arith.constant 10 : index
    %c0_224 = arith.constant 0 : index
    %240 = vector.load %arg11[%c10_223, %c0_224] : memref<12x384xf32, #tpu.memory_space<vmem>>, vector<1x352xf32>
    %c10_225 = arith.constant 10 : index
    %c32_226 = arith.constant 32 : index
    %241 = vector.load %arg11[%c10_225, %c32_226] : memref<12x384xf32, #tpu.memory_space<vmem>>, vector<1x352xf32>
    %c11_227 = arith.constant 11 : index
    %c0_228 = arith.constant 0 : index
    %242 = vector.load %arg11[%c11_227, %c0_228] : memref<12x384xf32, #tpu.memory_space<vmem>>, vector<1x352xf32>
    %c11_229 = arith.constant 11 : index
    %c32_230 = arith.constant 32 : index
    %243 = vector.load %arg11[%c11_229, %c32_230] : memref<12x384xf32, #tpu.memory_space<vmem>>, vector<1x352xf32>
    %244 = arith.maximumf %240, %241 : vector<1x352xf32>
    %245 = arith.maximumf %242, %243 : vector<1x352xf32>
    %246 = arith.maximumf %244, %245 : vector<1x352xf32>
    %247 = arith.truncf %246 : vector<1x352xf32> to vector<1x352xbf16>
    %c5_231 = arith.constant 5 : index
    %c0_232 = arith.constant 0 : index
    %c0_233 = arith.constant 0 : index
    %248 = vector.load %arg5[%c5_231, %c0_232, %c0_233] : memref<6x352x128xbf16, #tpu.memory_space<vmem>>, vector<1x352x128xbf16>
    %249 = vector.shape_cast %248 : vector<1x352x128xbf16> to vector<352x128xbf16>
    %cst_234 = arith.constant dense<0.000000e+00> : vector<1x128xf32>
    %250 = tpu.matmul %247, %249, %cst_234 {dimension_numbers = #tpu.dot_dimension_numbers<[1], [0], [0], [1], [0, 0, 1, 1], [], []>} : vector<1x352xbf16>, vector<352x128xbf16>, vector<1x128xf32> -> vector<1x128xf32>
    %251 = arith.addf %239, %250 : vector<1x128xf32>
    %c0_235 = arith.constant 0 : index
    %c0_236 = arith.constant 0 : index
    %252 = vector.load %arg6[%c0_235, %c0_236] : memref<1x128xf32, #tpu.memory_space<vmem>>, vector<1x128xf32>
    %253 = arith.addf %251, %252 : vector<1x128xf32>
    %cst_237 = arith.constant 0.000000e+00 : f32
    %254 = vector.broadcast %cst_237 : f32 to vector<1x128xf32>
    %255 = arith.maximumf %253, %254 : vector<1x128xf32>
    %256 = arith.truncf %255 : vector<1x128xf32> to vector<1x128xbf16>
    %c0_238 = arith.constant 0 : index
    %c0_239 = arith.constant 0 : index
    %257 = vector.load %arg7[%c0_238, %c0_239] : memref<128x10xbf16, #tpu.memory_space<vmem>>, vector<128x10xbf16>
    %cst_240 = arith.constant dense<0.000000e+00> : vector<1x10xf32>
    %258 = tpu.matmul %256, %257, %cst_240 {dimension_numbers = #tpu.dot_dimension_numbers<[1], [0], [0], [1], [0, 0, 1, 1], [], []>} : vector<1x128xbf16>, vector<128x10xbf16>, vector<1x10xf32> -> vector<1x10xf32>
    %c0_241 = arith.constant 0 : index
    %c0_242 = arith.constant 0 : index
    %259 = vector.load %arg8[%c0_241, %c0_242] : memref<1x10xf32, #tpu.memory_space<vmem>>, vector<1x10xf32>
    %260 = arith.addf %258, %259 : vector<1x10xf32>
    %c1_243 = arith.constant 1 : index
    %c0_244 = arith.constant 0 : index
    %261 = vector.load %arg9[%c1_243, %c0_244] : memref<2x10xf32, #tpu.memory_space<vmem>>, vector<1x10xf32>
    tpu.vector_store %arg9[%c1_243, %c0_244], %260 {strides = array<i32>} : memref<2x10xf32, #tpu.memory_space<vmem>>, vector<1x10xf32>,
    return
  }
}

</mosaic_0001>

<bundles_post_ra>
// kernel: cnn_classifier_forward.1
= control target key start
LH: loop header
LB: loop body
LE: loop exit
PB: predicated region body
PF: predicated region fallthrough
CT: control target
= control target key end

     0   :  { %14 = vsyncpa [#allocation5], 0  ;;  %s13063_s0 = inlined_call_operand.vmem [shape: f32[32,16], index: 0, kind: input, shape index: {}]   ;;  %s13064_s1 = inlined_call_operand.hbm [shape: bf16[3,16,448], index: 1, kind: input, shape index: {}]   ;;  %s13065_s2 = inlined_call_operand.vmem [shape: f32[1,448], index: 2, kind: input, shape index: {}]   ;;  %s13066_s3 = inlined_call_operand.hbm [shape: bf16[3,448,384], index: 3, kind: input, shape index: {}]   ;;  %s13067_s4 = inlined_call_operand.vmem [shape: f32[1,384], index: 4, kind: input, shape index: {}]   ;;  %s13068_s5 = inlined_call_operand.hbm [shape: bf16[6,352,128], index: 5, kind: input, shape index: {}]   ;;  %s13069_s6 = inlined_call_operand.vmem [shape: f32[1,128], index: 6, kind: input, shape index: {}]   ;;  %s13070_s7 = inlined_call_operand.vmem [shape: bf16[128,10], index: 7, kind: input, shape index: {}]   ;;  %s13071_s8 = inlined_call_operand.vmem [shape: f32[1,10], index: 8, kind: input, shape index: {}]   ;;  %s13072_s9 = inlined_call_operand.hbm [shape: f32[2,10], index: 9, kind: output, shape index: {}]  }
   0x1   :  { %15 = vsyncpa [#allocation8], 0 }
   0x2   :  { %16 = vsyncpa [#allocation6], 0  ;;  %s12232_s30 = smov [#allocation7]   ;;  %s12138_s13 = scalar_lea.hbm %s13066_s3, 32256 }
   0x3   :  { %s38_s10 = sshll.u32 %s12232_s30, 4  ;;  %p12139_p0 = scmp.ne.s32.totalorder %s13066_s3, %s12138_s13  ;;  %s39_s10 = int_to_ptr.vmem [resolvable:$true] %s38_s10 }
   0x4   :  { %p12142_p1 = scmp.lt.u32.totalorder %s12138_s13, %s13066_s3 }
   0x6   :  { %p12144_p2 = pnand %p12142_p1, %p12139_p0 }
   0x8   :  { %12147 = shalt.err (!%p12144_p2)
}
   0x9   :  { %s12148_s18 = scalar_lea.vmem %s39_s10, 32256  ;;  %p12153_p4 = scmp.lt.s32.totalorder %s39_s10, %s39_s10 }
   0xa   :  { %p12149_p3 = scmp.ne.s32.totalorder %s39_s10, %s12148_s18  ;;  %p12154_p5 = scmp.lt.s32.totalorder %s12148_s18, %s12148_s18 }
   0xc   :  { %p12155_p6 = por %p12154_p5, %p12153_p4 }
   0xe   :  { %p12156_p7 = pnand %p12155_p6, %p12149_p3 }
  0x10   :  { %12159 = shalt.err (!%p12156_p7)
}
  0x11   :  { %s12233_s19 = smov 192   ;;  %s12234_s20 = smov 12  }
  0x12   :  { %44 = dma.hbm_to_vmem [thread:$0]  %s13066_s3, 32256, %s39_s10, [#allocation8], %s12233_s19, %s12233_s19, %s12234_s20  }
  0x13   :  { %s12235_s23 = smov [#allocation4]   ;;  %s12160_s27 = scalar_lea.hbm %s13064_s1, 1536 }
  0x14   :  { %s24_s24 = sshll.u32 %s12235_s23, 4  ;;  %p12161_p8 = scmp.ne.s32.totalorder %s13064_s1, %s12160_s27  ;;  %s25_s24 = int_to_ptr.vmem [resolvable:$true] %s24_s24 }
  0x15   :  { %p12164_p9 = scmp.lt.u32.totalorder %s12160_s27, %s13064_s1 }
  0x17   :  { %p12166_p10 = pnand %p12164_p9, %p12161_p8 }
  0x19   :  { %12169 = shalt.err (!%p12166_p10)
}
  0x1a   :  { %s12170_s12 = scalar_lea.vmem %s25_s24, 1536  ;;  %p12175_p12 = scmp.lt.s32.totalorder %s25_s24, %s25_s24 }
  0x1b   :  { %p12171_p11 = scmp.ne.s32.totalorder %s25_s24, %s12170_s12  ;;  %p12176_p13 = scmp.lt.s32.totalorder %s12170_s12, %s12170_s12 }
  0x1d   :  { %p12177_p0 = por %p12176_p13, %p12175_p12 }
  0x1f   :  { %p12178_p1 = pnand %p12177_p0, %p12171_p11 }
  0x21   :  { %12181 = shalt.err (!%p12178_p1)
}
  0x22   :  { %s12236_s3 = smov 256   ;;  %s12237_s10 = smov 16  }
  0x23   :  { %30 = dma.hbm_to_vmem [thread:$0]  %s13064_s1, 1536, %s25_s24, [#allocation5], %s12236_s3, %s12236_s3, %s12237_s10  }
  0x24   :  { %s12238_s15 = smov [#allocation9]   ;;  %s12182_s19 = scalar_lea.hbm %s13068_s5, 16896 }
  0x25   :  { %s52_s16 = sshll.u32 %s12238_s15, 4  ;;  %p12183_p2 = scmp.ne.s32.totalorder %s13068_s5, %s12182_s19  ;;  %s53_s16 = int_to_ptr.vmem [resolvable:$true] %s52_s16 }
  0x26   :  { %p12186_p3 = scmp.lt.u32.totalorder %s12182_s19, %s13068_s5 }
  0x28   :  { %p12188_p4 = pnand %p12186_p3, %p12183_p2 }
  0x2a   :  { %12191 = shalt.err (!%p12188_p4)
}
  0x2b   :  { %s12192_s25 = scalar_lea.vmem %s53_s16, 16896  ;;  %p12197_p6 = scmp.lt.s32.totalorder %s53_s16, %s53_s16 }
  0x2c   :  { %p12193_p5 = scmp.ne.s32.totalorder %s53_s16, %s12192_s25  ;;  %p12198_p7 = scmp.lt.s32.totalorder %s12192_s25, %s12192_s25 }
  0x2e   :  { %p12199_p8 = por %p12198_p7, %p12197_p6 }
  0x30   :  { %p12200_p9 = pnand %p12199_p8, %p12193_p5 }
  0x32   :  { %12203 = shalt.err (!%p12200_p9)
}
  0x33   :  { %s12239_s1 = smov 64   ;;  %s12240_s24 = smov 4  }
  0x34   :  { %58 = dma.hbm_to_vmem [thread:$0]  %s13068_s5, 16896, %s53_s16, [#allocation8], %s12239_s1, %s12239_s1, %s12240_s24  }
  0x35   :  { %12226 = dma.done.wait [#allocation5], 1536  }
  0x36   :  { %12227 = vsyncadd [#allocation5], 4294965760 }
  0x37   :  { %12228 = dma.done.wait [#allocation8], 49152  }
  0x38   :  { %12229 = vsyncadd [#allocation8], 4294918144  ;;  %v12241_v0 = vmov 0   ;;  %v11131_v1 = vld [vmem:[#allocation4 + $0x24] ss:$16 sps:$4 sm:$0xff]   ;;  %vm110_vm0 = vcmask 130048  }
  0x39   :  { %146 = vmatprep.mubr.bf16.mxu1 %v12241_v0  ;;  %372 = vmatprep.mubr.bf16.mxu0 %v12241_v0  ;;  %v11133_v2 = vld [vmem:[#allocation4 + $0x20] ss:$16 sps:$4 sm:$0xff]   ;;  %v83_v4 = vld [vmem:[%s13063_s0 + $0x9] sm:$0x3f]  ;;  %v11139_v8 = vld [vmem:[#allocation4 + $0x4] ss:$16 sps:$4 sm:$0xff]  }
  0x3a   :  { %v82_v3 = vld [vmem:[%s13063_s0 + $0x1] sm:$0xff]  ;;  %114 = vmatprep.subr.bf16.mxu1 %v11131_v1  ;;  %v11136_v7 = vld [vmem:[#allocation4 + $0x2c] ss:$16 sps:$4 sm:$0xff]   ;;  %vm497_vm1 = vcmask 1043456   ;;  %vm498_vm2 = vcmask 523268   ;;  %vm502_vm3 = vcmask 1042432  }
  0x3b   :  { %v84_v5 = vpack.c.bf16 %v83_v4, %v82_v3  ;;  %v11134_v6 = vld [vmem:[#allocation4 + $0x28] ss:$16 sps:$4 sm:$0xff]   ;;  %115 = vmatpush1.bf16.msra.mxu1 %v11133_v2  ;;  %v11140_v9 = vld [vmem:[#allocation4 + $0x44] ss:$16 sps:$4 sm:$0xff]   ;;  %v11142_v10 = vld [vmem:[#allocation4 + $0x40] ss:$16 sps:$4 sm:$0xff]  }
  0x3c   :  { %157 = vmatprep.subr.bf16.mxu1 %v11136_v7  ;;  %v309_v11 = vld [vmem:[%s13063_s0 + $0x2] sm:$0xff]  ;;  %v310_v12 = vld [vmem:[%s13063_s0 + $0xa] sm:$0x3f]  ;;  %340 = vmatprep.subr.bf16.mxu0 %v11140_v9  ;;  %v11149_v15 = vld [vmem:[#allocation7 + $0x2a0] ss:$12 sps:$4 sm:$0xff]   ;;  %vm503_vm4 = vcmask 522244  }
  0x3d   :  { %v311_v13 = vpack.c.bf16 %v310_v12, %v309_v11  ;;  %v11137_v14 = vld [vmem:[#allocation4] ss:$16 sps:$4 sm:$0xff]   ;;  %341 = vmatpush1.bf16.msra.mxu0 %v11142_v10  ;;  %v11145_v17 = vld [vmem:[#allocation4 + $0xc] ss:$16 sps:$4 sm:$0xff]   ;;  %v11152_v21 = vld [vmem:[#allocation7 + $0x2b8] ss:$12 sps:$4 sm:$0xff]  }
  0x3e   :  { %9375 = vmatmul.mubr.msk.bf16.vlgmr.msra.gmra.mrb[0].mxu1 %vm110_vm0, %v84_v5  ;;  %v11151_v16 = vld [vmem:[#allocation7 + $0x2a4] ss:$12 sps:$4 sm:$0xff]   ;;  %v11154_v18 = vld [vmem:[#allocation7 + $0x2bc] ss:$12 sps:$4 sm:$0xff]   ;;  %v11157_v22 = vld [vmem:[#allocation7 + $0x2d4] ss:$12 sps:$4 sm:$0xff]  }
  0x3f   :  { %158 = vmatpush1.bf16.msra.mxu1 %v11134_v6  ;;  %189 = vmatprep.mubr.bf16.mxu1 %v12241_v0  ;;  %v75_v19 = vld [vmem:[%s13063_s0] sm:$0xff]  ;;  %v76_v20 = vld [vmem:[%s13063_s0 + $0x8] sm:$0x3f]  ;;  %v11161_v30 = vld [vmem:[#allocation7 + $0x300] ss:$12 sps:$4 sm:$0xff]   ;;  %vm1232_vm7 = vcmask 523264  }
  0x40   :  { %223 = vmatprep.subr.bf16.mxu1 %v11139_v8  ;;  %9387 = vmatmul.mubr.msk.bf16.vlgmr.msra.gmra.mrb[0].mxu0 %vm110_vm0, %v311_v13  ;;  %v77_v23 = vpack.c.bf16 %v76_v20, %v75_v19  ;;  %v11155_v24 = vld [vmem:[#allocation7 + $0x2d0] ss:$12 sps:$4 sm:$0xff]   ;;  %v11143_v25 = vld [vmem:[#allocation4 + $0x8] ss:$16 sps:$4 sm:$0xff]   ;;  %v11169_v35 = vld [vmem:[#allocation7 + $0x334] ss:$12 sps:$4 sm:$0xff]   ;;  %v436_v8 = vlaneseq }
  0x41   :  { %1236 = vmatprep.subr.bf16.mxu0 %v11151_v16  ;;  %v11148_v26 = vld [vmem:[#allocation4 + $0x4c] ss:$16 sps:$4 sm:$0xff]   ;;  %v11158_v28 = vld [vmem:[#allocation7 + $0x2e8] ss:$12 sps:$4 sm:$0xff]   ;;  %v11163_v29 = vld [vmem:[#allocation7 + $0x304] ss:$12 sps:$4 sm:$0xff]  }
  0x42   :  { %1237 = vmatpush1.bf16.msra.mxu0 %v11149_v15  ;;  %v11160_v27 = vld [vmem:[#allocation7 + $0x2ec] ss:$12 sps:$4 sm:$0xff]   ;;  %v11166_v32 = vld [vmem:[#allocation7 + $0x31c] ss:$12 sps:$4 sm:$0xff]   ;;  %v11175_v39 = vld [vmem:[#allocation7 + $0x364] ss:$12 sps:$4 sm:$0xff]  }
  0x43   :  { %1238 = vmatprep.subr.bf16.mxu0 %v11154_v18  ;;  %v11146_v31 = vld [vmem:[#allocation4 + $0x48] ss:$16 sps:$4 sm:$0xff]   ;;  %v11167_v36 = vld [vmem:[#allocation7 + $0x330] ss:$12 sps:$4 sm:$0xff]   ;;  %v11173_v41 = vld [vmem:[#allocation7 + $0x360] ss:$12 sps:$4 sm:$0xff]  }
  0x44   :  { %v11176_v33 = vld [vmem:[#allocation7 + $0x368] ss:$12 sps:$4 sm:$0xff]   ;;  %v11164_v34 = vld [vmem:[#allocation7 + $0x318] ss:$12 sps:$4 sm:$0xff]   ;;  %v11181_v43 = vld [vmem:[#allocation7 + $0x380] ss:$12 sps:$4 sm:$0xff]  }
  0x45   :  { %v11172_v37 = vld [vmem:[#allocation7 + $0x34c] ss:$12 sps:$4 sm:$0xff]   ;;  %v11170_v38 = vld [vmem:[#allocation7 + $0x348] ss:$12 sps:$4 sm:$0xff]   ;;  %v11183_v48 = vld [vmem:[#allocation7 + $0x390] ss:$12 sps:$4 sm:$0xff]  }
  0x46   :  { %9376 = vmatmul.mubr.msk.bf16.vlgmr.msra.gmra.mrb[4].mxu1 %vm110_vm0, %v84_v5  ;;  %1239 = vmatpush1.bf16.msra.mxu0 %v11152_v21  ;;  %v11177_v40 = vld [vmem:[#allocation7 + $0x2a8] ss:$12 sps:$4 sm:$0xff]   ;;  %v11178_v44 = vld [vmem:[#allocation7 + $0x378] ss:$12 sps:$4 sm:$0xff]   ;;  %v11182_v45 = vld [vmem:[#allocation7 + $0x2c0] ss:$12 sps:$4 sm:$0xff]  }
  0x47   :  { %224 = vmatpush1.bf16.msra.mxu1 %v11137_v14  ;;  %255 = vmatprep.mubr.bf16.mxu1 %v12241_v0  ;;  %v11180_v42 = vld [vmem:[#allocation7 + $0x37c] ss:$12 sps:$4 sm:$0xff]   ;;  %v11185_v46 = vld [vmem:[#allocation7 + $0x394] ss:$12 sps:$4 sm:$0xff]   ;;  %v11186_v47 = vld [vmem:[#allocation7 + $0x398] ss:$12 sps:$4 sm:$0xff]  }
  0x48   :  { %266 = vmatprep.subr.bf16.mxu1 %v11145_v17  ;;  %1240 = vmatprep.subr.bf16.mxu0 %v11157_v22  ;;  %v11187_v49 = vld [vmem:[#allocation7 + $0x2d8] ss:$12 sps:$4 sm:$0xff]   ;;  %v11191_v51 = vld [vmem:[#allocation7 + $0x3b0] ss:$12 sps:$4 sm:$0xff]   ;;  %v11188_v52 = vld [vmem:[#allocation7 + $0x3a8] ss:$12 sps:$4 sm:$0xff]  }
  0x49   :  { %v11190_v50 = vld [vmem:[#allocation7 + $0x3ac] ss:$12 sps:$4 sm:$0xff]   ;;  %v11192_v53 = vld [vmem:[#allocation7 + $0x2f0] ss:$12 sps:$4 sm:$0xff]   ;;  %v11196_v55 = vld [vmem:[#allocation7 + $0x3c8] ss:$12 sps:$4 sm:$0xff]  }
  0x4a   :  { %1241 = vmatpush1.bf16.msra.mxu0 %v11155_v24  ;;  %v11195_v54 = vld [vmem:[#allocation7 + $0x3c4] ss:$12 sps:$4 sm:$0xff]   ;;  %v11193_v56 = vld [vmem:[#allocation7 + $0x3c0] ss:$12 sps:$4 sm:$0xff]   ;;  %v11197_v57 = vld [vmem:[#allocation7 + $0x308] ss:$12 sps:$4 sm:$0xff]  }
  0x4b   :  { %1242 = vmatprep.subr.bf16.mxu0 %v11160_v27  ;;  %v11198_v58 = vld [vmem:[#allocation7 + $0x3d8] ss:$12 sps:$4 sm:$0xff]   ;;  %v11200_v59 = vld [vmem:[#allocation7 + $0x3dc] ss:$12 sps:$4 sm:$0xff]   ;;  %v11201_v60 = vld [vmem:[#allocation7 + $0x3e0] ss:$12 sps:$4 sm:$0xff]  }
  0x4c   :  { %v11202_v61 = vld [vmem:[#allocation7 + $0x320] ss:$12 sps:$4 sm:$0xff]   ;;  %v11206_v63 = vld [vmem:[#allocation7 + $0x3f8] ss:$12 sps:$4 sm:$0xff]   ;;  %v11203_v1 = vld [vmem:[#allocation7 + $0x3f0] ss:$12 sps:$4 sm:$0xff]  }
  0x4d   :  { %v11205_v62 = vld [vmem:[#allocation7 + $0x3f4] ss:$12 sps:$4 sm:$0xff]   ;;  %v11207_v2 = vld [vmem:[#allocation7 + $0x338] ss:$12 sps:$4 sm:$0xff]   ;;  %v11211_v4 = vld [vmem:[#allocation7 + $0x410] ss:$12 sps:$4 sm:$0xff]  }
  0x4e   :  { %9381 = vmatmul.mubr.msk.bf16.vlgmr.msra.gmra.mrb[0].mxu1 %vm110_vm0, %v77_v23  ;;  %1243 = vmatpush1.bf16.msra.mxu0 %v11158_v28  ;;  %v11210_v3 = vld [vmem:[#allocation7 + $0x40c] ss:$12 sps:$4 sm:$0xff]   ;;  %v11208_v5 = vld [vmem:[#allocation7 + $0x408] ss:$12 sps:$4 sm:$0xff]   ;;  %v11212_v6 = vld [vmem:[#allocation7 + $0x350] ss:$12 sps:$4 sm:$0xff]  }
  0x4f   :  { %267 = vmatpush1.bf16.msra.mxu1 %v11143_v25  ;;  %298 = vmatprep.mubr.bf16.mxu1 %v12241_v0  ;;  %v11215_v7 = vld [vmem:[#allocation7 + $0x424] ss:$12 sps:$4 sm:$0xff]   ;;  %v12363_v11 = vshrl.u32 %v436_v8, 7  ;;  %vm12390_vm5 = vmor %vm498_vm2, %vm497_vm1  ;;  %s12242_s21 = smov 96   ;;  %vm2835_vm8 = vcmask 785408   ;;  %vm12244_vm9 = vmmov 0  }
  0x50   :  { %383 = vmatprep.subr.bf16.mxu1 %v11148_v26  ;;  %1244 = vmatprep.subr.bf16.mxu0 %v11163_v29  ;;  %v434_v14 = vld [vmem:[%s13065_s2] sm:$0xf]  ;;  %vm12396_vm6 = vmor %vm503_vm4, %vm502_vm3  ;;  %v11217_v8 = vld [vmem:[#allocation7 + $0x438] ss:$12 sps:$4 sm:$0xff]   ;;  %vm4728_vm10 = vcmask 73728   ;;  %s12245_s24 = smov [#allocation10]  }
  0x51   :  { %v12369_v15 = vsub.s32 0, %v12363_v11  ;;  %v12372_v16 = vsub.s32 1, %v12363_v11  ;;  %s9361_s26 = sshll.u32 %s12245_s24, 4  ;;  %s9362_s26 = int_to_ptr.vmem [resolvable:$true] %s9361_s26 }
  0x52   :  { %1245 = vmatpush1.bf16.msra.mxu0 %v11161_v30  ;;  %p12209_p11 = scmp.lt.s32.totalorder %s9362_s26, %s9362_s26 }
  0x53   :  { %1246 = vmatprep.subr.bf16.mxu0 %v11166_v32  ;;  %v439_v17 = vrot.slane %v434_v14, %v12369_v15  ;;  %v443_v19 = vrot.slane %v434_v14, %v12372_v16 }
  0x56   :  { %9382 = vmatmul.mubr.msk.bf16.vlgmr.msra.gmra.mrb[4].mxu1 %vm110_vm0, %v77_v23  ;;  %1247 = vmatpush1.bf16.msra.mxu0 %v11164_v34 }
  0x57   :  { %384 = vmatpush1.bf16.msra.mxu1 %v11146_v31  ;;  %415 = vmatprep.mubr.bf16.mxu1 %v12241_v0 }
  0x58   :  { %10255 = vmatprep.subr.bf16.mxu1 %v11176_v33  ;;  %1248 = vmatprep.subr.bf16.mxu0 %v11169_v35 }
  0x5a   :  { %1249 = vmatpush1.bf16.msra.mxu0 %v11167_v36 }
  0x5b   :  { %1250 = vmatprep.subr.bf16.mxu0 %v11172_v37  ;;  %v12380_v37 = vsub.s32 2, %v12363_v11 }
  0x5e   :  { %1251 = vmatpush1.bf16.msra.mxu0 %v11170_v38  ;;  %v450_v38 = vsub.s32 3, %v12363_v11 }
  0x5f   :  { %1252 = vmatprep.subr.bf16.mxu0 %v11175_v39  ;;  %v447_v39 = vrot.slane %v434_v14, %v12380_v37 }
  0x62   :  { %9388 = vmatmul.mubr.msk.bf16.vlgmr.msra.gmra.mrb[4].mxu1 %vm110_vm0, %v311_v13  ;;  %1253 = vmatpush1.bf16.msra.mxu0 %v11173_v41 }
  0x63   :  { %10256 = vmatpush3.bf16.msra.mxu1 %v11177_v40  ;;  %1254 = vmatprep.subr.bf16.mxu0 %v11180_v42  ;;  %v451_v40 = vrot.slane %v434_v14, %v450_v38  ;;  %v11227_v14 = vld [vmem:[#allocation7 + $0x46c] ss:$12 sps:$4 sm:$0xff]  }
  0x64   :  { %10257 = vmatprep.subr.bf16.mxu1 %v11181_v43 }
  0x66   :  { %1255 = vmatpush1.bf16.msra.mxu0 %v11178_v44 }
  0x67   :  { %10258 = vmatpush3.bf16.msra.mxu1 %v11182_v45  ;;  %1256 = vmatprep.subr.bf16.mxu0 %v11185_v46 }
  0x68   :  { %10259 = vmatprep.subr.bf16.mxu1 %v11186_v47 }
  0x6a   :  { %1257 = vmatpush1.bf16.msra.mxu0 %v11183_v48 }
  0x6b   :  { %10260 = vmatpush3.bf16.msra.mxu1 %v11187_v49  ;;  %1258 = vmatprep.subr.bf16.mxu0 %v11190_v50 }
  0x6c   :  { %10261 = vmatprep.subr.bf16.mxu1 %v11191_v51 }
  0x6e   :  { %1259 = vmatpush1.bf16.msra.mxu0 %v11188_v52 }
  0x6f   :  { %10262 = vmatpush3.bf16.msra.mxu1 %v11192_v53  ;;  %1260 = vmatprep.subr.bf16.mxu0 %v11195_v54 }
  0x70   :  { %10263 = vmatprep.subr.bf16.mxu1 %v11196_v55 }
  0x72   :  { %1261 = vmatpush1.bf16.msra.mxu0 %v11193_v56 }
  0x73   :  { %10264 = vmatpush3.bf16.msra.mxu1 %v11197_v57  ;;  %1262 = vmatprep.subr.bf16.mxu0 %v11200_v59  ;;  %v11216_v59 = vld [vmem:[#allocation7 + $0x428] ss:$12 sps:$4 sm:$0xff]  }
  0x74   :  { %10265 = vmatprep.subr.bf16.mxu1 %v11201_v60 }
  0x76   :  { %1263 = vmatpush1.bf16.msra.mxu0 %v11198_v58  ;;  %v11213_v58 = vld [vmem:[#allocation7 + $0x420] ss:$12 sps:$4 sm:$0xff]  }
  0x77   :  { %10266 = vmatpush3.bf16.msra.mxu1 %v11202_v61  ;;  %1264 = vmatprep.subr.bf16.mxu0 %v11205_v62 }
  0x78   :  { %10267 = vmatprep.subr.bf16.mxu1 %v11206_v63 }
  0x7a   :  { %1265 = vmatpush1.bf16.msra.mxu0 %v11203_v1 }
  0x7b   :  { %10268 = vmatpush3.bf16.msra.mxu1 %v11207_v2  ;;  %1266 = vmatprep.subr.bf16.mxu0 %v11210_v3 }
  0x7c   :  { %10269 = vmatprep.subr.bf16.mxu1 %v11211_v4 }
  0x7e   :  { %1267 = vmatpush1.bf16.msra.mxu0 %v11208_v5 }
  0x7f   :  { %10270 = vmatpush3.bf16.msra.mxu1 %v11212_v6  ;;  %1279 = vmatprep.subr.bf16.mxu0 %v11215_v7  ;;  %v11219_v6 = vld [vmem:[#allocation7 + $0x43c] ss:$12 sps:$4 sm:$0xff]  }
  0x80   :  { %1363 = vmatprep.subr.bf16.mxu1 %v12241_v0 }
 0x113   :  { %v374_v9 = vpop.f32.mrb[0].mxu0 }
 0x114   :  { %v376_v10 = vpop.f32.mrb[1].mxu0 }
 0x115   :  { %v378_v12 = vpop.f32.mrb[2].mxu0 }
 0x116   :  { %v380_v13 = vpop.f32.mrb[3].mxu0 }
 0x121   :  { %v257_v18 = vpop.f32.mrb[0].mxu1 }
 0x122   :  { %v10985_v20 = vadd.f32 %v374_v9, %v257_v18  ;;  %v259_v21 = vpop.f32.mrb[1].mxu1  ;;  %v11220_v9 = vld [vmem:[#allocation7 + $0x440] ss:$12 sps:$4 sm:$0xff]   ;;  %v11228_v18 = vld [vmem:[#allocation7 + $0x470] ss:$12 sps:$4 sm:$0xff]  }
 0x123   :  { %v10986_v22 = vadd.f32 %v376_v10, %v259_v21  ;;  %v261_v23 = vpop.f32.mrb[2].mxu1  ;;  %v11223_v10 = vld [vmem:[#allocation7 + $0x454] ss:$12 sps:$4 sm:$0xff]  }
 0x124   :  { %v456_v24 = vadd.f32 %v10985_v20, %v439_v17  ;;  %v10987_v25 = vadd.f32 %v378_v12, %v261_v23  ;;  %v263_v26 = vpop.f32.mrb[3].mxu1  ;;  %v11221_v12 = vld [vmem:[#allocation7 + $0x450] ss:$12 sps:$4 sm:$0xff]  }
 0x125   :  { %v457_v27 = vadd.f32 %v10986_v22, %v443_v19  ;;  %v10988_v28 = vadd.f32 %v380_v13, %v263_v26  ;;  %v11224_v13 = vld [vmem:[#allocation7 + $0x458] ss:$12 sps:$4 sm:$0xff]  }
 0x126   :  { %v464_v29 = vmax.f32 %v456_v24, 0.0  ;;  %v460_v30 = vadd.f32 %v10987_v25, %v439_v17  ;;  %v11225_v17 = vld [vmem:[#allocation7 + $0x468] ss:$12 sps:$4 sm:$0xff]   ;;  %v11231_v22 = vld [vmem:[#allocation7 + $0x484] ss:$12 sps:$4 sm:$0xff]  }
 0x127   :  { %v465_v31 = vmax.f32 %v457_v27, 0.0  ;;  %v461_v32 = vadd.f32 %v10988_v28, %v443_v19  ;;  %v11229_v24 = vld [vmem:[#allocation7 + $0x480] ss:$12 sps:$4 sm:$0xff]   ;;  %v11232_v25 = vld [vmem:[#allocation7 + $0x488] ss:$12 sps:$4 sm:$0xff]  }
 0x128   :  { %v468_v33 = vmax.f32 %v460_v30, 0.0  ;;  %v11236_v28 = vld [vmem:[#allocation7 + $0x49c] ss:$12 sps:$4 sm:$0xff]   ;;  %v11234_v30 = vld [vmem:[#allocation7 + $0x498] ss:$12 sps:$4 sm:$0xff]  }
 0x129   :  { %v12376_v34 = vpack.c.bf16 %v465_v31, %v464_v29  ;;  %v469_v35 = vmax.f32 %v461_v32, 0.0  ;;  %v11237_v31 = vld [vmem:[#allocation7 + $0x4a0] ss:$12 sps:$4 sm:$0xff]  }
 0x12a   :  { %v11240_v32 = vld [vmem:[#allocation7 + $0x4b4] ss:$12 sps:$4 sm:$0xff]  }
 0x12b   :  { %496 = vst [vmem:[#allocation2] sm:$0xff] %v12376_v34  ;;  %v10249_v36 = vpack.c.bf16 %v469_v35, %v468_v33  ;;  %v11238_v33 = vld [vmem:[#allocation7 + $0x4b0] ss:$12 sps:$4 sm:$0xff]   ;;  %v11241_v35 = vld [vmem:[#allocation7 + $0x4b8] ss:$12 sps:$4 sm:$0xff]  }
 0x12d   :  { %501 = vst [vmem:[#allocation2 + $0x10] sm:$0x77] %v10249_v36  ;;  %v11244_v36 = vld [vmem:[#allocation7 + $0x4cc] ss:$12 sps:$4 sm:$0xff]  }
 0x134   :  { %v622_v41 = vld [vmem:[#allocation2 + $0x10] sm:$0x77] }
 0x135   :  { %v417_v42 = vpop.f32.mrb[4].mxu1  ;;  %v9394_v43 = vcombine.high %v12376_v34, %v622_v41  ;;  %v9393_v44 = vcombine.low %v12376_v34, %v622_v41  ;;  %v11248_v41 = vld [vmem:[#allocation7 + $0x4e4] ss:$12 sps:$4 sm:$0xff]  }
 0x136   :  { %v458_v45 = vadd.f32 %v447_v39, %v417_v42  ;;  %v419_v46 = vpop.f32.mrb[5].mxu1  ;;  %v11246_v42 = vld [vmem:[#allocation7 + $0x4e0] ss:$12 sps:$4 sm:$0xff]  }
 0x137   :  { %v459_v47 = vadd.f32 %v451_v40, %v419_v46  ;;  %v421_v48 = vpop.f32.mrb[6].mxu1  ;;  %v763_v49 = vshll.u32 %v9394_v43, 16  ;;  %v756_v53 = vshll.u32 %v9393_v44, 16  ;;  %v761_v56 = vshrl.u32 %v9394_v43, 16  ;;  %v11249_v43 = vld [vmem:[#allocation7 + $0x4e8] ss:$12 sps:$4 sm:$0xff]  }
 0x138   :  { %v466_v50 = vmax.f32 %v458_v45, 0.0  ;;  %v462_v51 = vadd.f32 %v447_v39, %v421_v48  ;;  %v423_v52 = vpop.f32.mrb[7].mxu1  ;;  %v754_v62 = vshrl.u32 %v9393_v44, 16  ;;  %v11242_v39 = vld [vmem:[#allocation7 + $0x4c8] ss:$12 sps:$4 sm:$0xff]  }
 0x139   :  { %v467_v54 = vmax.f32 %v459_v47, 0.0  ;;  %v463_v55 = vadd.f32 %v451_v40, %v423_v52  ;;  %v765_v57 = vrot.slane %v763_v49, 1  ;;  %v758_v63 = vrot.slane %v756_v53, 1  ;;  %v11245_v40 = vld [vmem:[#allocation7 + $0x4d0] ss:$12 sps:$4 sm:$0xff]  }
 0x13a   :  { %v470_v61 = vmax.f32 %v462_v51, 0.0  ;;  %v11252_v44 = vld [vmem:[#allocation7 + $0x4fc] ss:$12 sps:$4 sm:$0xff]   ;;  %v11250_v45 = vld [vmem:[#allocation7 + $0x4f8] ss:$12 sps:$4 sm:$0xff]  }
 0x13b   :  { %v10248_v1 = vpack.c.bf16 %v467_v54, %v466_v50  ;;  %v471_v2 = vmax.f32 %v463_v55, 0.0  ;;  %v766_v3 = vor.u32 %v765_v57, %v761_v56  ;;  %v759_v5 = vor.u32 %v758_v63, %v754_v62  ;;  %v11253_v46 = vld [vmem:[#allocation7 + $0x500] ss:$12 sps:$4 sm:$0xff]   ;;  %v11254_v49 = vld [vmem:[#allocation7 + $0x510] ss:$12 sps:$4 sm:$0xff]  }
 0x13c   :  { %v11256_v47 = vld [vmem:[#allocation7 + $0x514] ss:$12 sps:$4 sm:$0xff]   ;;  %v11257_v50 = vld [vmem:[#allocation7 + $0x518] ss:$12 sps:$4 sm:$0xff]   ;;  %v11261_v54 = vld [vmem:[#allocation7 + $0x530] ss:$12 sps:$4 sm:$0xff]  }
 0x13d   :  { %500 = vst.msk [vmem:[#allocation2 + $0x8] sm:$0xff] %vm12390_vm5, %v10248_v1  ;;  %v10250_v7 = vpack.c.bf16 %v471_v2, %v470_v61  ;;  %1268 = vmatprep.mubr.bf16.mxu0 %v766_v3  ;;  %1354 = vmatprep.mubr.bf16.mxu1 %v766_v3  ;;  %v11260_v51 = vld [vmem:[#allocation7 + $0x52c] ss:$12 sps:$4 sm:$0xff]   ;;  %v11258_v53 = vld [vmem:[#allocation7 + $0x528] ss:$12 sps:$4 sm:$0xff]  }
 0x13e   :  { %1269 = vmatmul.mubr.bf16.vlgmr.msra.gmra.mrb[4].mxu0 %v759_v5  ;;  %1355 = vmatmul.mubr.bf16.vlgmr.msra.gmra.mrb[8].mxu1 %v759_v5  ;;  %v11265_v55 = vld [vmem:[#allocation7 + $0x4] ss:$12 sps:$4 sm:$0xff]   ;;  %v11266_v57 = vld [vmem:[#allocation7 + $0xc8] ss:$12 sps:$4 sm:$0xff]   ;;  %v11271_v2 = vld [vmem:[#allocation7 + $0xe0] ss:$12 sps:$4 sm:$0xff]  }
 0x13f   :  { %505 = vst.msk [vmem:[#allocation2 + $0x18] sm:$0x77] %vm12396_vm6, %v10250_v7  ;;  %1280 = vmatpush1.bf16.msra.mxu0 %v11213_v58  ;;  %1364 = vmatpush1.bf16.msra.mxu1 %v11216_v59  ;;  %v12421_v58 = vld [vmem:[#allocation2 + $0x10] sm:$0x33]  ;;  %v11267_v62 = vld [vmem:[#allocation7 + $0x8] ss:$12 sps:$4 sm:$0xff]  }
 0x140   :  { %1281 = vmatprep.subr.bf16.mxu0 %v11219_v6  ;;  %1365 = vmatprep.subr.bf16.mxu1 %v12241_v0  ;;  %v11263_v59 = vld [vmem:[#allocation7] ss:$12 sps:$4 sm:$0xff]   ;;  %v11270_v1 = vld [vmem:[#allocation7 + $0x1c] ss:$12 sps:$4 sm:$0xff]   ;;  %v9484_v3 = vcombine.high %v12376_v34, %v12421_v58  ;;  %v11268_v5 = vld [vmem:[#allocation7 + $0x18] ss:$12 sps:$4 sm:$0xff]  }
 0x141   :  { %v11272_v6 = vld [vmem:[#allocation7 + $0x20] ss:$12 sps:$4 sm:$0xff]  }
 0x142   :  { %v11275_v7 = vld [vmem:[#allocation7 + $0x34] ss:$12 sps:$4 sm:$0xff]  }
 0x143   :  { %1282 = vmatpush1.bf16.msra.mxu0 %v11217_v8  ;;  %1366 = vmatpush1.bf16.msra.mxu1 %v11220_v9  ;;  %v11276_v8 = vld [vmem:[#allocation7 + $0xf8] ss:$12 sps:$4 sm:$0xff]   ;;  %v11273_v9 = vld [vmem:[#allocation7 + $0x30] ss:$12 sps:$4 sm:$0xff]  }
 0x144   :  { %1283 = vmatprep.subr.bf16.mxu0 %v11223_v10  ;;  %1367 = vmatprep.subr.bf16.mxu1 %v12241_v0  ;;  %v12406_v19 = vld [vmem:[#allocation2 + $0x8] sm:$0xff] }
 0x145   :  { %v11277_v10 = vld [vmem:[#allocation7 + $0x38] ss:$12 sps:$4 sm:$0xff]  }
 0x146   :  { %v623_v20 = vld [vmem:[#allocation2 + $0x18] sm:$0x77] }
 0x147   :  { %1284 = vmatpush1.bf16.msra.mxu0 %v11221_v12  ;;  %1368 = vmatpush1.bf16.msra.mxu1 %v11224_v13  ;;  %v9396_v21 = vcombine.high %v12406_v19, %v623_v20  ;;  %v9395_v48 = vcombine.low %v12406_v19, %v623_v20  ;;  %v11280_v12 = vld [vmem:[#allocation7 + $0x4c] ss:$12 sps:$4 sm:$0xff]   ;;  %v11281_v13 = vld [vmem:[#allocation7 + $0x110] ss:$12 sps:$4 sm:$0xff]   ;;  %v11286_v20 = vld [vmem:[#allocation7 + $0x128] ss:$12 sps:$4 sm:$0xff]  }
 0x148   :  { %1285 = vmatprep.subr.bf16.mxu0 %v11227_v14  ;;  %1369 = vmatprep.subr.bf16.mxu1 %v12241_v0  ;;  %v11278_v14 = vld [vmem:[#allocation7 + $0x48] ss:$12 sps:$4 sm:$0xff]  }
 0x149   :  { %v777_v23 = vshll.u32 %v9396_v21, 16  ;;  %v775_v26 = vshrl.u32 %v9396_v21, 16  ;;  %v770_v52 = vshll.u32 %v9395_v48, 16  ;;  %v768_v61 = vshrl.u32 %v9395_v48, 16  ;;  %v11283_v21 = vld [vmem:[#allocation7 + $0x60] ss:$12 sps:$4 sm:$0xff]  }
 0x14a   :  { %v11312_v48 = vld [vmem:[#allocation7 + $0xf0] ss:$12 sps:$4 sm:$0xff]  }
 0x14b   :  { %1286 = vmatpush1.bf16.msra.mxu0 %v11225_v17  ;;  %1370 = vmatpush1.bf16.msra.mxu1 %v11228_v18  ;;  %v779_v27 = vrot.slane %v777_v23, 1  ;;  %v772_v56 = vrot.slane %v770_v52, 1  ;;  %v11282_v17 = vld [vmem:[#allocation7 + $0x50] ss:$12 sps:$4 sm:$0xff]   ;;  %v11320_v52 = vld [vmem:[#allocation7 + $0x120] ss:$12 sps:$4 sm:$0xff]  }
 0x14c   :  { %1287 = vmatprep.subr.bf16.mxu0 %v11231_v22  ;;  %1371 = vmatprep.subr.bf16.mxu1 %v12241_v0  ;;  %v11285_v18 = vld [vmem:[#allocation7 + $0x64] ss:$12 sps:$4 sm:$0xff]   ;;  %v11287_v22 = vld [vmem:[#allocation7 + $0x68] ss:$12 sps:$4 sm:$0xff]  }
 0x14d   :  { %v780_v29 = vor.u32 %v779_v27, %v775_v26  ;;  %v773_v63 = vor.u32 %v772_v56, %v768_v61  ;;  %v11290_v23 = vld [vmem:[#allocation7 + $0x7c] ss:$12 sps:$4 sm:$0xff]   ;;  %v11292_v26 = vld [vmem:[#allocation7 + $0x80] ss:$12 sps:$4 sm:$0xff]  }
 0x14e   :  { %v11295_v27 = vld [vmem:[#allocation7 + $0x94] ss:$12 sps:$4 sm:$0xff]   ;;  %v11334_v61 = vld [vmem:[#allocation7 + $0x16c] ss:$12 sps:$4 sm:$0xff]  }
 0x14f   :  { %1288 = vmatpush1.bf16.msra.mxu0 %v11229_v24  ;;  %1372 = vmatpush1.bf16.msra.mxu1 %v11232_v25  ;;  %v11291_v24 = vld [vmem:[#allocation7 + $0x140] ss:$12 sps:$4 sm:$0xff]   ;;  %v11288_v25 = vld [vmem:[#allocation7 + $0x78] ss:$12 sps:$4 sm:$0xff]  }
 0x150   :  { %9481 = vmatprep.mubr.msk.bf16.mxu0 %vm1232_vm7, %v780_v29  ;;  %9482 = vmatprep.mubr.msk.bf16.mxu1 %vm1232_vm7, %v780_v29  ;;  %v11293_v29 = vld [vmem:[#allocation7 + $0x90] ss:$12 sps:$4 sm:$0xff]   ;;  %v11327_v56 = vld [vmem:[#allocation7 + $0x200] ss:$12 sps:$4 sm:$0xff]  }
 0x151   :  { %1289 = vmatprep.subr.bf16.mxu0 %v11236_v28  ;;  %1373 = vmatprep.subr.bf16.mxu1 %v12241_v0  ;;  %v11296_v28 = vld [vmem:[#allocation7 + $0x158] ss:$12 sps:$4 sm:$0xff]  }
 0x153   :  { %1290 = vmatpush1.bf16.msra.mxu0 %v11234_v30  ;;  %1374 = vmatpush1.bf16.msra.mxu1 %v11237_v31  ;;  %v11297_v30 = vld [vmem:[#allocation7 + $0x98] ss:$12 sps:$4 sm:$0xff]  }
 0x154   :  { %1291 = vmatprep.subr.bf16.mxu0 %v11240_v32  ;;  %1375 = vmatprep.subr.bf16.mxu1 %v12241_v0  ;;  %v11300_v31 = vld [vmem:[#allocation7 + $0xac] ss:$12 sps:$4 sm:$0xff]   ;;  %v11301_v32 = vld [vmem:[#allocation7 + $0x170] ss:$12 sps:$4 sm:$0xff]  }
 0x157   :  { %1292 = vmatpush1.bf16.msra.mxu0 %v11238_v33  ;;  %1376 = vmatpush1.bf16.msra.mxu1 %v11241_v35  ;;  %v11298_v33 = vld [vmem:[#allocation7 + $0xa8] ss:$12 sps:$4 sm:$0xff]   ;;  %v11302_v35 = vld [vmem:[#allocation7 + $0xb0] ss:$12 sps:$4 sm:$0xff]  }
 0x158   :  { %1293 = vmatprep.subr.bf16.mxu0 %v11244_v36  ;;  %1377 = vmatprep.subr.bf16.mxu1 %v12241_v0  ;;  %v11305_v36 = vld [vmem:[#allocation7 + $0xc4] ss:$12 sps:$4 sm:$0xff]  }
 0x15b   :  { %1294 = vmatpush1.bf16.msra.mxu0 %v11242_v39  ;;  %1378 = vmatpush1.bf16.msra.mxu1 %v11245_v40  ;;  %v11303_v39 = vld [vmem:[#allocation7 + $0xc0] ss:$12 sps:$4 sm:$0xff]  }
 0x15c   :  { %1295 = vmatprep.subr.bf16.mxu0 %v11248_v41  ;;  %1379 = vmatprep.subr.bf16.mxu1 %v12241_v0  ;;  %v12425_v40 = vld [vmem:[#allocation2 + $0x18] sm:$0x33] }
 0x15d   :  { %v11306_v41 = vld [vmem:[#allocation7 + $0x188] ss:$12 sps:$4 sm:$0xff]  }
 0x15f   :  { %1296 = vmatpush1.bf16.msra.mxu0 %v11246_v42  ;;  %1380 = vmatpush1.bf16.msra.mxu1 %v11249_v43  ;;  %v11310_v42 = vld [vmem:[#allocation7 + $0xdc] ss:$12 sps:$4 sm:$0xff]   ;;  %v9483_v43 = vcombine.low %v12376_v34, %v12421_v58 }
 0x160   :  { %1297 = vmatprep.subr.bf16.mxu0 %v11252_v44  ;;  %1381 = vmatprep.subr.bf16.mxu1 %v12241_v0  ;;  %v11308_v44 = vld [vmem:[#allocation7 + $0xd8] ss:$12 sps:$4 sm:$0xff]   ;;  %v11316_v34 = vld [vmem:[#allocation7 + $0x108] ss:$12 sps:$4 sm:$0xff]   ;;  %v11328_v58 = vld [vmem:[#allocation7 + $0x150] ss:$12 sps:$4 sm:$0xff]  }
 0x163   :  { %1298 = vmatpush1.bf16.msra.mxu0 %v11250_v45  ;;  %1382 = vmatpush1.bf16.msra.mxu1 %v11253_v46  ;;  %v9486_v45 = vcombine.high %v12406_v19, %v12425_v40  ;;  %v11311_v46 = vld [vmem:[#allocation7 + $0x1a0] ss:$12 sps:$4 sm:$0xff]   ;;  %v11319_v19 = vld [vmem:[#allocation7 + $0x1d0] ss:$12 sps:$4 sm:$0xff]  }
 0x164   :  { %1299 = vmatprep.subr.bf16.mxu0 %v11256_v47  ;;  %1383 = vmatprep.subr.bf16.mxu1 %v12241_v0  ;;  %v11314_v47 = vld [vmem:[#allocation7 + $0xf4] ss:$12 sps:$4 sm:$0xff]  }
 0x167   :  { %1300 = vmatpush1.bf16.msra.mxu0 %v11254_v49  ;;  %1384 = vmatpush1.bf16.msra.mxu1 %v11257_v50  ;;  %v11315_v49 = vld [vmem:[#allocation7 + $0x1b8] ss:$12 sps:$4 sm:$0xff]  }
 0x168   :  { %1301 = vmatprep.subr.bf16.mxu0 %v11260_v51  ;;  %1385 = vmatprep.subr.bf16.mxu1 %v12241_v0  ;;  %v11318_v50 = vld [vmem:[#allocation7 + $0x10c] ss:$12 sps:$4 sm:$0xff]   ;;  %v11322_v51 = vld [vmem:[#allocation7 + $0x124] ss:$12 sps:$4 sm:$0xff]  }
 0x16b   :  { %1302 = vmatpush1.bf16.msra.mxu0 %v11258_v53  ;;  %1386 = vmatpush1.bf16.msra.mxu1 %v11261_v54  ;;  %v11323_v53 = vld [vmem:[#allocation7 + $0x1e8] ss:$12 sps:$4 sm:$0xff]  }
 0x16c   :  { %1868 = vmatprep.subr.bf16.mxu0 %v11265_v55  ;;  %10277 = vmatprep.subr.bf16.mxu1 %v11266_v57  ;;  %v11326_v54 = vld [vmem:[#allocation7 + $0x13c] ss:$12 sps:$4 sm:$0xff]   ;;  %v11324_v55 = vld [vmem:[#allocation7 + $0x138] ss:$12 sps:$4 sm:$0xff]   ;;  %v11330_v57 = vld [vmem:[#allocation7 + $0x154] ss:$12 sps:$4 sm:$0xff]  }
 0x16e   :  { %1312 = vmatmul.mubr.bf16.vlgmr.msra.gmra.mrb[4].mxu0 %v773_v63  ;;  %1396 = vmatmul.mubr.bf16.vlgmr.msra.gmra.mrb[12].mxu1 %v773_v63  ;;  %v11335_v63 = vld [vmem:[#allocation7 + $0x230] ss:$12 sps:$4 sm:$0xff]  }
 0x16f   :  { %1869 = vmatpush1.bf16.msra.mxu0 %v11263_v59  ;;  %1900 = vmatprep.mubr.bf16.mxu0 %v9484_v3  ;;  %v11331_v59 = vld [vmem:[#allocation7 + $0x218] ss:$12 sps:$4 sm:$0xff]  }
 0x170   :  { %10278 = vmatpush3.bf16.msra.mxu1 %v11267_v62  ;;  %1986 = vmatprep.mubr.bf16.mxu1 %v9484_v3  ;;  %v11332_v62 = vld [vmem:[#allocation7 + $0x168] ss:$12 sps:$4 sm:$0xff]  }
 0x171   :  { %1870 = vmatprep.subr.bf16.mxu0 %v11270_v1  ;;  %10279 = vmatprep.subr.bf16.mxu1 %v11271_v2  ;;  %v11338_v1 = vld [vmem:[#allocation7 + $0x184] ss:$12 sps:$4 sm:$0xff]   ;;  %v11336_v2 = vld [vmem:[#allocation7 + $0x180] ss:$12 sps:$4 sm:$0xff]   ;;  %v11339_v3 = vld [vmem:[#allocation7 + $0x248] ss:$12 sps:$4 sm:$0xff]  }
 0x173   :  { %1871 = vmatpush1.bf16.msra.mxu0 %v11268_v5  ;;  %v11342_v5 = vld [vmem:[#allocation7 + $0x19c] ss:$12 sps:$4 sm:$0xff]  }
 0x174   :  { %10280 = vmatpush3.bf16.msra.mxu1 %v11272_v6  ;;  %1872 = vmatprep.subr.bf16.mxu0 %v11275_v7  ;;  %v11340_v6 = vld [vmem:[#allocation7 + $0x198] ss:$12 sps:$4 sm:$0xff]   ;;  %v11343_v7 = vld [vmem:[#allocation7 + $0x260] ss:$12 sps:$4 sm:$0xff]  }
 0x175   :  { %10281 = vmatprep.subr.bf16.mxu1 %v11276_v8  ;;  %v11346_v8 = vld [vmem:[#allocation7 + $0x1b4] ss:$12 sps:$4 sm:$0xff]  }
 0x177   :  { %1873 = vmatpush1.bf16.msra.mxu0 %v11273_v9  ;;  %v11344_v9 = vld [vmem:[#allocation7 + $0x1b0] ss:$12 sps:$4 sm:$0xff]  }
 0x178   :  { %10282 = vmatpush3.bf16.msra.mxu1 %v11277_v10  ;;  %1874 = vmatprep.subr.bf16.mxu0 %v11280_v12  ;;  %v11347_v10 = vld [vmem:[#allocation7 + $0x278] ss:$12 sps:$4 sm:$0xff]  }
 0x179   :  { %10283 = vmatprep.subr.bf16.mxu1 %v11281_v13  ;;  %v11350_v12 = vld [vmem:[#allocation7 + $0x1cc] ss:$12 sps:$4 sm:$0xff]   ;;  %v11348_v13 = vld [vmem:[#allocation7 + $0x1c8] ss:$12 sps:$4 sm:$0xff]  }
 0x17b   :  { %1875 = vmatpush1.bf16.msra.mxu0 %v11278_v14  ;;  %v11351_v14 = vld [vmem:[#allocation7 + $0x290] ss:$12 sps:$4 sm:$0xff]  }
 0x17c   :  { %10284 = vmatpush3.bf16.msra.mxu1 %v11282_v17  ;;  %1876 = vmatprep.subr.bf16.mxu0 %v11285_v18  ;;  %v12444_v17 = vld [vmem:[#allocation2] sm:$0xee] }
 0x17d   :  { %10285 = vmatprep.subr.bf16.mxu1 %v11286_v20  ;;  %v11354_v18 = vld [vmem:[#allocation7 + $0x1e4] ss:$12 sps:$4 sm:$0xff]   ;;  %v11356_v20 = vld [vmem:[#allocation7 + $0x608] ss:$12 sps:$4 sm:$0xff]  }
 0x17f   :  { %1877 = vmatpush1.bf16.msra.mxu0 %v11283_v21  ;;  %v11352_v21 = vld [vmem:[#allocation7 + $0x1e0] ss:$12 sps:$4 sm:$0xff]  }
 0x180   :  { %10286 = vmatpush3.bf16.msra.mxu1 %v11287_v22  ;;  %1878 = vmatprep.subr.bf16.mxu0 %v11290_v23  ;;  %v12447_v22 = vld [vmem:[#allocation2 + $0x10] sm:$0x77] }
 0x181   :  { %10287 = vmatprep.subr.bf16.mxu1 %v11291_v24  ;;  %v9574_v23 = vcombine.high %v12444_v17, %v12447_v22  ;;  %v11357_v24 = vld [vmem:[#allocation7 + $0x548] ss:$12 sps:$4 sm:$0xff]  }
 0x183   :  { %1879 = vmatpush1.bf16.msra.mxu0 %v11288_v25  ;;  %v11361_v25 = vld [vmem:[#allocation7 + $0x1fc] ss:$12 sps:$4 sm:$0xff]  }
 0x184   :  { %10288 = vmatpush3.bf16.msra.mxu1 %v11292_v26  ;;  %1880 = vmatprep.subr.bf16.mxu0 %v11295_v27  ;;  %v11362_v26 = vld [vmem:[#allocation7 + $0x620] ss:$12 sps:$4 sm:$0xff]   ;;  %v12136_v27 = vld [vmem:[#allocation2 + $0x8] sm:$0xff] }
 0x185   :  { %10289 = vmatprep.subr.bf16.mxu1 %v11296_v28  ;;  %v12452_v28 = vcombine.low %v12136_v27, %v12425_v40  ;;  %v11372_v40 = vld [vmem:[#allocation7 + $0x650] ss:$12 sps:$4 sm:$0xff]  }
 0x186   :  { %v11420_v27 = vld [vmem:[#allocation7 + $0x5d0] ss:$12 sps:$4 sm:$0xff]  }
 0x187   :  { %1881 = vmatpush1.bf16.msra.mxu0 %v11293_v29  ;;  %v12454_v29 = vrot.slane %v9574_v23, 1  ;;  %v11418_v23 = vld [vmem:[#allocation7 + $0x5bc] ss:$12 sps:$4 sm:$0xff]  }
 0x188   :  { %10290 = vmatpush3.bf16.msra.mxu1 %v11297_v30  ;;  %1882 = vmatprep.subr.bf16.mxu0 %v11300_v31  ;;  %v11359_v30 = vld [vmem:[#allocation7 + $0x1f8] ss:$12 sps:$4 sm:$0xff]   ;;  %v11363_v31 = vld [vmem:[#allocation7 + $0x560] ss:$12 sps:$4 sm:$0xff]  }
 0x189   :  { %10291 = vmatprep.subr.bf16.mxu1 %v11301_v32  ;;  %v11366_v32 = vld [vmem:[#allocation7 + $0x214] ss:$12 sps:$4 sm:$0xff]  }
 0x18b   :  { %1883 = vmatpush1.bf16.msra.mxu0 %v11298_v33  ;;  %v11367_v33 = vld [vmem:[#allocation7 + $0x638] ss:$12 sps:$4 sm:$0xff]  }
 0x18c   :  { %10292 = vmatpush3.bf16.msra.mxu1 %v11302_v35  ;;  %1884 = vmatprep.subr.bf16.mxu0 %v11305_v36  ;;  %v11364_v35 = vld [vmem:[#allocation7 + $0x210] ss:$12 sps:$4 sm:$0xff]   ;;  %v11368_v36 = vld [vmem:[#allocation7 + $0x578] ss:$12 sps:$4 sm:$0xff]  }
 0x18d   :  { %1995 = vmatprep.subr.bf16.mxu1 %v12241_v0 }
 0x18f   :  { %1987 = vmatmul.mubr.bf16.vlgmr.msra.gmra.mrb[16].mxu1 %v9483_v43  ;;  %1885 = vmatpush1.bf16.msra.mxu0 %v11303_v39  ;;  %v11371_v39 = vld [vmem:[#allocation7 + $0x22c] ss:$12 sps:$4 sm:$0xff]  }
 0x190   :  { %1996 = vmatpush1.bf16.msra.mxu1 %v11306_v41  ;;  %9572 = vmatprep.mubr.msk.bf16.mxu1 %vm1232_vm7, %v9486_v45  ;;  %v11369_v41 = vld [vmem:[#allocation7 + $0x228] ss:$12 sps:$4 sm:$0xff]  }
 0x191   :  { %1886 = vmatprep.subr.bf16.mxu0 %v11310_v42  ;;  %1997 = vmatprep.subr.bf16.mxu1 %v12241_v0  ;;  %v11373_v42 = vld [vmem:[#allocation7 + $0x590] ss:$12 sps:$4 sm:$0xff]  }
 0x193   :  { %1887 = vmatpush1.bf16.msra.mxu0 %v11308_v44  ;;  %v11377_v44 = vld [vmem:[#allocation7 + $0x668] ss:$12 sps:$4 sm:$0xff]  }
 0x194   :  { %1998 = vmatpush1.bf16.msra.mxu1 %v11311_v46  ;;  %1888 = vmatprep.subr.bf16.mxu0 %v11314_v47  ;;  %v11378_v46 = vld [vmem:[#allocation7 + $0x5a8] ss:$12 sps:$4 sm:$0xff]  }
 0x195   :  { %1999 = vmatprep.subr.bf16.mxu1 %v12241_v0  ;;  %v11381_v47 = vld [vmem:[#allocation7 + $0x25c] ss:$12 sps:$4 sm:$0xff]  }
 0x197   :  { %1889 = vmatpush1.bf16.msra.mxu0 %v11312_v48  ;;  %v11382_v48 = vld [vmem:[#allocation7 + $0x680] ss:$12 sps:$4 sm:$0xff]  }
 0x198   :  { %2000 = vmatpush1.bf16.msra.mxu1 %v11315_v49  ;;  %1890 = vmatprep.subr.bf16.mxu0 %v11318_v50  ;;  %v11379_v49 = vld [vmem:[#allocation7 + $0x258] ss:$12 sps:$4 sm:$0xff]   ;;  %v11383_v50 = vld [vmem:[#allocation7 + $0x5c0] ss:$12 sps:$4 sm:$0xff]  }
 0x199   :  { %2001 = vmatprep.subr.bf16.mxu1 %v12241_v0 }
 0x19b   :  { %1891 = vmatpush1.bf16.msra.mxu0 %v11316_v34  ;;  %v11386_v34 = vld [vmem:[#allocation7 + $0x274] ss:$12 sps:$4 sm:$0xff]  }
 0x19c   :  { %2002 = vmatpush1.bf16.msra.mxu1 %v11319_v19  ;;  %1892 = vmatprep.subr.bf16.mxu0 %v11322_v51  ;;  %v11387_v19 = vld [vmem:[#allocation7 + $0x698] ss:$12 sps:$4 sm:$0xff]   ;;  %v11384_v51 = vld [vmem:[#allocation7 + $0x270] ss:$12 sps:$4 sm:$0xff]  }
 0x19d   :  { %2003 = vmatprep.subr.bf16.mxu1 %v12241_v0 }
 0x19f   :  { %1893 = vmatpush1.bf16.msra.mxu0 %v11320_v52  ;;  %v11388_v52 = vld [vmem:[#allocation7 + $0x5d8] ss:$12 sps:$4 sm:$0xff]  }
 0x1a0   :  { %2004 = vmatpush1.bf16.msra.mxu1 %v11323_v53  ;;  %1894 = vmatprep.subr.bf16.mxu0 %v11326_v54  ;;  %v11391_v53 = vld [vmem:[#allocation7 + $0x28c] ss:$12 sps:$4 sm:$0xff]   ;;  %v11392_v54 = vld [vmem:[#allocation7 + $0x6b0] ss:$12 sps:$4 sm:$0xff]  }
 0x1a1   :  { %2005 = vmatprep.subr.bf16.mxu1 %v12241_v0 }
 0x1a3   :  { %1895 = vmatpush1.bf16.msra.mxu0 %v11324_v55  ;;  %v11389_v55 = vld [vmem:[#allocation7 + $0x288] ss:$12 sps:$4 sm:$0xff]  }
 0x1a4   :  { %2006 = vmatpush1.bf16.msra.mxu1 %v11327_v56  ;;  %1896 = vmatprep.subr.bf16.mxu0 %v11330_v57  ;;  %v11393_v56 = vld [vmem:[#allocation7 + $0x5f0] ss:$12 sps:$4 sm:$0xff]  }
 0x1a5   :  { %2007 = vmatprep.subr.bf16.mxu1 %v12241_v0  ;;  %v11396_v57 = vld [vmem:[#allocation7 + $0x544] ss:$12 sps:$4 sm:$0xff]  }
 0x1a7   :  { %1897 = vmatpush1.bf16.msra.mxu0 %v11328_v58  ;;  %v2037_v58 = vld [vmem:[#allocation2 + $0x8] sm:$0xee] }
 0x1a8   :  { %2008 = vmatpush1.bf16.msra.mxu1 %v11331_v59  ;;  %1898 = vmatprep.subr.bf16.mxu0 %v11334_v61  ;;  %v11394_v59 = vld [vmem:[#allocation7 + $0x540] ss:$12 sps:$4 sm:$0xff]   ;;  %v9573_v61 = vcombine.low %v12444_v17, %v12447_v22  ;;  %v11408_v17 = vld [vmem:[#allocation7 + $0x588] ss:$12 sps:$4 sm:$0xff]  }
 0x1a9   :  { %2009 = vmatprep.subr.bf16.mxu1 %v12241_v0  ;;  %v11415_v22 = vld [vmem:[#allocation7 + $0x728] ss:$12 sps:$4 sm:$0xff]  }
 0x1ab   :  { %1899 = vmatpush1.bf16.msra.mxu0 %v11332_v62  ;;  %v12137_v62 = vld [vmem:[#allocation2 + $0x18] sm:$0x77] }
 0x1ac   :  { %2010 = vmatpush1.bf16.msra.mxu1 %v11335_v63  ;;  %1911 = vmatprep.subr.bf16.mxu0 %v11338_v1  ;;  %v9576_v63 = vcombine.high %v2037_v58, %v12137_v62  ;;  %v9575_v1 = vcombine.low %v2037_v58, %v12137_v62  ;;  %v11454_v58 = vld [vmem:[#allocation7 + $0x6a8] ss:$12 sps:$4 sm:$0xff]  }
 0x1ad   :  { %2011 = vmatprep.subr.bf16.mxu1 %v12241_v0  ;;  %v11462_v62 = vld [vmem:[#allocation7 + $0x6dc] ss:$12 sps:$4 sm:$0xff]  }
 0x1ae   :  { %1901 = vmatmul.mubr.bf16.vlgmr.msra.gmra.mrb[4].mxu0 %v9483_v43  ;;  %v11376_v43 = vld [vmem:[#allocation7 + $0x244] ss:$12 sps:$4 sm:$0xff]  }
 0x1af   :  { %1912 = vmatpush1.bf16.msra.mxu0 %v11336_v2  ;;  %9571 = vmatprep.mubr.msk.bf16.mxu0 %vm1232_vm7, %v9486_v45  ;;  %v11374_v45 = vld [vmem:[#allocation7 + $0x240] ss:$12 sps:$4 sm:$0xff]   ;;  %v11398_v2 = vld [vmem:[#allocation7 + $0x6c8] ss:$12 sps:$4 sm:$0xff]  }
 0x1b0   :  { %2012 = vmatpush1.bf16.msra.mxu1 %v11339_v3  ;;  %1913 = vmatprep.subr.bf16.mxu0 %v11342_v5  ;;  %v11402_v3 = vld [vmem:[#allocation7 + $0x55c] ss:$12 sps:$4 sm:$0xff]   ;;  %v12460_v5 = vrot.slane %v9573_v61, 1  ;;  %v11457_v61 = vld [vmem:[#allocation7 + $0x6c0] ss:$12 sps:$4 sm:$0xff]  }
 0x1b1   :  { %2013 = vmatprep.subr.bf16.mxu1 %v12241_v0 }
 0x1b3   :  { %1914 = vmatpush1.bf16.msra.mxu0 %v11340_v6  ;;  %v12463_v6 = vrot.slane %v9576_v63, 1  ;;  %v11460_v63 = vld [vmem:[#allocation7 + $0x6d8] ss:$12 sps:$4 sm:$0xff]  }
 0x1b4   :  { %2014 = vmatpush1.bf16.msra.mxu1 %v11343_v7  ;;  %1915 = vmatprep.subr.bf16.mxu0 %v11346_v8  ;;  %v11400_v7 = vld [vmem:[#allocation7 + $0x558] ss:$12 sps:$4 sm:$0xff]   ;;  %v12465_v8 = vrot.slane %v9575_v1, 1  ;;  %v11465_v1 = vld [vmem:[#allocation7 + $0x6f4] ss:$12 sps:$4 sm:$0xff]  }
 0x1b5   :  { %2015 = vmatprep.subr.bf16.mxu1 %v12241_v0 }
 0x1b7   :  { %1916 = vmatpush1.bf16.msra.mxu0 %v11344_v9  ;;  %v11403_v9 = vld [vmem:[#allocation7 + $0x6e0] ss:$12 sps:$4 sm:$0xff]  }
 0x1b8   :  { %2016 = vmatpush1.bf16.msra.mxu1 %v11347_v10  ;;  %1917 = vmatprep.subr.bf16.mxu0 %v11350_v12  ;;  %v11406_v10 = vld [vmem:[#allocation7 + $0x574] ss:$12 sps:$4 sm:$0xff]   ;;  %v11404_v12 = vld [vmem:[#allocation7 + $0x570] ss:$12 sps:$4 sm:$0xff]  }
 0x1b9   :  { %2017 = vmatprep.subr.bf16.mxu1 %v12241_v0 }
 0x1bb   :  { %1918 = vmatpush1.bf16.msra.mxu0 %v11348_v13  ;;  %v11407_v13 = vld [vmem:[#allocation7 + $0x6f8] ss:$12 sps:$4 sm:$0xff]  }
 0x1bc   :  { %2018 = vmatpush1.bf16.msra.mxu1 %v11351_v14  ;;  %1919 = vmatprep.subr.bf16.mxu0 %v11354_v18  ;;  %v11410_v14 = vld [vmem:[#allocation7 + $0x58c] ss:$12 sps:$4 sm:$0xff]   ;;  %v11411_v18 = vld [vmem:[#allocation7 + $0x710] ss:$12 sps:$4 sm:$0xff]  }
 0x1bd   :  { %10299 = vmatprep.subr.bf16.mxu1 %v11356_v20  ;;  %v11414_v20 = vld [vmem:[#allocation7 + $0x5a4] ss:$12 sps:$4 sm:$0xff]  }
 0x1bf   :  { %2028 = vmatmul.mubr.bf16.vlgmr.msra.gmra.mrb[20].mxu1 %v12452_v28  ;;  %1920 = vmatpush1.bf16.msra.mxu0 %v11352_v21  ;;  %v11412_v21 = vld [vmem:[#allocation7 + $0x5a0] ss:$12 sps:$4 sm:$0xff]  }
 0x1c0   :  { %10300 = vmatpush3.bf16.msra.mxu1 %v11357_v24  ;;  %2737 = vmatprep.mubr.bf16.mxu1 %v12454_v29  ;;  %v11416_v24 = vld [vmem:[#allocation7 + $0x5b8] ss:$12 sps:$4 sm:$0xff]  }
 0x1c1   :  { %1921 = vmatprep.subr.bf16.mxu0 %v11361_v25  ;;  %10301 = vmatprep.subr.bf16.mxu1 %v11362_v26  ;;  %v11419_v25 = vld [vmem:[#allocation7 + $0x740] ss:$12 sps:$4 sm:$0xff]  }
 0x1c2   :  { %v11422_v26 = vld [vmem:[#allocation7 + $0x5d4] ss:$12 sps:$4 sm:$0xff]  }
 0x1c3   :  { %1922 = vmatpush1.bf16.msra.mxu0 %v11359_v30  ;;  %v11424_v30 = vld [vmem:[#allocation7 + $0x5e8] ss:$12 sps:$4 sm:$0xff]  }
 0x1c4   :  { %10302 = vmatpush3.bf16.msra.mxu1 %v11363_v31  ;;  %1923 = vmatprep.subr.bf16.mxu0 %v11366_v32  ;;  %v11427_v31 = vld [vmem:[#allocation7 + $0x770] ss:$12 sps:$4 sm:$0xff]  }
 0x1c5   :  { %10303 = vmatprep.subr.bf16.mxu1 %v11367_v33  ;;  %v11430_v32 = vld [vmem:[#allocation7 + $0x604] ss:$12 sps:$4 sm:$0xff]   ;;  %v11428_v33 = vld [vmem:[#allocation7 + $0x600] ss:$12 sps:$4 sm:$0xff]  }
 0x1c7   :  { %1924 = vmatpush1.bf16.msra.mxu0 %v11364_v35  ;;  %v11431_v35 = vld [vmem:[#allocation7 + $0x788] ss:$12 sps:$4 sm:$0xff]  }
 0x1c8   :  { %10304 = vmatpush3.bf16.msra.mxu1 %v11368_v36  ;;  %1925 = vmatprep.subr.bf16.mxu0 %v11371_v39  ;;  %v11434_v36 = vld [vmem:[#allocation7 + $0x61c] ss:$12 sps:$4 sm:$0xff]   ;;  %v11432_v39 = vld [vmem:[#allocation7 + $0x618] ss:$12 sps:$4 sm:$0xff]  }
 0x1c9   :  { %10305 = vmatprep.subr.bf16.mxu1 %v11372_v40  ;;  %v11435_v40 = vld [vmem:[#allocation7 + $0x7a0] ss:$12 sps:$4 sm:$0xff]  }
 0x1cb   :  { %1926 = vmatpush1.bf16.msra.mxu0 %v11369_v41  ;;  %v11438_v41 = vld [vmem:[#allocation7 + $0x634] ss:$12 sps:$4 sm:$0xff]  }
 0x1cc   :  { %10306 = vmatpush3.bf16.msra.mxu1 %v11373_v42  ;;  %1927 = vmatprep.subr.bf16.mxu0 %v11376_v43  ;;  %v11436_v42 = vld [vmem:[#allocation7 + $0x630] ss:$12 sps:$4 sm:$0xff]   ;;  %v11439_v43 = vld [vmem:[#allocation7 + $0x7b8] ss:$12 sps:$4 sm:$0xff]  }
 0x1cd   :  { %10307 = vmatprep.subr.bf16.mxu1 %v11377_v44  ;;  %v11442_v44 = vld [vmem:[#allocation7 + $0x64c] ss:$12 sps:$4 sm:$0xff]  }
 0x1cf   :  { %1928 = vmatpush1.bf16.msra.mxu0 %v11374_v45  ;;  %v11440_v45 = vld [vmem:[#allocation7 + $0x648] ss:$12 sps:$4 sm:$0xff]  }
 0x1d0   :  { %10308 = vmatpush3.bf16.msra.mxu1 %v11378_v46  ;;  %1929 = vmatprep.subr.bf16.mxu0 %v11381_v47  ;;  %v11443_v46 = vld [vmem:[#allocation7 + $0x7d0] ss:$12 sps:$4 sm:$0xff]  }
 0x1d1   :  { %10309 = vmatprep.subr.bf16.mxu1 %v11382_v48  ;;  %v11446_v47 = vld [vmem:[#allocation7 + $0x664] ss:$12 sps:$4 sm:$0xff]   ;;  %v11444_v48 = vld [vmem:[#allocation7 + $0x660] ss:$12 sps:$4 sm:$0xff]  }
 0x1d3   :  { %1930 = vmatpush1.bf16.msra.mxu0 %v11379_v49  ;;  %v11450_v49 = vld [vmem:[#allocation7 + $0x67c] ss:$12 sps:$4 sm:$0xff]  }
 0x1d4   :  { %10310 = vmatpush3.bf16.msra.mxu1 %v11383_v50  ;;  %1931 = vmatprep.subr.bf16.mxu0 %v11386_v34  ;;  %v11448_v50 = vld [vmem:[#allocation7 + $0x678] ss:$12 sps:$4 sm:$0xff]   ;;  %v11453_v34 = vld [vmem:[#allocation7 + $0x694] ss:$12 sps:$4 sm:$0xff]  }
 0x1d5   :  { %10311 = vmatprep.subr.bf16.mxu1 %v11387_v19 }
 0x1d7   :  { %1932 = vmatpush1.bf16.msra.mxu0 %v11384_v51  ;;  %v11451_v51 = vld [vmem:[#allocation7 + $0x690] ss:$12 sps:$4 sm:$0xff]  }
 0x1d8   :  { %10312 = vmatpush3.bf16.msra.mxu1 %v11388_v52  ;;  %1933 = vmatprep.subr.bf16.mxu0 %v11391_v53  ;;  %v11456_v53 = vld [vmem:[#allocation7 + $0x6ac] ss:$12 sps:$4 sm:$0xff]  }
 0x1d9   :  { %10313 = vmatprep.subr.bf16.mxu1 %v11392_v54 }
 0x1db   :  { %1934 = vmatpush1.bf16.msra.mxu0 %v11389_v55 }
 0x1dc   :  { %10314 = vmatpush3.bf16.msra.mxu1 %v11393_v56  ;;  %2619 = vmatprep.subr.bf16.mxu0 %v11396_v57 }
 0x1dd   :  { %2746 = vmatprep.subr.bf16.mxu1 %v12241_v0 }
 0x1de   :  { %1944 = vmatmul.mubr.bf16.vlgmr.msra.gmra.mrb[4].mxu0 %v12452_v28  ;;  %v11423_v28 = vld [vmem:[#allocation7 + $0x758] ss:$12 sps:$4 sm:$0xff]  }
 0x1df   :  { %2738 = vmatmul.mubr.bf16.vlgmr.msra.gmra.mrb[24].mxu1 %v12460_v5  ;;  %2620 = vmatpush1.bf16.msra.mxu0 %v11394_v59  ;;  %v11459_v59 = vld [vmem:[#allocation7 + $0x6c4] ss:$12 sps:$4 sm:$0xff]  }
 0x1e0   :  { %2651 = vmatprep.mubr.bf16.mxu0 %v12454_v29  ;;  %2747 = vmatpush1.bf16.msra.mxu1 %v11398_v2  ;;  %v11426_v29 = vld [vmem:[#allocation7 + $0x5ec] ss:$12 sps:$4 sm:$0xff]   ;;  %v11463_v2 = vld [vmem:[#allocation7 + $0x6f0] ss:$12 sps:$4 sm:$0xff]  }
 0x1e1   :  { %9662 = vmatprep.mubr.msk.bf16.mxu1 %vm1232_vm7, %v12463_v6  ;;  %2621 = vmatprep.subr.bf16.mxu0 %v11402_v3  ;;  %v11468_v3 = vld [vmem:[#allocation7 + $0x70c] ss:$12 sps:$4 sm:$0xff]  }
 0x1e2   :  { %2748 = vmatprep.subr.bf16.mxu1 %v12241_v0 }
 0x1e3   :  { %2622 = vmatpush1.bf16.msra.mxu0 %v11400_v7  ;;  %v11466_v7 = vld [vmem:[#allocation7 + $0x708] ss:$12 sps:$4 sm:$0xff]  }
 0x1e4   :  { %2749 = vmatpush1.bf16.msra.mxu1 %v11403_v9  ;;  %2623 = vmatprep.subr.bf16.mxu0 %v11406_v10  ;;  %v11471_v9 = vld [vmem:[#allocation7 + $0x724] ss:$12 sps:$4 sm:$0xff]   ;;  %v11469_v10 = vld [vmem:[#allocation7 + $0x720] ss:$12 sps:$4 sm:$0xff]  }
 0x1e5   :  { %2750 = vmatprep.subr.bf16.mxu1 %v12241_v0 }
 0x1e7   :  { %2624 = vmatpush1.bf16.msra.mxu0 %v11404_v12  ;;  %v11474_v12 = vld [vmem:[#allocation7 + $0x73c] ss:$12 sps:$4 sm:$0xff]  }
 0x1e8   :  { %2751 = vmatpush1.bf16.msra.mxu1 %v11407_v13  ;;  %2625 = vmatprep.subr.bf16.mxu0 %v11410_v14  ;;  %v11472_v13 = vld [vmem:[#allocation7 + $0x738] ss:$12 sps:$4 sm:$0xff]   ;;  %v11475_v14 = vld [vmem:[#allocation7 + $0x750] ss:$12 sps:$4 sm:$0xff]  }
 0x1e9   :  { %2752 = vmatprep.subr.bf16.mxu1 %v12241_v0 }
 0x1eb   :  { %2626 = vmatpush1.bf16.msra.mxu0 %v11408_v17  ;;  %v11480_v17 = vld [vmem:[#allocation7 + $0x76c] ss:$12 sps:$4 sm:$0xff]  }
 0x1ec   :  { %2753 = vmatpush1.bf16.msra.mxu1 %v11411_v18  ;;  %2627 = vmatprep.subr.bf16.mxu0 %v11414_v20  ;;  %v11483_v18 = vld [vmem:[#allocation7 + $0x784] ss:$12 sps:$4 sm:$0xff]   ;;  %v11481_v20 = vld [vmem:[#allocation7 + $0x780] ss:$12 sps:$4 sm:$0xff]  }
 0x1ed   :  { %2754 = vmatprep.subr.bf16.mxu1 %v12241_v0 }
 0x1ef   :  { %2628 = vmatpush1.bf16.msra.mxu0 %v11412_v21  ;;  %v11486_v21 = vld [vmem:[#allocation7 + $0x79c] ss:$12 sps:$4 sm:$0xff]  }
 0x1f0   :  { %2755 = vmatpush1.bf16.msra.mxu1 %v11415_v22  ;;  %2629 = vmatprep.subr.bf16.mxu0 %v11418_v23  ;;  %v11484_v22 = vld [vmem:[#allocation7 + $0x798] ss:$12 sps:$4 sm:$0xff]   ;;  %v11489_v23 = vld [vmem:[#allocation7 + $0x7b4] ss:$12 sps:$4 sm:$0xff]  }
 0x1f1   :  { %2756 = vmatprep.subr.bf16.mxu1 %v12241_v0 }
 0x1f3   :  { %2630 = vmatpush1.bf16.msra.mxu0 %v11416_v24 }
 0x1f4   :  { %2757 = vmatpush1.bf16.msra.mxu1 %v11419_v25  ;;  %2631 = vmatprep.subr.bf16.mxu0 %v11422_v26 }
 0x1f5   :  { %2758 = vmatprep.subr.bf16.mxu1 %v12241_v0 }
 0x1f7   :  { %2632 = vmatpush1.bf16.msra.mxu0 %v11420_v27 }
 0x1f8   :  { %2759 = vmatpush1.bf16.msra.mxu1 %v11423_v28  ;;  %2633 = vmatprep.subr.bf16.mxu0 %v11426_v29  ;;  %v11487_v28 = vld [vmem:[#allocation7 + $0x7b0] ss:$12 sps:$4 sm:$0xff]  }
 0x1f9   :  { %2760 = vmatprep.subr.bf16.mxu1 %v12241_v0 }
 0x1fb   :  { %2634 = vmatpush1.bf16.msra.mxu0 %v11424_v30 }
 0x1fc   :  { %2761 = vmatpush1.bf16.msra.mxu1 %v11427_v31  ;;  %2635 = vmatprep.subr.bf16.mxu0 %v11430_v32  ;;  %v11492_v31 = vld [vmem:[#allocation7 + $0x7cc] ss:$12 sps:$4 sm:$0xff]   ;;  %v11490_v32 = vld [vmem:[#allocation7 + $0x7c8] ss:$12 sps:$4 sm:$0xff]  }
 0x1fd   :  { %2762 = vmatprep.subr.bf16.mxu1 %v12241_v0 }
 0x1ff   :  { %2636 = vmatpush1.bf16.msra.mxu0 %v11428_v33 }
 0x200   :  { %2763 = vmatpush1.bf16.msra.mxu1 %v11431_v35  ;;  %2637 = vmatprep.subr.bf16.mxu0 %v11434_v36 }
 0x201   :  { %2764 = vmatprep.subr.bf16.mxu1 %v12241_v0 }
 0x203   :  { %2638 = vmatpush1.bf16.msra.mxu0 %v11432_v39 }
 0x204   :  { %2765 = vmatpush1.bf16.msra.mxu1 %v11435_v40  ;;  %2639 = vmatprep.subr.bf16.mxu0 %v11438_v41 }
 0x205   :  { %2766 = vmatprep.subr.bf16.mxu1 %v12241_v0 }
 0x207   :  { %2640 = vmatpush1.bf16.msra.mxu0 %v11436_v42 }
 0x208   :  { %2767 = vmatpush1.bf16.msra.mxu1 %v11439_v43  ;;  %2641 = vmatprep.subr.bf16.mxu0 %v11442_v44 }
 0x209   :  { %2768 = vmatprep.subr.bf16.mxu1 %v12241_v0 }
 0x20b   :  { %2642 = vmatpush1.bf16.msra.mxu0 %v11440_v45 }
 0x20c   :  { %2769 = vmatpush1.bf16.msra.mxu1 %v11443_v46  ;;  %2643 = vmatprep.subr.bf16.mxu0 %v11446_v47 }
 0x20f   :  { %2779 = vmatmul.mubr.bf16.vlgmr.msra.gmra.mrb[28].mxu1 %v12465_v8  ;;  %2644 = vmatpush1.bf16.msra.mxu0 %v11444_v48 }
 0x210   :  { %2645 = vmatprep.subr.bf16.mxu0 %v11450_v49 }
 0x211   :  { %v10271_v19 = vpop.f32.mrb[8].mxu1 }
 0x212   :  { %v10272_v52 = vpop.f32.mrb[9].mxu1 }
 0x213   :  { %v10273_v54 = vadd.f32 %v10272_v52, %v10271_v19  ;;  %2646 = vmatpush1.bf16.msra.mxu0 %v11448_v50  ;;  %v10274_v55 = vpop.f32.mrb[10].mxu1 }
 0x214   :  { %v10275_v56 = vpop.f32.mrb[11].mxu1  ;;  %2647 = vmatprep.subr.bf16.mxu0 %v11453_v34 }
 0x215   :  { %v10276_v57 = vadd.f32 %v10275_v56, %v10274_v55  ;;  %v11495_v55 = vld [vmem:[#allocation9 + $0xb0] sm:$0xff]   ;;  %v11496_v56 = vld [vmem:[#allocation9 + $0x160] sm:$0xff]  }
 0x217   :  { %2648 = vmatpush1.bf16.msra.mxu0 %v11451_v51 }
 0x218   :  { %2649 = vmatprep.subr.bf16.mxu0 %v11456_v53  ;;  %v11493_v53 = vld [vmem:[#allocation9 + $0xf0] sm:$0xff]  }
 0x219   :  { %10321 = vmatprep.subr.bf16.mxu1 %v11493_v53 }
 0x21a   :  { %10322 = vmatpush3.bf16.msra.mxu1 %v11495_v55 }
 0x21b   :  { %2650 = vmatpush1.bf16.msra.mxu0 %v11454_v58  ;;  %v11498_v58 = vld [vmem:[#allocation9 + $0x1a8] sm:$0xff]  }
 0x21c   :  { %2662 = vmatprep.subr.bf16.mxu0 %v11459_v59  ;;  %v11499_v59 = vld [vmem:[#allocation9 + $0xb8] sm:$0xff]  }
 0x21e   :  { %2652 = vmatmul.mubr.bf16.vlgmr.msra.gmra.mrb[4].mxu0 %v12460_v5  ;;  %v11477_v5 = vld [vmem:[#allocation7 + $0x754] ss:$12 sps:$4 sm:$0xff]  }
 0x21f   :  { %2663 = vmatpush1.bf16.msra.mxu0 %v11457_v61  ;;  %9661 = vmatprep.mubr.msk.bf16.mxu0 %vm1232_vm7, %v12463_v6  ;;  %v11478_v6 = vld [vmem:[#allocation7 + $0x768] ss:$12 sps:$4 sm:$0xff]  }
 0x220   :  { %2664 = vmatprep.subr.bf16.mxu0 %v11462_v62  ;;  %v11500_v61 = vld [vmem:[#allocation9 + $0x168] sm:$0xff]   ;;  %v11501_v62 = vld [vmem:[#allocation9 + $0x100] sm:$0xff]  }
 0x223   :  { %2665 = vmatpush1.bf16.msra.mxu0 %v11460_v63  ;;  %v11502_v63 = vld [vmem:[#allocation9 + $0x1b0] sm:$0xff]  }
 0x224   :  { %2666 = vmatprep.subr.bf16.mxu0 %v11465_v1  ;;  %v11503_v1 = vld [vmem:[#allocation9 + $0xc0] sm:$0xff]  }
 0x227   :  { %2667 = vmatpush1.bf16.msra.mxu0 %v11463_v2  ;;  %v11504_v2 = vld [vmem:[#allocation9 + $0x170] sm:$0xff]  }
 0x228   :  { %2668 = vmatprep.subr.bf16.mxu0 %v11468_v3  ;;  %v11505_v3 = vld [vmem:[#allocation9 + $0x108] sm:$0xff]  }
 0x22b   :  { %2669 = vmatpush1.bf16.msra.mxu0 %v11466_v7  ;;  %v11506_v7 = vld [vmem:[#allocation9 + $0x1b8] sm:$0xff]  }
 0x22c   :  { %2670 = vmatprep.subr.bf16.mxu0 %v11471_v9  ;;  %v11507_v9 = vld [vmem:[#allocation9 + $0xc8] sm:$0xff]  }
 0x22f   :  { %2671 = vmatpush1.bf16.msra.mxu0 %v11469_v10  ;;  %v11508_v10 = vld [vmem:[#allocation9 + $0x178] sm:$0xff]  }
 0x230   :  { %2672 = vmatprep.subr.bf16.mxu0 %v11474_v12  ;;  %v11509_v12 = vld [vmem:[#allocation9 + $0x110] sm:$0xff]  }
 0x233   :  { %2673 = vmatpush1.bf16.msra.mxu0 %v11472_v13  ;;  %v11510_v13 = vld [vmem:[#allocation9 + $0x1c0] sm:$0xff]  }
 0x234   :  { %2674 = vmatprep.subr.bf16.mxu0 %v11477_v5  ;;  %v11511_v5 = vld [vmem:[#allocation9 + $0xd0] sm:$0xff]  }
 0x237   :  { %2675 = vmatpush1.bf16.msra.mxu0 %v11475_v14  ;;  %v11512_v14 = vld [vmem:[#allocation9 + $0x180] sm:$0xff]  }
 0x238   :  { %2676 = vmatprep.subr.bf16.mxu0 %v11480_v17  ;;  %v2793_v17 = vld [vmem:[%s13067_s4] sm:$0x7] }
 0x23b   :  { %2677 = vmatpush1.bf16.msra.mxu0 %v11478_v6 }
 0x23c   :  { %2678 = vmatprep.subr.bf16.mxu0 %v11483_v18 }
 0x23f   :  { %2679 = vmatpush1.bf16.msra.mxu0 %v11481_v20  ;;  %v2806_v20 = vrot.slane %v2793_v17, %v12380_v37 }
 0x240   :  { %2680 = vmatprep.subr.bf16.mxu0 %v11486_v21 }
 0x241   :  { %v1397_v24 = vpop.f32.mrb[12].mxu1 }
 0x242   :  { %v1398_v25 = vadd.f32 %v10273_v54, %v1397_v24  ;;  %v1399_v26 = vpop.f32.mrb[13].mxu1  ;;  %v11494_v54 = vld [vmem:[#allocation9 + $0x1a0] sm:$0xff]  }
 0x243   :  { %v1400_v27 = vpop.f32.mrb[14].mxu1  ;;  %2681 = vmatpush1.bf16.msra.mxu0 %v11484_v22 }
 0x244   :  { %v1401_v29 = vadd.f32 %v10276_v57, %v1400_v27  ;;  %v1402_v30 = vpop.f32.mrb[15].mxu1  ;;  %2682 = vmatprep.subr.bf16.mxu0 %v11489_v23  ;;  %v11497_v57 = vld [vmem:[#allocation9 + $0xf8] sm:$0xff]  }
 0x245   :  { %10323 = vmatprep.subr.bf16.mxu1 %v11497_v57 }
 0x246   :  { %10324 = vmatpush3.bf16.msra.mxu1 %v11499_v59 }
 0x247   :  { %2683 = vmatpush1.bf16.msra.mxu0 %v11487_v28  ;;  %10325 = vmatprep.subr.bf16.mxu1 %v11501_v62 }
 0x248   :  { %2684 = vmatprep.subr.bf16.mxu0 %v11492_v31  ;;  %v2798_v31 = vrot.slane %v2793_v17, %v12369_v15 }
 0x24a   :  { %10326 = vmatpush3.bf16.msra.mxu1 %v11503_v1 }
 0x24b   :  { %2685 = vmatpush1.bf16.msra.mxu0 %v11490_v32  ;;  %10327 = vmatprep.subr.bf16.mxu1 %v11505_v3  ;;  %v2802_v32 = vrot.slane %v2793_v17, %v12372_v16  ;;  %v11525_v17 = vld [vmem:[#allocation9 + $0x250] sm:$0xff]  }
 0x24c   :  { %10379 = vmatprep.subr.bf16.mxu0 %v11494_v54 }
 0x24e   :  { %2695 = vmatmul.mubr.bf16.vlgmr.msra.gmra.mrb[4].mxu0 %v12465_v8  ;;  %10328 = vmatpush3.bf16.msra.mxu1 %v11507_v9 }
 0x24f   :  { %10380 = vmatpush3.bf16.msra.mxu0 %v11496_v56  ;;  %10329 = vmatprep.subr.bf16.mxu1 %v11509_v12  ;;  %v11522_v12 = vld [vmem:[#allocation9 + $0x1d8] sm:$0xff]  }
 0x250   :  { %10381 = vmatprep.subr.bf16.mxu0 %v11498_v58 }
 0x252   :  { %10330 = vmatpush3.bf16.msra.mxu1 %v11511_v5 }
 0x253   :  { %10382 = vmatpush3.bf16.msra.mxu0 %v11500_v61 }
 0x254   :  { %10383 = vmatprep.subr.bf16.mxu0 %v11502_v63 }
 0x257   :  { %10384 = vmatpush3.bf16.msra.mxu0 %v11504_v2 }
 0x258   :  { %10385 = vmatprep.subr.bf16.mxu0 %v11506_v7 }
 0x25b   :  { %10386 = vmatpush3.bf16.msra.mxu0 %v11508_v10  ;;  %v11521_v10 = vld [vmem:[#allocation9 + $0x128] sm:$0xff]  }
 0x25c   :  { %10387 = vmatprep.subr.bf16.mxu0 %v11510_v13  ;;  %v11523_v13 = vld [vmem:[#allocation9 + $0xe8] sm:$0xff]  }
 0x25f   :  { %10388 = vmatpush3.bf16.msra.mxu0 %v11512_v14  ;;  %v11524_v14 = vld [vmem:[#allocation9 + $0x198] sm:$0xff]  }
 0x262   :  { %v10293_v33 = vpop.f32.mrb[16].mxu1 }
 0x263   :  { %v10294_v35 = vpop.f32.mrb[17].mxu1 }
 0x264   :  { %v10295_v36 = vadd.f32 %v10294_v35, %v10293_v33  ;;  %v10296_v39 = vpop.f32.mrb[18].mxu1 }
 0x265   :  { %v10297_v40 = vpop.f32.mrb[19].mxu1 }
 0x266   :  { %v10298_v41 = vadd.f32 %v10297_v40, %v10296_v39  ;;  %v1989_v42 = vadd.f32 %v10295_v36, %v1398_v25 }
 0x268   :  { %v1992_v43 = vadd.f32 %v10298_v41, %v1401_v29 }
 0x292   :  { %v2029_v44 = vpop.f32.mrb[20].mxu1 }
 0x293   :  { %v2030_v45 = vadd.f32 %v2029_v44, %v1989_v42  ;;  %v2031_v46 = vpop.f32.mrb[21].mxu1 }
 0x294   :  { %v2032_v47 = vpop.f32.mrb[22].mxu1 }
 0x295   :  { %v2033_v48 = vadd.f32 %v2032_v47, %v1992_v43  ;;  %v2034_v49 = vpop.f32.mrb[23].mxu1  ;;  %v11513_v47 = vld [vmem:[#allocation9 + $0x118] sm:$0xff]  }
 0x296   :  { %10331 = vmatprep.subr.bf16.mxu1 %v11513_v47 }
 0x2b2   :  { %v10315_v50 = vpop.f32.mrb[24].mxu1 }
 0x2b3   :  { %v10316_v34 = vpop.f32.mrb[25].mxu1 }
 0x2b4   :  { %v10317_v19 = vadd.f32 %v10316_v34, %v10315_v50  ;;  %v10318_v51 = vpop.f32.mrb[26].mxu1  ;;  %v11515_v50 = vld [vmem:[#allocation9 + $0xd8] sm:$0xff]   ;;  %v11516_v34 = vld [vmem:[#allocation9 + $0x188] sm:$0xff]  }
 0x2b5   :  { %v10319_v52 = vpop.f32.mrb[27].mxu1  ;;  %10332 = vmatpush3.bf16.msra.mxu1 %v11515_v50 }
 0x2b6   :  { %v10320_v8 = vadd.f32 %v10319_v52, %v10318_v51  ;;  %v11518_v51 = vld [vmem:[#allocation9 + $0x1d0] sm:$0xff]   ;;  %v11519_v52 = vld [vmem:[#allocation9 + $0xe0] sm:$0xff]  }
 0x2e2   :  { %v2780_v6 = vpop.f32.mrb[28].mxu1 }
 0x2e3   :  { %v2781_v18 = vadd.f32 %v10317_v19, %v2780_v6  ;;  %v2782_v21 = vpop.f32.mrb[29].mxu1  ;;  %v11517_v19 = vld [vmem:[#allocation9 + $0x120] sm:$0xff]  }
 0x2e4   :  { %v2783_v22 = vpop.f32.mrb[30].mxu1  ;;  %10333 = vmatprep.subr.bf16.mxu1 %v11517_v19 }
 0x2e5   :  { %v2789_v23 = vadd.f32 %v2781_v18, %v2030_v45  ;;  %v2784_v24 = vadd.f32 %v10320_v8, %v2783_v22  ;;  %v2785_v25 = vpop.f32.mrb[31].mxu1  ;;  %v11520_v8 = vld [vmem:[#allocation9 + $0x190] sm:$0xff]   ;;  %10334 = vmatpush3.bf16.msra.mxu1 %v11519_v52 }
 0x2e6   :  { %10335 = vmatprep.subr.bf16.mxu1 %v11521_v10 }
 0x2e7   :  { %v2812_v26 = vadd.f32 %v2806_v20, %v2789_v23  ;;  %v2792_v27 = vadd.f32 %v2784_v24, %v2033_v48  ;;  %v11514_v48 = vld [vmem:[#allocation9 + $0x1c8] sm:$0xff]  }
 0x2e8   :  { %10389 = vmatprep.subr.bf16.mxu0 %v11514_v48 }
 0x2e9   :  { %v2818_v28 = vmax.f32 %v2812_v26, 0.0  ;;  %v2815_v29 = vadd.f32 %v2806_v20, %v2792_v27  ;;  %10390 = vmatpush3.bf16.msra.mxu0 %v11516_v34  ;;  %10336 = vmatpush3.bf16.msra.mxu1 %v11523_v13  ;;  %v12243_v20 = vmov 0.0  }
 0x2ea   :  { %10391 = vmatprep.subr.bf16.mxu0 %v11518_v51  ;;  %10753 = vmatprep.subr.bf16.mxu1 %v12243_v20 }
 0x2eb   :  { %2824 = vst [vmem:[#allocation3 + $0x10] sm:$0xff] %v2818_v28  ;;  %v2821_v30 = vmax.f32 %v2815_v29, 0.0 }
 0x2ed   :  { %2827 = vst [vmem:[#allocation3 + $0x28] sm:$0xf] %v2821_v30  ;;  %10392 = vmatpush3.bf16.msra.mxu0 %v11520_v8 }
 0x2ee   :  { %10393 = vmatprep.subr.bf16.mxu0 %v11522_v12 }
 0x2f1   :  { %10394 = vmatpush3.bf16.msra.mxu0 %v11524_v14 }
 0x2f2   :  { %10408 = vmatprep.subr.bf16.mxu0 %v11525_v17  ;;  %v11529_v17 = vld [vmem:[#allocation9 + $0x138] sm:$0xff]  }
 0x321   :  { %v2696_v33 = vpop.f32.mrb[4].mxu0 }
 0x322   :  { %v2810_v35 = vadd.f32 %v2798_v31, %v2696_v33  ;;  %v2698_v36 = vpop.f32.mrb[5].mxu0 }
 0x323   :  { %v2811_v39 = vadd.f32 %v2802_v32, %v2698_v36  ;;  %v2700_v40 = vpop.f32.mrb[6].mxu0 }
 0x324   :  { %v2816_v41 = vmax.f32 %v2810_v35, 0.0  ;;  %v2813_v42 = vadd.f32 %v2798_v31, %v2700_v40  ;;  %v2702_v43 = vpop.f32.mrb[7].mxu0 }
 0x325   :  { %v2817_v44 = vmax.f32 %v2811_v39, 0.0  ;;  %v2814_v45 = vadd.f32 %v2802_v32, %v2702_v43 }
 0x326   :  { %2822 = vst [vmem:[#allocation3] sm:$0xff] %v2816_v41  ;;  %v2819_v46 = vmax.f32 %v2813_v42, 0.0 }
 0x327   :  { %2823 = vst [vmem:[#allocation3 + $0x8] sm:$0xff] %v2817_v44  ;;  %v2820_v49 = vmax.f32 %v2814_v45, 0.0 }
 0x328   :  { %2825 = vst [vmem:[#allocation3 + $0x18] sm:$0xf] %v2819_v46 }
 0x329   :  { %2826 = vst [vmem:[#allocation3 + $0x20] sm:$0xf] %v2820_v49 }
 0x32e   :  { %v3424_v53 = vld [vmem:[#allocation3 + $0x4] ss:$8 sm:$0x7]  ;;  %v3426_v54 = vld [vmem:[#allocation3 + $0x5] ss:$8 sm:$0x7] }
 0x32f   :  { %v11081_v55 = vpack.i.bf16 %v3426_v54, %v3424_v53  ;;  %v12494_v56 = vld [vmem:[#allocation3 + $0x2] ss:$8 sm:$0x7]  ;;  %v12496_v57 = vld [vmem:[#allocation3 + $0x3] ss:$8 sm:$0x7] }
 0x330   :  { %v11071_v58 = vpack.i.bf16 %v12496_v57, %v12494_v56  ;;  %v12500_v59 = vld [vmem:[#allocation3 + $0x6] ss:$8 sm:$0x7]  ;;  %v12502_v61 = vld [vmem:[#allocation3 + $0x7] ss:$8 sm:$0x7] }
 0x331   :  { %11082 = vrot.lane.b32.xlu1 %v11081_v55, %s12242_s21  ;;  %v12505_v62 = vld [vmem:[#allocation3] ss:$8 sm:$0x7]  ;;  %v12507_v63 = vld [vmem:[#allocation3 + $0x1] ss:$8 sm:$0x7]  ;;  %v11086_v2 = vpack.i.bf16 %v12502_v61, %v12500_v59 }
 0x332   :  { %11072 = vrot.lane.b32.xlu0 %v11071_v58, %s12242_s21  ;;  %v12510_v1 = vld [vmem:[#allocation3 + $0x1a] ss:$8 sm:$0x7]  ;;  %v12514_v3 = vld [vmem:[#allocation3 + $0x1b] ss:$8 sm:$0x7]  ;;  %v11076_v9 = vpack.i.bf16 %v12507_v63, %v12505_v62 }
 0x333   :  { %v12516_v7 = vld [vmem:[#allocation3 + $0x18] ss:$8 sm:$0x7]  ;;  %v12521_v5 = vld [vmem:[#allocation3 + $0x19] ss:$8 sm:$0x7]  ;;  %v11096_v6 = vpack.i.bf16 %v12514_v3, %v12510_v1 }
 0x334   :  { %v11091_v18 = vpack.i.bf16 %v12521_v5, %v12516_v7 }
 0x335   :  { %11087 = vrot.lane.b32.xlu1 %v11086_v2, %s12242_s21 }
 0x336   :  { %11077 = vrot.lane.b32.xlu0 %v11076_v9, %s12242_s21  ;;  %v11528_v9 = vld [vmem:[#allocation9 + $0x258] sm:$0xff]  }
 0x339   :  { %11097 = vrot.lane.b32.xlu1 %v11096_v6, %s12242_s21  ;;  %v11530_v6 = vld [vmem:[#allocation9 + $0x218] sm:$0xff]  }
 0x33a   :  { %11092 = vrot.lane.b32.xlu0 %v11091_v18, %s12242_s21  ;;  %v11531_v18 = vld [vmem:[#allocation9 + $0x260] sm:$0xff]  }
 0x3a3   :  { %v11083_v21 = vpop.permute.xlu1 %11082 }
 0x3a4   :  { %v11085_v22 = vunpack.i.h.bf16 %v11083_v21  ;;  %v11084_v23 = vunpack.i.l.bf16 %v11083_v21  ;;  %v11073_v24 = vpop.permute.xlu0 %11072 }
 0x3a5   :  { %v11075_v25 = vunpack.i.h.bf16 %v11073_v24  ;;  %v11074_v26 = vunpack.i.l.bf16 %v11073_v24  ;;  %v11533_v24 = vld [vmem:[#allocation9 + $0x220] sm:$0xff]  }
 0x3a6   :  { %v3437_v27 = vrot.slane %v11085_v22, 1  ;;  %v3430_v28 = vrot.slane %v11084_v23, 1 }
 0x3a7   :  { %v2924_v29 = vrot.slane %v11075_v25, 1  ;;  %v2917_v30 = vrot.slane %v11074_v26, 1  ;;  %v11088_v31 = vpop.permute.xlu1 %11087 }
 0x3a8   :  { %v3438_v32 = vsel %vm2835_vm8, %v11085_v22, %v3437_v27  ;;  %v3431_v33 = vsel %vm2835_vm8, %v11084_v23, %v3430_v28  ;;  %v11090_v35 = vunpack.i.h.bf16 %v11088_v31  ;;  %v11089_v36 = vunpack.i.l.bf16 %v11088_v31  ;;  %v11532_v23 = vld [vmem:[#allocation9 + $0x140] sm:$0xff]   ;;  %v11535_v31 = vld [vmem:[#allocation9 + $0x148] sm:$0xff]  }
 0x3a9   :  { %v3440_v39 = vmax.f32 %v3426_v54, %v3438_v32  ;;  %v3433_v40 = vmax.f32 %v3424_v53, %v3431_v33  ;;  %v2925_v41 = vsel %vm2835_vm8, %v11075_v25, %v2924_v29  ;;  %v2918_v42 = vsel %vm2835_vm8, %v11074_v26, %v2917_v30  ;;  %v11534_v26 = vld [vmem:[#allocation9 + $0x268] sm:$0xff]   ;;  %v11537_v33 = vld [vmem:[#allocation9 + $0x270] sm:$0xff]  }
 0x3aa   :  { %v3736_v43 = vrot.slane %v11090_v35, 1  ;;  %v3729_v44 = vrot.slane %v11089_v36, 1  ;;  %v2927_v45 = vmax.f32 %v12496_v57, %v2925_v41  ;;  %v2920_v46 = vmax.f32 %v12494_v56, %v2918_v42  ;;  %v11078_v56 = vpop.permute.xlu0 %11077  ;;  %v11536_v32 = vld [vmem:[#allocation9 + $0x228] sm:$0xff]   ;;  %v11538_v41 = vld [vmem:[#allocation9 + $0x150] sm:$0xff]  }
 0x3ab   :  { %v12537_v47 = vmax.f32 %v3433_v40, %v3440_v39  ;;  %v11080_v12 = vunpack.i.h.bf16 %v11078_v56  ;;  %v11079_v13 = vunpack.i.l.bf16 %v11078_v56  ;;  %v11539_v42 = vld [vmem:[#allocation9 + $0x230] sm:$0xff]   ;;  %v11547_v56 = vld [vmem:[#allocation9 + $0x48] sm:$0xff]  }
 0x3ac   :  { %v3737_v48 = vsel %vm2835_vm8, %v11090_v35, %v3736_v43  ;;  %v3730_v49 = vsel %vm2835_vm8, %v11089_v36, %v3729_v44  ;;  %v12543_v19 = vmax.f32 %v2920_v46, %v2927_v45  ;;  %v11540_v43 = vld [vmem:[#allocation9 + $0x278] sm:$0xff]  }
 0x3ad   :  { %v3739_v50 = vmax.f32 %v12502_v61, %v3737_v48  ;;  %v3732_v34 = vmax.f32 %v12500_v59, %v3730_v49  ;;  %v3450_v51 = vrot.slane %v12537_v47, %v12372_v16  ;;  %v3446_v54 = vrot.slane %v12537_v47, %v12369_v15  ;;  %v11526_v59 = vld [vmem:[#allocation9 + $0x130] sm:$0xff]   ;;  %v11543_v49 = vld [vmem:[#allocation9 + $0x40] sm:$0xff]  }
 0x3ae   :  { %v2937_v52 = vrot.slane %v12543_v19, %v12372_v16  ;;  %v2933_v53 = vrot.slane %v12543_v19, %v12369_v15  ;;  %v11527_v61 = vld [vmem:[#allocation9 + $0x210] sm:$0xff]   ;;  %v2842_v21 = vrot.slane %v11080_v12, 1  ;;  %v2834_v22 = vrot.slane %v11079_v13, 1  ;;  %v11093_v25 = vpop.permute.xlu0 %11092 }
 0x3af   :  { %v3459_v8 = vpack.c.bf16 %v3450_v51, %v3450_v51  ;;  %v12553_v55 = vmax.f32 %v3732_v34, %v3739_v50  ;;  %v3458_v2 = vpack.c.bf16 %v3446_v54, %v3446_v54  ;;  %v11095_v29 = vunpack.i.h.bf16 %v11093_v25  ;;  %v11544_v50 = vld [vmem:[#allocation9 + $0x280] sm:$0xff]  }
 0x3b0   :  { %v2946_v57 = vpack.c.bf16 %v2937_v52, %v2937_v52  ;;  %v2945_v58 = vpack.c.bf16 %v2933_v53, %v2933_v53  ;;  %v2843_v27 = vsel %vm2835_vm8, %v11080_v12, %v2842_v21  ;;  %v2836_v28 = vsel %vm2835_vm8, %v11079_v13, %v2834_v22  ;;  %v11546_v54 = vld [vmem:[#allocation9 + $0x240] sm:$0xff]   ;;  %v11558_v21 = vld [vmem:[#allocation9 + $0x2c8] sm:$0xff]  }
 0x3b1   :  { %3673 = vmatprep.mubr.bf16.mxu0 %v3459_v8  ;;  %v3749_v10 = vrot.slane %v12553_v55, %v12372_v16  ;;  %v11094_v30 = vunpack.i.l.bf16 %v11093_v25  ;;  %v2845_v35 = vmax.f32 %v12507_v63, %v2843_v27  ;;  %v2838_v36 = vmax.f32 %v12505_v62, %v2836_v28  ;;  %v11541_v63 = vld [vmem:[#allocation9 + $0x158] sm:$0xff]   ;;  %v11545_v8 = vld [vmem:[#allocation9] sm:$0xff]   ;;  %v11562_v25 = vld [vmem:[#allocation9 + $0x2d0] sm:$0xff]  }
 0x3b2   :  { %3160 = vmatprep.mubr.bf16.mxu1 %v2946_v57  ;;  %3674 = vmatmul.mubr.bf16.vlgmr.msra.gmra.mrb[8].mxu0 %v3458_v2  ;;  %v4035_v39 = vrot.slane %v11095_v29, 1  ;;  %v11542_v62 = vld [vmem:[#allocation9 + $0x238] sm:$0xff]   ;;  %v2941_v48 = vrot.slane %v12543_v19, %v12380_v37  ;;  %v11552_v2 = vld [vmem:[#allocation9 + $0x300] sm:$0xff]   ;;  %v11565_v28 = vld [vmem:[#allocation9 + $0x28] sm:$0xff]  }
 0x3b3   :  { %3161 = vmatmul.mubr.bf16.vlgmr.msra.gmra.mrb[32].mxu1 %v2945_v58  ;;  %v3758_v14 = vpack.c.bf16 %v3749_v10, %v3749_v10  ;;  %10409 = vmatpush3.bf16.msra.mxu0 %v11527_v61  ;;  %v4028_v40 = vrot.slane %v11094_v30, 1  ;;  %v12567_v44 = vmax.f32 %v2838_v36, %v2845_v35  ;;  %v11548_v58 = vld [vmem:[#allocation9 + $0x288] sm:$0xff]   ;;  %v3745_v61 = vrot.slane %v12553_v55, %v12369_v15  ;;  %v11553_v10 = vld [vmem:[#allocation9 + $0x10] sm:$0xff]   ;;  %v11554_v12 = vld [vmem:[#allocation9 + $0x2c0] sm:$0xff]  }
 0x3b4   :  { %10754 = vmatpush3.bf16.msra.mxu1 %v11526_v59  ;;  %10410 = vmatprep.subr.bf16.mxu0 %v11528_v9  ;;  %v4036_v45 = vsel %vm2835_vm8, %v11095_v29, %v4035_v39  ;;  %v2947_v53 = vpack.c.bf16 %v2941_v48, %v2941_v48  ;;  %v11549_v59 = vld [vmem:[#allocation9 + $0x8] sm:$0xff]   ;;  %v11559_v22 = vld [vmem:[#allocation9 + $0x60] sm:$0xff]   ;;  %v11564_v27 = vld [vmem:[#allocation9 + $0x318] sm:$0xff]  }
 0x3b5   :  { %10755 = vmatprep.subr.bf16.mxu1 %v12243_v20  ;;  %3972 = vmatprep.mubr.bf16.mxu0 %v3758_v14  ;;  %v4029_v46 = vsel %vm2835_vm8, %v11094_v30, %v4028_v40  ;;  %v2855_v34 = vrot.slane %v12567_v44, %v12372_v16  ;;  %v4038_v51 = vmax.f32 %v12521_v5, %v4036_v45  ;;  %v11551_v5 = vld [vmem:[#allocation9 + $0x50] sm:$0xff]   ;;  %v11555_v14 = vld [vmem:[#allocation9 + $0x58] sm:$0xff]   ;;  %v11572_v36 = vld [vmem:[#allocation9 + $0x328] sm:$0xff]  }
 0x3b6   :  { %10765 = vmatprep.mubr.msk.bf16.mxu1 %vm12244_vm9, %v12243_v20  ;;  %v4031_v52 = vmax.f32 %v12516_v7, %v4029_v46  ;;  %v11550_v7 = vld [vmem:[#allocation9 + $0x248] sm:$0xff]   ;;  %v3757_v13 = vpack.c.bf16 %v3745_v61, %v3745_v61  ;;  %v11566_v29 = vld [vmem:[#allocation9 + $0x2d8] sm:$0xff]   ;;  %v11567_v30 = vld [vmem:[#allocation9 + $0x70] sm:$0xff]  }
 0x3b7   :  { %10411 = vmatpush3.bf16.msra.mxu0 %v11530_v6  ;;  %v2864_v57 = vpack.c.bf16 %v2855_v34, %v2855_v34  ;;  %v11571_v35 = vld [vmem:[#allocation9 + $0x78] sm:$0xff]   ;;  %v11574_v40 = vld [vmem:[#allocation9 + $0x2e8] sm:$0xff]   ;;  %v11577_v46 = vld [vmem:[#allocation9 + $0x2f0] sm:$0xff]  }
 0x3b8   :  { %10756 = vmatpush3.bf16.msra.mxu1 %v11529_v17  ;;  %10412 = vmatprep.subr.bf16.mxu0 %v11531_v18  ;;  %v12579_v19 = vmax.f32 %v4031_v52, %v4038_v51  ;;  %v11556_v17 = vld [vmem:[#allocation9 + $0x308] sm:$0xff]   ;;  %v11557_v18 = vld [vmem:[#allocation9 + $0x18] sm:$0xff]   ;;  %v11581_v34 = vld [vmem:[#allocation9 + $0x90] sm:$0xff]  }
 0x3b9   :  { %10757 = vmatprep.subr.bf16.mxu1 %v12243_v20  ;;  %v11573_v39 = vld [vmem:[#allocation9 + $0x38] sm:$0xff]   ;;  %v11582_v51 = vld [vmem:[#allocation9 + $0x3f0] sm:$0xff]  }
 0x3ba   :  { %v4048_v9 = vrot.slane %v12579_v19, %v12372_v16  ;;  %v11580_v48 = vld [vmem:[#allocation9 + $0x2f8] sm:$0xff]  }
 0x3bb   :  { %10413 = vmatpush3.bf16.msra.mxu0 %v11533_v24  ;;  %v11561_v24 = vld [vmem:[#allocation9 + $0x20] sm:$0xff]  }
 0x3bc   :  { %10758 = vmatpush3.bf16.msra.mxu1 %v11532_v23  ;;  %10414 = vmatprep.subr.bf16.mxu0 %v11534_v26  ;;  %v4057_v6 = vpack.c.bf16 %v4048_v9, %v4048_v9  ;;  %v11560_v23 = vld [vmem:[#allocation9 + $0x310] sm:$0xff]   ;;  %v11563_v26 = vld [vmem:[#allocation9 + $0x68] sm:$0xff]  }
 0x3bd   :  { %10759 = vmatprep.subr.bf16.mxu1 %v12243_v20  ;;  %v11588_v9 = vld [vmem:[#allocation9 + $0x408] sm:$0xff]  }
 0x3bf   :  { %10415 = vmatpush3.bf16.msra.mxu0 %v11536_v32  ;;  %v11569_v32 = vld [vmem:[#allocation9 + $0x30] sm:$0xff]  }
 0x3c0   :  { %10760 = vmatpush3.bf16.msra.mxu1 %v11535_v31  ;;  %10416 = vmatprep.subr.bf16.mxu0 %v11537_v33  ;;  %v11568_v31 = vld [vmem:[#allocation9 + $0x320] sm:$0xff]  }
 0x3c1   :  { %10761 = vmatprep.subr.bf16.mxu1 %v12243_v20  ;;  %v11570_v33 = vld [vmem:[#allocation9 + $0x2e0] sm:$0xff]  }
 0x3c3   :  { %10417 = vmatpush3.bf16.msra.mxu0 %v11539_v42  ;;  %v11575_v42 = vld [vmem:[#allocation9 + $0x330] sm:$0xff]  }
 0x3c4   :  { %10762 = vmatpush3.bf16.msra.mxu1 %v11538_v41  ;;  %10418 = vmatprep.subr.bf16.mxu0 %v11540_v43  ;;  %v2851_v41 = vrot.slane %v12567_v44, %v12369_v15  ;;  %v11576_v43 = vld [vmem:[#allocation9 + $0x80] sm:$0xff]  }
 0x3c5   :  { %10763 = vmatprep.subr.bf16.mxu1 %v12243_v20 }
 0x3c6   :  { %v2863_v45 = vpack.c.bf16 %v2851_v41, %v2851_v41  ;;  %v11607_v41 = vld [vmem:[#allocation9 + $0x360] sm:$0xff]  }
 0x3c7   :  { %10419 = vmatpush3.bf16.msra.mxu0 %v11542_v62  ;;  %v11579_v62 = vld [vmem:[#allocation9 + $0x88] sm:$0xff]  }
 0x3c8   :  { %10764 = vmatpush3.bf16.msra.mxu1 %v11541_v63  ;;  %10420 = vmatprep.subr.bf16.mxu0 %v11544_v50  ;;  %v11578_v63 = vld [vmem:[#allocation9 + $0x338] sm:$0xff]   ;;  %v11098_v50 = vpop.permute.xlu1 %11097 }
 0x3c9   :  { %10350 = vmatprep.subr.bf16.mxu1 %v11543_v49  ;;  %v4044_v49 = vrot.slane %v12579_v19, %v12369_v15 }
 0x3cb   :  { %10766 = vmatmul.mubr.msk.bf16.vlgmr.msra.gmra.mrb[36].mxu1 %vm2835_vm8, %v2947_v53  ;;  %10421 = vmatpush3.bf16.msra.mxu0 %v11546_v54  ;;  %v4056_v52 = vpack.c.bf16 %v4044_v49, %v4044_v49  ;;  %v11099_v53 = vunpack.i.l.bf16 %v11098_v50  ;;  %v11583_v54 = vld [vmem:[#allocation9 + $0x98] sm:$0xff]  }
 0x3cc   :  { %10351 = vmatpush3.bf16.msra.mxu1 %v11545_v8  ;;  %3375 = vmatprep.mubr.bf16.mxu1 %v2864_v57  ;;  %v11100_v8 = vunpack.i.h.bf16 %v11098_v50  ;;  %v11612_v50 = vld [vmem:[#allocation9 + $0x378] sm:$0xff]  }
 0x3cd   :  { %10352 = vmatprep.subr.bf16.mxu1 %v11547_v56  ;;  %10422 = vmatprep.subr.bf16.mxu0 %v11548_v58  ;;  %v11584_v56 = vld [vmem:[#allocation9 + $0x3f8] sm:$0xff]   ;;  %v4327_v58 = vrot.slane %v11099_v53, 1 }
 0x3ce   :  { %v4334_v57 = vrot.slane %v11100_v8, 1 }
 0x3cf   :  { %10423 = vmatpush3.bf16.msra.mxu0 %v11550_v7  ;;  %v11586_v7 = vld [vmem:[#allocation9 + $0x400] sm:$0xff]   ;;  %v4328_v61 = vsel %vm2835_vm8, %v11099_v53, %v4327_v58  ;;  %v11618_v53 = vld [vmem:[#allocation9 + $0x390] sm:$0xff]  }
 0x3d0   :  { %10353 = vmatpush3.bf16.msra.mxu1 %v11549_v59  ;;  %10437 = vmatprep.subr.bf16.mxu0 %v11552_v2  ;;  %v11585_v59 = vld [vmem:[#allocation9 + $0xa0] sm:$0xff]   ;;  %v11587_v2 = vld [vmem:[#allocation9 + $0xa8] sm:$0xff]  }
 0x3d1   :  { %10354 = vmatprep.subr.bf16.mxu1 %v11551_v5  ;;  %v4335_v5 = vsel %vm2835_vm8, %v11100_v8, %v4334_v57  ;;  %v11617_v8 = vld [vmem:[#allocation9 + $0x3d0] sm:$0xff]   ;;  %v11621_v57 = vld [vmem:[#allocation9 + $0x3e0] sm:$0xff]  }
 0x3d2   :  { %3973 = vmatmul.mubr.bf16.vlgmr.msra.gmra.mrb[12].mxu0 %v3757_v13  ;;  %v4330_v13 = vmax.f32 %v12510_v1, %v4328_v61  ;;  %v11592_v1 = vld [vmem:[#allocation9 + $0x418] sm:$0xff]   ;;  %v11622_v58 = vld [vmem:[#allocation9 + $0x3a0] sm:$0xff]  }
 0x3d3   :  { %10438 = vmatpush3.bf16.msra.mxu0 %v11554_v12  ;;  %4271 = vmatprep.mubr.bf16.mxu0 %v4057_v6  ;;  %v4337_v12 = vmax.f32 %v12514_v3, %v4335_v5  ;;  %v11590_v6 = vld [vmem:[#allocation9 + $0x410] sm:$0xff]  }
 0x3d4   :  { %10355 = vmatpush3.bf16.msra.mxu1 %v11553_v10  ;;  %10439 = vmatprep.subr.bf16.mxu0 %v11556_v17  ;;  %v2859_v10 = vrot.slane %v12567_v44, %v12380_v37  ;;  %v11591_v44 = vld [vmem:[#allocation9 + $0x1e8] sm:$0xff]   ;;  %v11627_v61 = vld [vmem:[#allocation4 + $0x24] ss:$16 sps:$4 sm:$0xff]  }
 0x3d5   :  { %10356 = vmatprep.subr.bf16.mxu1 %v11555_v14  ;;  %v11589_v14 = vld [vmem:[#allocation9 + $0x1e0] sm:$0xff]  }
 0x3d6   :  { %v2865_v17 = vpack.c.bf16 %v2859_v10, %v2859_v10  ;;  %v11630_v10 = vld [vmem:[#allocation4 + $0x2c] ss:$16 sps:$4 sm:$0xff]  }
 0x3d7   :  { %10440 = vmatpush3.bf16.msra.mxu0 %v11558_v21  ;;  %v11593_v21 = vld [vmem:[#allocation9 + $0x1f0] sm:$0xff]  }
 0x3d8   :  { %10357 = vmatpush3.bf16.msra.mxu1 %v11557_v18  ;;  %10441 = vmatprep.subr.bf16.mxu0 %v11560_v23  ;;  %v12610_v18 = vmax.f32 %v4330_v13, %v4337_v12  ;;  %v11594_v23 = vld [vmem:[#allocation9 + $0x1f8] sm:$0xff]   ;;  %v4737_v12 = vld [vmem:[%s13063_s0 + $0x11] sm:$0xff]  ;;  %v4738_v13 = vld [vmem:[%s13063_s0 + $0x19] sm:$0x3f] }
 0x3d9   :  { %10358 = vmatprep.subr.bf16.mxu1 %v11559_v22 }
 0x3da   :  { %v4351_v3 = vrot.slane %v12610_v18, %v12380_v37  ;;  %v4343_v5 = vrot.slane %v12610_v18, %v12369_v15 }
 0x3db   :  { %10442 = vmatpush3.bf16.msra.mxu0 %v11562_v25  ;;  %v11596_v25 = vld [vmem:[#allocation9 + $0x208] sm:$0xff]  }
 0x3dc   :  { %10359 = vmatpush3.bf16.msra.mxu1 %v11561_v24  ;;  %10443 = vmatprep.subr.bf16.mxu0 %v11564_v27  ;;  %v4357_v22 = vpack.c.bf16 %v4351_v3, %v4351_v3  ;;  %v11595_v24 = vld [vmem:[#allocation9 + $0x200] sm:$0xff]   ;;  %v11597_v27 = vld [vmem:[#allocation9 + $0x290] sm:$0xff]   ;;  %v4731_v3 = vld [vmem:[%s13063_s0 + $0x18] sm:$0x3f] }
 0x3dd   :  { %10360 = vmatprep.subr.bf16.mxu1 %v11563_v26  ;;  %v3454_v26 = vrot.slane %v12537_v47, %v12380_v37  ;;  %v11600_v47 = vld [vmem:[#allocation9 + $0x2a8] sm:$0xff]  }
 0x3df   :  { %10444 = vmatpush3.bf16.msra.mxu0 %v11566_v29  ;;  %v11598_v29 = vld [vmem:[#allocation9 + $0x298] sm:$0xff]  }
 0x3e0   :  { %10361 = vmatpush3.bf16.msra.mxu1 %v11565_v28  ;;  %10445 = vmatprep.subr.bf16.mxu0 %v11568_v31  ;;  %v3460_v28 = vpack.c.bf16 %v3454_v26, %v3454_v26  ;;  %v11601_v31 = vld [vmem:[#allocation9 + $0x2b0] sm:$0xff]  }
 0x3e1   :  { %10362 = vmatprep.subr.bf16.mxu1 %v11567_v30  ;;  %v11599_v30 = vld [vmem:[#allocation9 + $0x2a0] sm:$0xff]  }
 0x3e3   :  { %10446 = vmatpush3.bf16.msra.mxu0 %v11570_v33  ;;  %v3753_v33 = vrot.slane %v12553_v55, %v12380_v37  ;;  %v11606_v55 = vld [vmem:[#allocation9 + $0x358] sm:$0xff]  }
 0x3e4   :  { %10363 = vmatpush3.bf16.msra.mxu1 %v11569_v32  ;;  %10447 = vmatprep.subr.bf16.mxu0 %v11572_v36  ;;  %v11602_v32 = vld [vmem:[#allocation9 + $0x2b8] sm:$0xff]  }
 0x3e5   :  { %10364 = vmatprep.subr.bf16.mxu1 %v11571_v35  ;;  %v11603_v35 = vld [vmem:[#allocation9 + $0x340] sm:$0xff]   ;;  %v3759_v36 = vpack.c.bf16 %v3753_v33, %v3753_v33 }
 0x3e7   :  { %10448 = vmatpush3.bf16.msra.mxu0 %v11574_v40  ;;  %v11605_v40 = vld [vmem:[#allocation9 + $0x350] sm:$0xff]  }
 0x3e8   :  { %10365 = vmatpush3.bf16.msra.mxu1 %v11573_v39  ;;  %10449 = vmatprep.subr.bf16.mxu0 %v11575_v42  ;;  %v11604_v39 = vld [vmem:[#allocation9 + $0x348] sm:$0xff]  }
 0x3e9   :  { %10769 = vmatprep.subr.bf16.mxu1 %v12243_v20  ;;  %v11608_v42 = vld [vmem:[#allocation9 + $0x368] sm:$0xff]  }
 0x3eb   :  { %3376 = vmatmul.mubr.bf16.vlgmr.msra.gmra.mrb[40].mxu1 %v2863_v45  ;;  %10450 = vmatpush3.bf16.msra.mxu0 %v11577_v46  ;;  %v11609_v45 = vld [vmem:[#allocation9 + $0x3b0] sm:$0xff]   ;;  %v4347_v46 = vrot.slane %v12610_v18, %v12372_v16 }
 0x3ec   :  { %10770 = vmatpush3.bf16.msra.mxu1 %v11576_v43  ;;  %10781 = vmatprep.mubr.msk.bf16.mxu1 %vm12244_vm9, %v12243_v20  ;;  %v4052_v43 = vrot.slane %v12579_v19, %v12380_v37  ;;  %v11615_v19 = vld [vmem:[#allocation9 + $0x3c8] sm:$0xff]   ;;  %v11631_v18 = vld [vmem:[#allocation4] ss:$16 sps:$4 sm:$0xff]  }
 0x3ed   :  { %10771 = vmatprep.subr.bf16.mxu1 %v12243_v20  ;;  %10451 = vmatprep.subr.bf16.mxu0 %v11578_v63  ;;  %v11610_v63 = vld [vmem:[#allocation9 + $0x370] sm:$0xff]   ;;  %v4356_v49 = vpack.c.bf16 %v4347_v46, %v4347_v46 }
 0x3ef   :  { %10452 = vmatpush3.bf16.msra.mxu0 %v11580_v48  ;;  %v11611_v48 = vld [vmem:[#allocation9 + $0x3b8] sm:$0xff]  }
 0x3f0   :  { %10772 = vmatpush3.bf16.msra.mxu1 %v11579_v62  ;;  %10833 = vmatprep.subr.bf16.mxu0 %v12243_v20  ;;  %v4058_v62 = vpack.c.bf16 %v4052_v43, %v4052_v43 }
 0x3f1   :  { %10773 = vmatprep.subr.bf16.mxu1 %v12243_v20 }
 0x3f2   :  { %4272 = vmatmul.mubr.bf16.vlgmr.msra.gmra.mrb[16].mxu0 %v4056_v52  ;;  %v11616_v52 = vld [vmem:[#allocation9 + $0x388] sm:$0xff]  }
 0x3f3   :  { %10834 = vmatpush3.bf16.msra.mxu0 %v11582_v51  ;;  %10845 = vmatprep.mubr.msk.bf16.mxu0 %vm12244_vm9, %v12243_v20  ;;  %v11614_v51 = vld [vmem:[#allocation9 + $0x380] sm:$0xff]  }
 0x3f4   :  { %10774 = vmatpush3.bf16.msra.mxu1 %v11581_v34  ;;  %10835 = vmatprep.subr.bf16.mxu0 %v12243_v20  ;;  %v11613_v34 = vld [vmem:[#allocation9 + $0x3c0] sm:$0xff]  }
 0x3f5   :  { %10775 = vmatprep.subr.bf16.mxu1 %v12243_v20 }
 0x3f7   :  { %10836 = vmatpush3.bf16.msra.mxu0 %v11584_v56  ;;  %v11620_v56 = vld [vmem:[#allocation9 + $0x398] sm:$0xff]  }
 0x3f8   :  { %10776 = vmatpush3.bf16.msra.mxu1 %v11583_v54  ;;  %10837 = vmatprep.subr.bf16.mxu0 %v12243_v20  ;;  %v11619_v54 = vld [vmem:[#allocation9 + $0x3d8] sm:$0xff]  }
 0x3f9   :  { %10777 = vmatprep.subr.bf16.mxu1 %v12243_v20 }
 0x3fb   :  { %10838 = vmatpush3.bf16.msra.mxu0 %v11586_v7  ;;  %v11624_v7 = vld [vmem:[#allocation9 + $0x3a8] sm:$0xff]  }
 0x3fc   :  { %10778 = vmatpush3.bf16.msra.mxu1 %v11585_v59  ;;  %10839 = vmatprep.subr.bf16.mxu0 %v12243_v20  ;;  %v11623_v59 = vld [vmem:[#allocation9 + $0x3e8] sm:$0xff]  }
 0x3fd   :  { %10779 = vmatprep.subr.bf16.mxu1 %v12243_v20 }
 0x3ff   :  { %10840 = vmatpush3.bf16.msra.mxu0 %v11588_v9  ;;  %v4355_v9 = vpack.c.bf16 %v4343_v5, %v4343_v5 }
 0x400   :  { %10780 = vmatpush3.bf16.msra.mxu1 %v11587_v2  ;;  %10841 = vmatprep.subr.bf16.mxu0 %v12243_v20  ;;  %v11625_v2 = vld [vmem:[#allocation4 + $0x20] ss:$16 sps:$4 sm:$0xff]  }
 0x401   :  { %10785 = vmatprep.subr.bf16.mxu1 %v12243_v20 }
 0x403   :  { %10782 = vmatmul.mubr.msk.bf16.vlgmr.msra.gmra.mrb[44].mxu1 %vm2835_vm8, %v2865_v17  ;;  %10842 = vmatpush3.bf16.msra.mxu0 %v11590_v6  ;;  %v11628_v17 = vld [vmem:[#allocation4 + $0x28] ss:$16 sps:$4 sm:$0xff]   ;;  %v11633_v6 = vld [vmem:[#allocation4 + $0x4] ss:$16 sps:$4 sm:$0xff]  }
 0x404   :  { %10786 = vmatpush3.bf16.msra.mxu1 %v11589_v14  ;;  %10797 = vmatprep.mubr.msk.bf16.mxu1 %vm12244_vm9, %v12243_v20  ;;  %v4739_v14 = vpack.c.bf16 %v4738_v13, %v4737_v12  ;;  %v11650_v13 = vld [vmem:[%s13070_s7 + $0x38] sm:$0xff]  }
 0x405   :  { %10787 = vmatprep.subr.bf16.mxu1 %v12243_v20  ;;  %10843 = vmatprep.subr.bf16.mxu0 %v12243_v20 }
 0x407   :  { %10844 = vmatpush3.bf16.msra.mxu0 %v11592_v1  ;;  %v4730_v1 = vld [vmem:[%s13063_s0 + $0x10] sm:$0xff] }
 0x408   :  { %10788 = vmatpush3.bf16.msra.mxu1 %v11591_v44  ;;  %10849 = vmatprep.subr.bf16.mxu0 %v12243_v20  ;;  %v11636_v44 = vld [vmem:[#allocation4 + $0xc] ss:$16 sps:$4 sm:$0xff]  }
 0x409   :  { %10789 = vmatprep.subr.bf16.mxu1 %v12243_v20 }
 0x40a   :  { %10846 = vmatmul.mubr.msk.bf16.vlgmr.msra.gmra.mrb[20].mxu0 %vm2835_vm8, %v4357_v22  ;;  %v11634_v22 = vld [vmem:[#allocation4 + $0x8] ss:$16 sps:$4 sm:$0xff]  }
 0x40b   :  { %10865 = vmatprep.mubr.msk.bf16.mxu0 %vm12244_vm9, %v12243_v20 }
 0x40c   :  { %10790 = vmatpush3.bf16.msra.mxu1 %v11593_v21  ;;  %v4732_v21 = vpack.c.bf16 %v4731_v3, %v4730_v1 }
 0x40d   :  { %10791 = vmatprep.subr.bf16.mxu1 %v12243_v20 }
 0x410   :  { %10792 = vmatpush3.bf16.msra.mxu1 %v11594_v23  ;;  %v11639_v23 = vld [vmem:[#allocation4 + $0x44] ss:$16 sps:$4 sm:$0xff]  }
 0x411   :  { %10793 = vmatprep.subr.bf16.mxu1 %v12243_v20 }
 0x414   :  { %10794 = vmatpush3.bf16.msra.mxu1 %v11595_v24 }
 0x415   :  { %10795 = vmatprep.subr.bf16.mxu1 %v12243_v20 }
 0x418   :  { %10796 = vmatpush3.bf16.msra.mxu1 %v11596_v25 }
 0x419   :  { %10801 = vmatprep.subr.bf16.mxu1 %v12243_v20 }
 0x41b   :  { %10798 = vmatmul.mubr.msk.bf16.vlgmr.msra.gmra.mrb[48].mxu1 %vm2835_vm8, %v3460_v28 }
 0x41c   :  { %10802 = vmatpush3.bf16.msra.mxu1 %v11597_v27  ;;  %10813 = vmatprep.mubr.msk.bf16.mxu1 %vm12244_vm9, %v12243_v20 }
 0x41d   :  { %10803 = vmatprep.subr.bf16.mxu1 %v12243_v20 }
 0x420   :  { %10804 = vmatpush3.bf16.msra.mxu1 %v11598_v29 }
 0x421   :  { %10805 = vmatprep.subr.bf16.mxu1 %v12243_v20 }
 0x424   :  { %10806 = vmatpush3.bf16.msra.mxu1 %v11599_v30 }
 0x425   :  { %10807 = vmatprep.subr.bf16.mxu1 %v12243_v20 }
 0x428   :  { %10808 = vmatpush3.bf16.msra.mxu1 %v11600_v47 }
 0x429   :  { %10809 = vmatprep.subr.bf16.mxu1 %v12243_v20 }
 0x42c   :  { %10810 = vmatpush3.bf16.msra.mxu1 %v11601_v31  ;;  %v11637_v31 = vld [vmem:[#allocation4 + $0x40] ss:$16 sps:$4 sm:$0xff]  }
 0x42d   :  { %10811 = vmatprep.subr.bf16.mxu1 %v12243_v20 }
 0x430   :  { %10812 = vmatpush3.bf16.msra.mxu1 %v11602_v32 }
 0x431   :  { %10817 = vmatprep.subr.bf16.mxu1 %v12243_v20 }
 0x433   :  { %10814 = vmatmul.mubr.msk.bf16.vlgmr.msra.gmra.mrb[52].mxu1 %vm2835_vm8, %v3759_v36  ;;  %v4962_v36 = vld [vmem:[%s13063_s0 + $0x12] sm:$0xff] }
 0x434   :  { %10818 = vmatpush3.bf16.msra.mxu1 %v11603_v35  ;;  %10829 = vmatprep.mubr.msk.bf16.mxu1 %vm12244_vm9, %v12243_v20  ;;  %v11642_v35 = vld [vmem:[#allocation4 + $0x4c] ss:$16 sps:$4 sm:$0xff]  }
 0x435   :  { %10819 = vmatprep.subr.bf16.mxu1 %v12243_v20 }
 0x438   :  { %10820 = vmatpush3.bf16.msra.mxu1 %v11604_v39  ;;  %v4963_v39 = vld [vmem:[%s13063_s0 + $0x1a] sm:$0x3f] }
 0x439   :  { %10821 = vmatprep.subr.bf16.mxu1 %v12243_v20 }
 0x43c   :  { %10822 = vmatpush3.bf16.msra.mxu1 %v11605_v40  ;;  %v4964_v40 = vpack.c.bf16 %v4963_v39, %v4962_v36 }
 0x43d   :  { %10823 = vmatprep.subr.bf16.mxu1 %v12243_v20 }
 0x440   :  { %10824 = vmatpush3.bf16.msra.mxu1 %v11606_v55  ;;  %v11640_v55 = vld [vmem:[#allocation4 + $0x48] ss:$16 sps:$4 sm:$0xff]  }
 0x441   :  { %10825 = vmatprep.subr.bf16.mxu1 %v12243_v20 }
 0x444   :  { %10826 = vmatpush3.bf16.msra.mxu1 %v11607_v41 }
 0x445   :  { %10827 = vmatprep.subr.bf16.mxu1 %v12243_v20 }
 0x448   :  { %10828 = vmatpush3.bf16.msra.mxu1 %v11608_v42 }
 0x449   :  { %10466 = vmatprep.subr.bf16.mxu1 %v11609_v45 }
 0x44b   :  { %10830 = vmatmul.mubr.msk.bf16.vlgmr.msra.gmra.mrb[56].mxu1 %vm2835_vm8, %v4058_v62  ;;  %v11644_v62 = vld [vmem:[%s13070_s7 + $0x8] sm:$0xff]  }
 0x44c   :  { %10467 = vmatpush3.bf16.msra.mxu1 %v11610_v63  ;;  %4570 = vmatprep.mubr.bf16.mxu1 %v4356_v49  ;;  %v11643_v63 = vld [vmem:[%s13070_s7] sm:$0xff]   ;;  %v11645_v49 = vld [vmem:[%s13070_s7 + $0x10] sm:$0xff]  }
 0x44d   :  { %10468 = vmatprep.subr.bf16.mxu1 %v11611_v48  ;;  %10850 = vmatpush3.bf16.msra.mxu0 %v11643_v63  ;;  %v11705_v63 = vld [vmem:[#allocation7 + $0x350] ss:$12 sps:$4 sm:$0xff]  }
 0x44e   :  { %10851 = vmatprep.subr.bf16.mxu0 %v12243_v20 }
 0x450   :  { %10469 = vmatpush3.bf16.msra.mxu1 %v11612_v50 }
 0x451   :  { %10470 = vmatprep.subr.bf16.mxu1 %v11613_v34  ;;  %10852 = vmatpush3.bf16.msra.mxu0 %v11644_v62 }
 0x452   :  { %10853 = vmatprep.subr.bf16.mxu0 %v12243_v20 }
 0x454   :  { %10471 = vmatpush3.bf16.msra.mxu1 %v11614_v51 }
 0x455   :  { %10472 = vmatprep.subr.bf16.mxu1 %v11615_v19  ;;  %10854 = vmatpush3.bf16.msra.mxu0 %v11645_v49 }
 0x456   :  { %10855 = vmatprep.subr.bf16.mxu0 %v12243_v20 }
 0x458   :  { %10473 = vmatpush3.bf16.msra.mxu1 %v11616_v52  ;;  %v11646_v52 = vld [vmem:[%s13070_s7 + $0x18] sm:$0xff]  }
 0x459   :  { %10474 = vmatprep.subr.bf16.mxu1 %v11617_v8  ;;  %10856 = vmatpush3.bf16.msra.mxu0 %v11646_v52  ;;  %v11647_v8 = vld [vmem:[%s13070_s7 + $0x20] sm:$0xff]  }
 0x45a   :  { %10857 = vmatprep.subr.bf16.mxu0 %v12243_v20 }
 0x45c   :  { %10475 = vmatpush3.bf16.msra.mxu1 %v11618_v53 }
 0x45d   :  { %10476 = vmatprep.subr.bf16.mxu1 %v11619_v54  ;;  %10858 = vmatpush3.bf16.msra.mxu0 %v11647_v8 }
 0x45e   :  { %10859 = vmatprep.subr.bf16.mxu0 %v12243_v20 }
 0x460   :  { %10477 = vmatpush3.bf16.msra.mxu1 %v11620_v56 }
 0x461   :  { %10478 = vmatprep.subr.bf16.mxu1 %v11621_v57 }
 0x464   :  { %10479 = vmatpush3.bf16.msra.mxu1 %v11622_v58 }
 0x465   :  { %10480 = vmatprep.subr.bf16.mxu1 %v11623_v59 }
 0x468   :  { %10481 = vmatpush3.bf16.msra.mxu1 %v11624_v7  ;;  %v11648_v7 = vld [vmem:[%s13070_s7 + $0x28] sm:$0xff]  }
 0x469   :  { %4767 = vmatprep.subr.bf16.mxu1 %v11627_v61  ;;  %10860 = vmatpush3.bf16.msra.mxu0 %v11648_v7 }
 0x46a   :  { %10861 = vmatprep.subr.bf16.mxu0 %v12243_v20 }
 0x46b   :  { %4571 = vmatmul.mubr.bf16.vlgmr.msra.gmra.mrb[60].mxu1 %v4355_v9 }
 0x46c   :  { %4768 = vmatpush1.bf16.msra.mxu1 %v11625_v2  ;;  %4799 = vmatprep.mubr.bf16.mxu1 %v12241_v0  ;;  %v11649_v2 = vld [vmem:[%s13070_s7 + $0x30] sm:$0xff]  }
 0x46d   :  { %4810 = vmatprep.subr.bf16.mxu1 %v11630_v10  ;;  %10862 = vmatpush3.bf16.msra.mxu0 %v11649_v2 }
 0x46e   :  { %10863 = vmatprep.subr.bf16.mxu0 %v12243_v20 }
 0x471   :  { %10864 = vmatpush3.bf16.msra.mxu0 %v11650_v13 }
 0x473   :  { %9813 = vmatmul.mubr.msk.bf16.vlgmr.msra.gmra.mrb[64].mxu1 %vm110_vm0, %v4739_v14 }
 0x474   :  { %4811 = vmatpush1.bf16.msra.mxu1 %v11628_v17  ;;  %4842 = vmatprep.mubr.bf16.mxu1 %v12241_v0 }
 0x475   :  { %4876 = vmatprep.subr.bf16.mxu1 %v11633_v6 }
 0x47b   :  { %9814 = vmatmul.mubr.msk.bf16.vlgmr.msra.gmra.mrb[68].mxu1 %vm110_vm0, %v4739_v14  ;;  %v11653_v14 = vld [vmem:[#allocation7 + $0x2a4] ss:$12 sps:$4 sm:$0xff]  }
 0x47c   :  { %4877 = vmatpush1.bf16.msra.mxu1 %v11631_v18  ;;  %4908 = vmatprep.mubr.bf16.mxu1 %v12241_v0 }
 0x47d   :  { %4919 = vmatprep.subr.bf16.mxu1 %v11636_v44  ;;  %5880 = vmatprep.subr.bf16.mxu0 %v11653_v14  ;;  %v11651_v14 = vld [vmem:[#allocation7 + $0x2a0] ss:$12 sps:$4 sm:$0xff]  }
 0x483   :  { %9819 = vmatmul.mubr.msk.bf16.vlgmr.msra.gmra.mrb[64].mxu1 %vm110_vm0, %v4732_v21 }
 0x484   :  { %4920 = vmatpush1.bf16.msra.mxu1 %v11634_v22  ;;  %4951 = vmatprep.mubr.bf16.mxu1 %v12241_v0 }
 0x485   :  { %4992 = vmatprep.subr.bf16.mxu1 %v11639_v23  ;;  %v10395_v25 = vpop.f32.mrb[8].mxu0  ;;  %v11669_v23 = vld [vmem:[#allocation7 + $0x368] ss:$12 sps:$4 sm:$0xff]  }
 0x486   :  { %v10337_v24 = vpop.f32.mrb[32].mxu1  ;;  %v10396_v27 = vpop.f32.mrb[9].mxu0 }
 0x487   :  { %v10338_v26 = vpop.f32.mrb[33].mxu1  ;;  %v12676_v29 = vadd.f32 %v10396_v27, %v10395_v25  ;;  %v10398_v47 = vpop.f32.mrb[10].mxu0  ;;  %v11675_v27 = vld [vmem:[#allocation7 + $0x2c0] ss:$12 sps:$4 sm:$0xff]  }
 0x488   :  { %v10339_v28 = vadd.f32 %v10338_v26, %v10337_v24  ;;  %v10340_v30 = vpop.f32.mrb[34].mxu1  ;;  %v10399_v33 = vpop.f32.mrb[11].mxu0  ;;  %v11670_v24 = vld [vmem:[#allocation7 + $0x2a8] ss:$12 sps:$4 sm:$0xff]   ;;  %v11674_v26 = vld [vmem:[#allocation7 + $0x380] ss:$12 sps:$4 sm:$0xff]  }
 0x489   :  { %v10341_v32 = vpop.f32.mrb[35].mxu1  ;;  %v11680_v30 = vld [vmem:[#allocation7 + $0x2d8] ss:$12 sps:$4 sm:$0xff]  }
 0x48b   :  { %9820 = vmatmul.mubr.msk.bf16.vlgmr.msra.gmra.mrb[68].mxu1 %vm110_vm0, %v4732_v21 }
 0x48c   :  { %4993 = vmatpush1.bf16.msra.mxu1 %v11637_v31  ;;  %5024 = vmatprep.mubr.bf16.mxu1 %v12241_v0 }
 0x48d   :  { %5035 = vmatprep.subr.bf16.mxu1 %v11642_v35  ;;  %v11684_v35 = vld [vmem:[#allocation7 + $0x3b0] ss:$12 sps:$4 sm:$0xff]  }
 0x493   :  { %9825 = vmatmul.mubr.msk.bf16.vlgmr.msra.gmra.mrb[64].mxu1 %vm110_vm0, %v4964_v40 }
 0x494   :  { %5036 = vmatpush1.bf16.msra.mxu1 %v11640_v55  ;;  %5067 = vmatprep.mubr.bf16.mxu1 %v12241_v0  ;;  %v11689_v55 = vld [vmem:[#allocation7 + $0x3c8] ss:$12 sps:$4 sm:$0xff]  }
 0x495   :  { %10504 = vmatprep.subr.bf16.mxu1 %v11669_v23  ;;  %v11668_v23 = vld [vmem:[#allocation7 + $0x31c] ss:$12 sps:$4 sm:$0xff]  }
 0x49b   :  { %9826 = vmatmul.mubr.msk.bf16.vlgmr.msra.gmra.mrb[68].mxu1 %vm110_vm0, %v4964_v40  ;;  %v11685_v40 = vld [vmem:[#allocation7 + $0x2f0] ss:$12 sps:$4 sm:$0xff]  }
 0x49c   :  { %10505 = vmatpush3.bf16.msra.mxu1 %v11670_v24  ;;  %v11666_v24 = vld [vmem:[#allocation7 + $0x318] ss:$12 sps:$4 sm:$0xff]  }
 0x49d   :  { %10506 = vmatprep.subr.bf16.mxu1 %v11674_v26  ;;  %v5086_v26 = vld [vmem:[%s13065_s2] sm:$0xf] }
 0x49e   :  { %v3202_v41 = vpop.f32.mrb[36].mxu1 }
 0x49f   :  { %v3203_v42 = vadd.f32 %v10339_v28, %v3202_v41  ;;  %v10767_v43 = vpop.f32.mrb[37].mxu1  ;;  %v11679_v28 = vld [vmem:[#allocation7 + $0x398] ss:$12 sps:$4 sm:$0xff]   ;;  %v11690_v41 = vld [vmem:[#allocation7 + $0x308] ss:$12 sps:$4 sm:$0xff]  }
 0x4a0   :  { %v3205_v45 = vpop.f32.mrb[38].mxu1  ;;  %10507 = vmatpush3.bf16.msra.mxu1 %v11675_v27  ;;  %v11695_v43 = vld [vmem:[#allocation7 + $0x320] ss:$12 sps:$4 sm:$0xff]   ;;  %v11671_v27 = vld [vmem:[#allocation7 + $0x330] ss:$12 sps:$4 sm:$0xff]  }
 0x4a1   :  { %v10768_v46 = vpop.f32.mrb[39].mxu1  ;;  %10508 = vmatprep.subr.bf16.mxu1 %v11679_v28  ;;  %v11699_v45 = vld [vmem:[#allocation7 + $0x3f8] ss:$12 sps:$4 sm:$0xff]  }
 0x4a2   :  { %v11700_v46 = vld [vmem:[#allocation7 + $0x338] ss:$12 sps:$4 sm:$0xff]  }
 0x4a3   :  { %v11678_v28 = vld [vmem:[#allocation7 + $0x34c] ss:$12 sps:$4 sm:$0xff]  }
 0x4a4   :  { %10509 = vmatpush3.bf16.msra.mxu1 %v11680_v30  ;;  %v5091_v30 = vrot.slane %v5086_v26, %v12369_v15 }
 0x4a5   :  { %v10424_v48 = vpop.f32.mrb[12].mxu0  ;;  %10510 = vmatprep.subr.bf16.mxu1 %v11684_v35 }
 0x4a6   :  { %v10425_v50 = vpop.f32.mrb[13].mxu0 }
 0x4a7   :  { %v12700_v34 = vadd.f32 %v10425_v50, %v10424_v48  ;;  %v10427_v51 = vpop.f32.mrb[14].mxu0 }
 0x4a8   :  { %v10428_v19 = vpop.f32.mrb[15].mxu0  ;;  %10511 = vmatpush3.bf16.msra.mxu1 %v11685_v40 }
 0x4a9   :  { %10512 = vmatprep.subr.bf16.mxu1 %v11689_v55 }
 0x4ac   :  { %10513 = vmatpush3.bf16.msra.mxu1 %v11690_v41 }
 0x4be   :  { %v10366_v53 = vpop.f32.mrb[40].mxu1 }
 0x4bf   :  { %v10367_v54 = vpop.f32.mrb[41].mxu1 }
 0x4c0   :  { %v10368_v56 = vadd.f32 %v10367_v54, %v10366_v53  ;;  %v10369_v57 = vpop.f32.mrb[42].mxu1 }
 0x4c1   :  { %v10370_v58 = vpop.f32.mrb[43].mxu1 }
 0x4c2   :  { %v3378_v59 = vadd.f32 %v10368_v56, %v3203_v42  ;;  %v11694_v42 = vld [vmem:[#allocation7 + $0x3e0] ss:$12 sps:$4 sm:$0xff]  }
 0x4c3   :  { %10514 = vmatprep.subr.bf16.mxu1 %v11694_v42 }
 0x4c4   :  { %10515 = vmatpush3.bf16.msra.mxu1 %v11695_v43  ;;  %v11681_v43 = vld [vmem:[#allocation7 + $0x360] ss:$12 sps:$4 sm:$0xff]  }
 0x4c5   :  { %v10453_v5 = vpop.f32.mrb[16].mxu0  ;;  %10516 = vmatprep.subr.bf16.mxu1 %v11699_v45 }
 0x4c6   :  { %v10454_v61 = vpop.f32.mrb[17].mxu0 }
 0x4c7   :  { %v12718_v9 = vadd.f32 %v10454_v61, %v10453_v5  ;;  %v10456_v10 = vpop.f32.mrb[18].mxu0 }
 0x4c8   :  { %v10457_v12 = vpop.f32.mrb[19].mxu0  ;;  %10517 = vmatpush3.bf16.msra.mxu1 %v11700_v46 }
 0x4d6   :  { %v3417_v17 = vpop.f32.mrb[44].mxu1 }
 0x4d7   :  { %v3418_v6 = vadd.f32 %v3417_v17, %v3378_v59  ;;  %v10783_v18 = vpop.f32.mrb[45].mxu1 }
 0x4d8   :  { %v3420_v44 = vpop.f32.mrb[46].mxu1  ;;  %v11659_v18 = vld [vmem:[#allocation7 + $0x2d4] ss:$12 sps:$4 sm:$0xff]  }
 0x4d9   :  { %v10784_v1 = vpop.f32.mrb[47].mxu1  ;;  %v11657_v44 = vld [vmem:[#allocation7 + $0x2d0] ss:$12 sps:$4 sm:$0xff]  }
 0x4da   :  { %v11662_v1 = vld [vmem:[#allocation7 + $0x2ec] ss:$12 sps:$4 sm:$0xff]  }
 0x4dd   :  { %v4612_v3 = vpop.f32.mrb[20].mxu0 }
 0x4de   :  { %v10847_v21 = vpop.f32.mrb[21].mxu0 }
 0x4df   :  { %v4615_v22 = vpop.f32.mrb[22].mxu0  ;;  %v11665_v21 = vld [vmem:[#allocation7 + $0x304] ss:$12 sps:$4 sm:$0xff]  }
 0x4e0   :  { %v10848_v25 = vpop.f32.mrb[23].mxu0  ;;  %v11663_v22 = vld [vmem:[#allocation7 + $0x300] ss:$12 sps:$4 sm:$0xff]  }
 0x4e1   :  { %v11673_v25 = vld [vmem:[#allocation7 + $0x334] ss:$12 sps:$4 sm:$0xff]  }
 0x4ee   :  { %v3715_v47 = vpop.f32.mrb[48].mxu1 }
 0x4ef   :  { %v3716_v31 = vadd.f32 %v12676_v29, %v3715_v47  ;;  %v10799_v32 = vpop.f32.mrb[49].mxu1  ;;  %v11704_v29 = vld [vmem:[#allocation7 + $0x410] ss:$12 sps:$4 sm:$0xff]   ;;  %v5095_v47 = vrot.slane %v5086_v26, %v12372_v16 }
 0x4f0   :  { %v3718_v33 = vpop.f32.mrb[50].mxu1  ;;  %10518 = vmatprep.subr.bf16.mxu1 %v11704_v29  ;;  %v11688_v29 = vld [vmem:[#allocation7 + $0x37c] ss:$12 sps:$4 sm:$0xff]  }
 0x4f1   :  { %v3721_v36 = vadd.f32 %v3716_v31, %v3418_v6  ;;  %v10800_v39 = vpop.f32.mrb[51].mxu1  ;;  %10519 = vmatpush3.bf16.msra.mxu1 %v11705_v63  ;;  %v11654_v6 = vld [vmem:[#allocation7 + $0x2b8] ss:$12 sps:$4 sm:$0xff]   ;;  %v11676_v31 = vld [vmem:[#allocation7 + $0x348] ss:$12 sps:$4 sm:$0xff]  }
 0x4f2   :  { %6007 = vmatprep.subr.bf16.mxu1 %v12241_v0  ;;  %v11683_v33 = vld [vmem:[#allocation7 + $0x364] ss:$12 sps:$4 sm:$0xff]  }
 0x506   :  { %v4014_v62 = vpop.f32.mrb[52].mxu1 }
 0x507   :  { %v4015_v48 = vadd.f32 %v12700_v34, %v4014_v62  ;;  %v10815_v49 = vpop.f32.mrb[53].mxu1  ;;  %v4619_v34 = vld [vmem:[%s13069_s6] sm:$0x1]  ;;  %v5099_v62 = vrot.slane %v5086_v26, %v12380_v37 }
 0x508   :  { %v4017_v50 = vpop.f32.mrb[54].mxu1 }
 0x509   :  { %v4020_v51 = vadd.f32 %v4015_v48, %v3721_v36  ;;  %v10816_v19 = vpop.f32.mrb[55].mxu1  ;;  %v5103_v50 = vrot.slane %v5086_v26, %v450_v38  ;;  %v11709_v26 = vld [vmem:[#allocation7 + $0x428] ss:$12 sps:$4 sm:$0xff]  }
 0x51e   :  { %v4313_v52 = vpop.f32.mrb[56].mxu1 }
 0x51f   :  { %v4314_v8 = vadd.f32 %v12718_v9, %v4313_v52  ;;  %v10831_v53 = vpop.f32.mrb[57].mxu1  ;;  %v11656_v9 = vld [vmem:[#allocation7 + $0x2bc] ss:$12 sps:$4 sm:$0xff]  }
 0x520   :  { %v4316_v54 = vpop.f32.mrb[58].mxu1 }
 0x521   :  { %v4319_v56 = vadd.f32 %v4314_v8, %v4020_v51  ;;  %v10832_v57 = vpop.f32.mrb[59].mxu1  ;;  %v11686_v51 = vld [vmem:[#allocation7 + $0x378] ss:$12 sps:$4 sm:$0xff]   ;;  %v11693_v8 = vld [vmem:[#allocation7 + $0x394] ss:$12 sps:$4 sm:$0xff]  }
 0x53e   :  { %v10482_v58 = vpop.f32.mrb[60].mxu1 }
 0x53f   :  { %v10483_v59 = vpop.f32.mrb[61].mxu1 }
 0x540   :  { %v10484_v7 = vadd.f32 %v10483_v59, %v10482_v58  ;;  %v10485_v5 = vpop.f32.mrb[62].mxu1 }
 0x541   :  { %v10486_v61 = vpop.f32.mrb[63].mxu1  ;;  %v11691_v5 = vld [vmem:[#allocation7 + $0x390] ss:$12 sps:$4 sm:$0xff]  }
 0x542   :  { %v4613_v2 = vadd.f32 %v10484_v7, %v4612_v3  ;;  %v11660_v3 = vld [vmem:[#allocation7 + $0x2e8] ss:$12 sps:$4 sm:$0xff]   ;;  %v11698_v61 = vld [vmem:[#allocation7 + $0x3ac] ss:$12 sps:$4 sm:$0xff]  }
 0x544   :  { %v4618_v10 = vadd.f32 %v4613_v2, %v4319_v56 }
 0x546   :  { %v4620_v12 = vadd.f32 %v4619_v34, %v4618_v10 }
 0x548   :  { %v4621_v13 = vmax.f32 %v4620_v12, 0.0  ;;  %v11696_v12 = vld [vmem:[#allocation7 + $0x3a8] ss:$12 sps:$4 sm:$0xff]  }
 0x54a   :  { %v4622_v17 = vpack.c.bf16 %v4621_v13, %v4621_v13 }
 0x54c   :  { %10866 = vmatmul.mubr.bf16.vlgmr.msra.gmra.mrb[24].mxu0 %v4622_v17 }
 0x54d   :  { %5881 = vmatpush1.bf16.msra.mxu0 %v11651_v14  ;;  %v11703_v14 = vld [vmem:[#allocation7 + $0x3c4] ss:$12 sps:$4 sm:$0xff]  }
 0x54e   :  { %5882 = vmatprep.subr.bf16.mxu0 %v11656_v9 }
 0x551   :  { %5883 = vmatpush1.bf16.msra.mxu0 %v11654_v6 }
 0x552   :  { %5884 = vmatprep.subr.bf16.mxu0 %v11659_v18  ;;  %v11701_v18 = vld [vmem:[#allocation7 + $0x3c0] ss:$12 sps:$4 sm:$0xff]  }
 0x555   :  { %5885 = vmatpush1.bf16.msra.mxu0 %v11657_v44  ;;  %v11708_v44 = vld [vmem:[#allocation7 + $0x3dc] ss:$12 sps:$4 sm:$0xff]  }
 0x556   :  { %5886 = vmatprep.subr.bf16.mxu0 %v11662_v1 }
 0x559   :  { %5887 = vmatpush1.bf16.msra.mxu0 %v11660_v3 }
 0x55a   :  { %5888 = vmatprep.subr.bf16.mxu0 %v11665_v21 }
 0x55d   :  { %5889 = vmatpush1.bf16.msra.mxu0 %v11663_v22 }
 0x55e   :  { %5890 = vmatprep.subr.bf16.mxu0 %v11668_v23 }
 0x561   :  { %5891 = vmatpush1.bf16.msra.mxu0 %v11666_v24  ;;  %v11706_v24 = vld [vmem:[#allocation7 + $0x3d8] ss:$12 sps:$4 sm:$0xff]  }
 0x562   :  { %5892 = vmatprep.subr.bf16.mxu0 %v11673_v25 }
 0x565   :  { %5893 = vmatpush1.bf16.msra.mxu0 %v11671_v27  ;;  %v11712_v27 = vld [vmem:[#allocation7 + $0x3f4] ss:$12 sps:$4 sm:$0xff]  }
 0x566   :  { %v5026_v32 = vpop.f32.mrb[64].mxu1  ;;  %5894 = vmatprep.subr.bf16.mxu0 %v11678_v28 }
 0x567   :  { %v5108_v35 = vadd.f32 %v5091_v30, %v5026_v32  ;;  %v5028_v36 = vpop.f32.mrb[65].mxu1  ;;  %v11713_v32 = vld [vmem:[#allocation7 + $0x440] ss:$12 sps:$4 sm:$0xff]  }
 0x568   :  { %v5109_v39 = vadd.f32 %v5095_v47, %v5028_v36  ;;  %v5030_v40 = vpop.f32.mrb[66].mxu1 }
 0x569   :  { %v5116_v55 = vmax.f32 %v5108_v35, 0.0  ;;  %v5112_v41 = vadd.f32 %v5091_v30, %v5030_v40  ;;  %5895 = vmatpush1.bf16.msra.mxu0 %v11676_v31  ;;  %v5032_v42 = vpop.f32.mrb[67].mxu1  ;;  %v11710_v31 = vld [vmem:[#allocation7 + $0x3f0] ss:$12 sps:$4 sm:$0xff]   ;;  %v11714_v40 = vld [vmem:[#allocation7 + $0x408] ss:$12 sps:$4 sm:$0xff]  }
 0x56a   :  { %v5117_v45 = vmax.f32 %v5109_v39, 0.0  ;;  %v5113_v46 = vadd.f32 %v5095_v47, %v5032_v42  ;;  %5896 = vmatprep.subr.bf16.mxu0 %v11683_v33  ;;  %v11716_v33 = vld [vmem:[#allocation7 + $0x40c] ss:$12 sps:$4 sm:$0xff]   ;;  %v11721_v42 = vld [vmem:[#allocation7 + $0x424] ss:$12 sps:$4 sm:$0xff]  }
 0x56b   :  { %v5120_v63 = vmax.f32 %v5112_v41, 0.0  ;;  %v11718_v41 = vld [vmem:[#allocation7 + $0x458] ss:$12 sps:$4 sm:$0xff]  }
 0x56c   :  { %v12737_v48 = vpack.c.bf16 %v5117_v45, %v5116_v55  ;;  %v5121_v49 = vmax.f32 %v5113_v46, 0.0  ;;  %v11722_v45 = vld [vmem:[#allocation7 + $0x470] ss:$12 sps:$4 sm:$0xff]  }
 0x56d   :  { %5897 = vmatpush1.bf16.msra.mxu0 %v11681_v43  ;;  %v11719_v43 = vld [vmem:[#allocation7 + $0x420] ss:$12 sps:$4 sm:$0xff]   ;;  %v11725_v46 = vld [vmem:[#allocation7 + $0x43c] ss:$12 sps:$4 sm:$0xff]  }
 0x56e   :  { %5148 = vst [vmem:[#allocation2] sm:$0xff] %v12737_v48  ;;  %v10253_v19 = vpack.c.bf16 %v5121_v49, %v5120_v63  ;;  %v5069_v52 = vpop.f32.mrb[68].mxu1  ;;  %5898 = vmatprep.subr.bf16.mxu0 %v11688_v29  ;;  %v11723_v29 = vld [vmem:[#allocation7 + $0x438] ss:$12 sps:$4 sm:$0xff]   ;;  %v11726_v63 = vld [vmem:[#allocation7 + $0x488] ss:$12 sps:$4 sm:$0xff]  }
 0x56f   :  { %v5110_v53 = vadd.f32 %v5099_v62, %v5069_v52  ;;  %v5071_v54 = vpop.f32.mrb[69].mxu1  ;;  %v11727_v49 = vld [vmem:[#allocation7 + $0x450] ss:$12 sps:$4 sm:$0xff]   ;;  %v11734_v52 = vld [vmem:[#allocation7 + $0x4b8] ss:$12 sps:$4 sm:$0xff]  }
 0x570   :  { %5150 = vst [vmem:[#allocation2 + $0x10] sm:$0x77] %v10253_v19  ;;  %v5111_v56 = vadd.f32 %v5103_v50, %v5071_v54  ;;  %v5073_v57 = vpop.f32.mrb[70].mxu1  ;;  %v11731_v19 = vld [vmem:[#allocation7 + $0x468] ss:$12 sps:$4 sm:$0xff]  }
 0x571   :  { %v5118_v58 = vmax.f32 %v5110_v53, 0.0  ;;  %v5114_v59 = vadd.f32 %v5099_v62, %v5073_v57  ;;  %5899 = vmatpush1.bf16.msra.mxu0 %v11686_v51  ;;  %v5075_v7 = vpop.f32.mrb[71].mxu1  ;;  %v11729_v62 = vld [vmem:[#allocation7 + $0x454] ss:$12 sps:$4 sm:$0xff]   ;;  %v11733_v51 = vld [vmem:[#allocation7 + $0x46c] ss:$12 sps:$4 sm:$0xff]  }
 0x572   :  { %v5119_v11 = vmax.f32 %v5111_v56, 0.0  ;;  %v5115_v38 = vadd.f32 %v5103_v50, %v5075_v7  ;;  %5900 = vmatprep.subr.bf16.mxu0 %v11693_v8  ;;  %v11730_v50 = vld [vmem:[#allocation7 + $0x4a0] ss:$12 sps:$4 sm:$0xff]   ;;  %v11737_v8 = vld [vmem:[#allocation7 + $0x484] ss:$12 sps:$4 sm:$0xff]  }
 0x573   :  { %v5122_v2 = vmax.f32 %v5114_v59, 0.0  ;;  %v11735_v53 = vld [vmem:[#allocation7 + $0x480] ss:$12 sps:$4 sm:$0xff]   ;;  %v11738_v54 = vld [vmem:[#allocation7 + $0x4d0] ss:$12 sps:$4 sm:$0xff]  }
 0x574   :  { %v10252_v34 = vpack.c.bf16 %v5119_v11, %v5118_v58  ;;  %v5123_v10 = vmax.f32 %v5115_v38, 0.0  ;;  %v11741_v56 = vld [vmem:[#allocation7 + $0x49c] ss:$12 sps:$4 sm:$0xff]   ;;  %v11739_v57 = vld [vmem:[#allocation7 + $0x498] ss:$12 sps:$4 sm:$0xff]  }
 0x575   :  { %5901 = vmatpush1.bf16.msra.mxu0 %v11691_v5  ;;  %v11742_v58 = vld [vmem:[#allocation7 + $0x4e8] ss:$12 sps:$4 sm:$0xff]   ;;  %v11743_v7 = vld [vmem:[#allocation7 + $0x4b0] ss:$12 sps:$4 sm:$0xff]   ;;  %v11746_v5 = vld [vmem:[#allocation7 + $0x500] ss:$12 sps:$4 sm:$0xff]  }
 0x576   :  { %5149 = vst.msk [vmem:[#allocation2 + $0x8] sm:$0xff] %vm12390_vm5, %v10252_v34  ;;  %v10254_v13 = vpack.c.bf16 %v5123_v10, %v5122_v2  ;;  %5902 = vmatprep.subr.bf16.mxu0 %v11698_v61  ;;  %v11745_v59 = vld [vmem:[#allocation7 + $0x4b4] ss:$12 sps:$4 sm:$0xff]   ;;  %v11749_v11 = vld [vmem:[#allocation7 + $0x4cc] ss:$12 sps:$4 sm:$0xff]  }
 0x577   :  { %v12744_v17 = vld [vmem:[#allocation2 + $0x10] sm:$0x77]  ;;  %v11747_v61 = vld [vmem:[#allocation7 + $0x4c8] ss:$12 sps:$4 sm:$0xff]  }
 0x578   :  { %5151 = vst.msk [vmem:[#allocation2 + $0x18] sm:$0x77] %vm12396_vm6, %v10254_v13  ;;  %v9832_v9 = vcombine.high %v12737_v48, %v12744_v17  ;;  %v9831_v6 = vcombine.low %v12737_v48, %v12744_v17  ;;  %v11750_v2 = vld [vmem:[#allocation7 + $0x518] ss:$12 sps:$4 sm:$0xff]   ;;  %v11754_v13 = vld [vmem:[#allocation7 + $0x530] ss:$12 sps:$4 sm:$0xff]  }
 0x579   :  { %5903 = vmatpush1.bf16.msra.mxu0 %v11696_v12  ;;  %v11753_v34 = vld [vmem:[#allocation7 + $0x4e4] ss:$12 sps:$4 sm:$0xff]   ;;  %v11751_v12 = vld [vmem:[#allocation7 + $0x4e0] ss:$12 sps:$4 sm:$0xff]  }
 0x57a   :  { %5904 = vmatprep.subr.bf16.mxu0 %v11703_v14  ;;  %v5408_v60 = vshll.u32 %v9832_v9, 16  ;;  %v5401_v1 = vshll.u32 %v9831_v6, 16  ;;  %v5406_v3 = vshrl.u32 %v9832_v9, 16  ;;  %v5399_v22 = vshrl.u32 %v9831_v6, 16  ;;  %v11757_v14 = vld [vmem:[#allocation7 + $0x4fc] ss:$12 sps:$4 sm:$0xff]  }
 0x57b   :  { %v11759_v6 = vld [vmem:[#allocation7 + $0xc8] ss:$12 sps:$4 sm:$0xff]  }
 0x57c   :  { %v5410_v21 = vrot.slane %v5408_v60, 1  ;;  %v5403_v23 = vrot.slane %v5401_v1, 1  ;;  %v12773_v60 = vld [vmem:[#allocation2 + $0x10] sm:$0x33]  ;;  %v11760_v1 = vld [vmem:[#allocation7 + $0x8] ss:$12 sps:$4 sm:$0xff]  }
 0x57d   :  { %5905 = vmatpush1.bf16.msra.mxu0 %v11701_v18  ;;  %v12752_v28 = vld [vmem:[#allocation2 + $0x8] sm:$0xff] }
 0x57e   :  { %5906 = vmatprep.subr.bf16.mxu0 %v11708_v44  ;;  %v5411_v4 = vor.u32 %v5410_v21, %v5406_v3  ;;  %v5404_v25 = vor.u32 %v5403_v23, %v5399_v22  ;;  %v11755_v18 = vld [vmem:[#allocation7 + $0x4f8] ss:$12 sps:$4 sm:$0xff]   ;;  %v11763_v21 = vld [vmem:[#allocation7 + $0x514] ss:$12 sps:$4 sm:$0xff]   ;;  %v9922_v23 = vcombine.high %v12737_v48, %v12773_v60 }
 0x57f   :  { %v12754_v30 = vld [vmem:[#allocation2 + $0x18] sm:$0x77] }
 0x580   :  { %5912 = vmatprep.mubr.bf16.mxu0 %v5411_v4  ;;  %5998 = vmatprep.mubr.bf16.mxu1 %v5411_v4  ;;  %v9834_v47 = vcombine.high %v12752_v28, %v12754_v30  ;;  %v9833_v38 = vcombine.low %v12752_v28, %v12754_v30  ;;  %v11764_v22 = vld [vmem:[#allocation7 + $0xe0] ss:$12 sps:$4 sm:$0xff]  }
 0x581   :  { %5907 = vmatpush1.bf16.msra.mxu0 %v11706_v24  ;;  %5999 = vmatmul.mubr.bf16.vlgmr.msra.gmra.mrb[72].mxu1 %v5404_v25  ;;  %v11761_v24 = vld [vmem:[#allocation7 + $0x510] ss:$12 sps:$4 sm:$0xff]   ;;  %v11765_v4 = vld [vmem:[#allocation7 + $0x20] ss:$12 sps:$4 sm:$0xff]  }
 0x582   :  { %6008 = vmatpush1.bf16.msra.mxu1 %v11709_v26  ;;  %5908 = vmatprep.subr.bf16.mxu0 %v11712_v27  ;;  %v5422_v35 = vshll.u32 %v9834_v47, 16  ;;  %v5420_v36 = vshrl.u32 %v9834_v47, 16  ;;  %v5415_v10 = vshll.u32 %v9833_v38, 16  ;;  %v5413_v44 = vshrl.u32 %v9833_v38, 16  ;;  %v11769_v26 = vld [vmem:[#allocation7 + $0xf8] ss:$12 sps:$4 sm:$0xff]  }
 0x583   :  { %6009 = vmatprep.subr.bf16.mxu1 %v12241_v0  ;;  %v11766_v27 = vld [vmem:[#allocation7 + $0x528] ss:$12 sps:$4 sm:$0xff]   ;;  %v11770_v47 = vld [vmem:[#allocation7 + $0x38] ss:$12 sps:$4 sm:$0xff]  }
 0x584   :  { %v5424_v39 = vrot.slane %v5422_v35, 1  ;;  %v5417_v9 = vrot.slane %v5415_v10, 1  ;;  %v11775_v35 = vld [vmem:[#allocation7 + $0x50] ss:$12 sps:$4 sm:$0xff]   ;;  %v11813_v10 = vld [vmem:[#allocation7 + $0xd8] ss:$12 sps:$4 sm:$0xff]  }
 0x585   :  { %5909 = vmatpush1.bf16.msra.mxu0 %v11710_v31  ;;  %v11773_v31 = vld [vmem:[#allocation7 + $0x4] ss:$12 sps:$4 sm:$0xff]  }
 0x586   :  { %6010 = vmatpush1.bf16.msra.mxu1 %v11713_v32  ;;  %5910 = vmatprep.subr.bf16.mxu0 %v11716_v33  ;;  %v5425_v55 = vor.u32 %v5424_v39, %v5420_v36  ;;  %v5418_v3 = vor.u32 %v5417_v9, %v5413_v44  ;;  %v11774_v32 = vld [vmem:[#allocation7 + $0x110] ss:$12 sps:$4 sm:$0xff]   ;;  %v11771_v33 = vld [vmem:[#allocation7] ss:$12 sps:$4 sm:$0xff]   ;;  %v11779_v39 = vld [vmem:[#allocation7 + $0x128] ss:$12 sps:$4 sm:$0xff]  }
 0x587   :  { %6011 = vmatprep.subr.bf16.mxu1 %v12241_v0  ;;  %v11778_v36 = vld [vmem:[#allocation7 + $0x1c] ss:$12 sps:$4 sm:$0xff]   ;;  %v11811_v38 = vld [vmem:[#allocation7 + $0xc4] ss:$12 sps:$4 sm:$0xff]   ;;  %v11820_v9 = vld [vmem:[#allocation7 + $0x200] ss:$12 sps:$4 sm:$0xff]  }
 0x588   :  { %9920 = vmatprep.mubr.msk.bf16.mxu1 %vm1232_vm7, %v5425_v55  ;;  %v11824_v44 = vld [vmem:[#allocation7 + $0x218] ss:$12 sps:$4 sm:$0xff]  }
 0x589   :  { %5911 = vmatpush1.bf16.msra.mxu0 %v11714_v40  ;;  %v11776_v40 = vld [vmem:[#allocation7 + $0x18] ss:$12 sps:$4 sm:$0xff]  }
 0x58a   :  { %6012 = vmatpush1.bf16.msra.mxu1 %v11718_v41  ;;  %5923 = vmatprep.subr.bf16.mxu0 %v11721_v42  ;;  %v11783_v41 = vld [vmem:[#allocation7 + $0x34] ss:$12 sps:$4 sm:$0xff]  }
 0x58b   :  { %6013 = vmatprep.subr.bf16.mxu1 %v12241_v0  ;;  %v11784_v42 = vld [vmem:[#allocation7 + $0x140] ss:$12 sps:$4 sm:$0xff]  }
 0x58c   :  { %5913 = vmatmul.mubr.bf16.vlgmr.msra.gmra.mrb[28].mxu0 %v5404_v25  ;;  %v11768_v25 = vld [vmem:[#allocation7 + $0x52c] ss:$12 sps:$4 sm:$0xff]  }
 0x58d   :  { %5924 = vmatpush1.bf16.msra.mxu0 %v11719_v43  ;;  %9919 = vmatprep.mubr.msk.bf16.mxu0 %vm1232_vm7, %v5425_v55  ;;  %v11780_v55 = vld [vmem:[#allocation7 + $0x68] ss:$12 sps:$4 sm:$0xff]   ;;  %v11781_v43 = vld [vmem:[#allocation7 + $0x30] ss:$12 sps:$4 sm:$0xff]  }
 0x58e   :  { %6014 = vmatpush1.bf16.msra.mxu1 %v11722_v45  ;;  %5925 = vmatprep.subr.bf16.mxu0 %v11725_v46  ;;  %v11785_v45 = vld [vmem:[#allocation7 + $0x80] ss:$12 sps:$4 sm:$0xff]  }
 0x58f   :  { %6015 = vmatprep.subr.bf16.mxu1 %v12241_v0  ;;  %v11788_v46 = vld [vmem:[#allocation7 + $0x4c] ss:$12 sps:$4 sm:$0xff]  }
 0x591   :  { %5926 = vmatpush1.bf16.msra.mxu0 %v11723_v29  ;;  %v11789_v29 = vld [vmem:[#allocation7 + $0x158] ss:$12 sps:$4 sm:$0xff]  }
 0x592   :  { %6016 = vmatpush1.bf16.msra.mxu1 %v11726_v63  ;;  %5927 = vmatprep.subr.bf16.mxu0 %v11729_v62  ;;  %v11786_v63 = vld [vmem:[#allocation7 + $0x48] ss:$12 sps:$4 sm:$0xff]   ;;  %v11790_v62 = vld [vmem:[#allocation7 + $0x98] ss:$12 sps:$4 sm:$0xff]  }
 0x593   :  { %6017 = vmatprep.subr.bf16.mxu1 %v12241_v0 }
 0x595   :  { %5928 = vmatpush1.bf16.msra.mxu0 %v11727_v49  ;;  %v11793_v49 = vld [vmem:[#allocation7 + $0x64] ss:$12 sps:$4 sm:$0xff]  }
 0x596   :  { %6018 = vmatpush1.bf16.msra.mxu1 %v11730_v50  ;;  %5929 = vmatprep.subr.bf16.mxu0 %v11733_v51  ;;  %v11794_v50 = vld [vmem:[#allocation7 + $0x170] ss:$12 sps:$4 sm:$0xff]   ;;  %v11791_v51 = vld [vmem:[#allocation7 + $0x60] ss:$12 sps:$4 sm:$0xff]  }
 0x597   :  { %6019 = vmatprep.subr.bf16.mxu1 %v12241_v0 }
 0x599   :  { %5930 = vmatpush1.bf16.msra.mxu0 %v11731_v19  ;;  %v11795_v19 = vld [vmem:[#allocation7 + $0xb0] ss:$12 sps:$4 sm:$0xff]  }
 0x59a   :  { %6020 = vmatpush1.bf16.msra.mxu1 %v11734_v52  ;;  %5931 = vmatprep.subr.bf16.mxu0 %v11737_v8  ;;  %v11798_v52 = vld [vmem:[#allocation7 + $0x7c] ss:$12 sps:$4 sm:$0xff]   ;;  %v11796_v8 = vld [vmem:[#allocation7 + $0x78] ss:$12 sps:$4 sm:$0xff]  }
 0x59b   :  { %6021 = vmatprep.subr.bf16.mxu1 %v12241_v0 }
 0x59d   :  { %5932 = vmatpush1.bf16.msra.mxu0 %v11735_v53  ;;  %v12777_v53 = vld [vmem:[#allocation2 + $0x18] sm:$0x33] }
 0x59e   :  { %6022 = vmatpush1.bf16.msra.mxu1 %v11738_v54  ;;  %5933 = vmatprep.subr.bf16.mxu0 %v11741_v56  ;;  %v11799_v54 = vld [vmem:[#allocation7 + $0x188] ss:$12 sps:$4 sm:$0xff]   ;;  %v12781_v56 = vcombine.low %v12737_v48, %v12773_v60  ;;  %v11827_v60 = vld [vmem:[#allocation7 + $0x124] ss:$12 sps:$4 sm:$0xff]  }
 0x59f   :  { %6023 = vmatprep.subr.bf16.mxu1 %v12241_v0  ;;  %v11805_v48 = vld [vmem:[#allocation7 + $0xa8] ss:$12 sps:$4 sm:$0xff]  }
 0x5a1   :  { %5934 = vmatpush1.bf16.msra.mxu0 %v11739_v57  ;;  %v11803_v57 = vld [vmem:[#allocation7 + $0x94] ss:$12 sps:$4 sm:$0xff]  }
 0x5a2   :  { %6024 = vmatpush1.bf16.msra.mxu1 %v11742_v58  ;;  %5935 = vmatprep.subr.bf16.mxu0 %v11745_v59  ;;  %v12786_v58 = vcombine.high %v12752_v28, %v12777_v53  ;;  %v11801_v59 = vld [vmem:[#allocation7 + $0x90] ss:$12 sps:$4 sm:$0xff]  }
 0x5a3   :  { %6025 = vmatprep.subr.bf16.mxu1 %v12241_v0 }
 0x5a5   :  { %5936 = vmatpush1.bf16.msra.mxu0 %v11743_v7  ;;  %v11804_v7 = vld [vmem:[#allocation7 + $0x1a0] ss:$12 sps:$4 sm:$0xff]  }
 0x5a6   :  { %6026 = vmatpush1.bf16.msra.mxu1 %v11746_v5  ;;  %5937 = vmatprep.subr.bf16.mxu0 %v11749_v11  ;;  %v11807_v5 = vld [vmem:[#allocation7 + $0xac] ss:$12 sps:$4 sm:$0xff]  }
 0x5a7   :  { %6027 = vmatprep.subr.bf16.mxu1 %v12241_v0  ;;  %v11808_v11 = vld [vmem:[#allocation7 + $0x1b8] ss:$12 sps:$4 sm:$0xff]  }
 0x5a9   :  { %5938 = vmatpush1.bf16.msra.mxu0 %v11747_v61  ;;  %v11809_v61 = vld [vmem:[#allocation7 + $0xc0] ss:$12 sps:$4 sm:$0xff]  }
 0x5aa   :  { %6028 = vmatpush1.bf16.msra.mxu1 %v11750_v2  ;;  %5939 = vmatprep.subr.bf16.mxu0 %v11753_v34  ;;  %v11812_v2 = vld [vmem:[#allocation7 + $0x1d0] ss:$12 sps:$4 sm:$0xff]  }
 0x5ab   :  { %6029 = vmatprep.subr.bf16.mxu1 %v12241_v0  ;;  %v11815_v34 = vld [vmem:[#allocation7 + $0xdc] ss:$12 sps:$4 sm:$0xff]  }
 0x5ad   :  { %5940 = vmatpush1.bf16.msra.mxu0 %v11751_v12  ;;  %v11816_v12 = vld [vmem:[#allocation7 + $0x1e8] ss:$12 sps:$4 sm:$0xff]  }
 0x5ae   :  { %6030 = vmatpush1.bf16.msra.mxu1 %v11754_v13  ;;  %5941 = vmatprep.subr.bf16.mxu0 %v11757_v14  ;;  %v11819_v13 = vld [vmem:[#allocation7 + $0xf4] ss:$12 sps:$4 sm:$0xff]   ;;  %v11817_v14 = vld [vmem:[#allocation7 + $0xf0] ss:$12 sps:$4 sm:$0xff]  }
 0x5af   :  { %10526 = vmatprep.subr.bf16.mxu1 %v11759_v6  ;;  %v11823_v6 = vld [vmem:[#allocation7 + $0x10c] ss:$12 sps:$4 sm:$0xff]  }
 0x5b1   :  { %5942 = vmatpush1.bf16.msra.mxu0 %v11755_v18  ;;  %6040 = vmatmul.mubr.bf16.vlgmr.msra.gmra.mrb[76].mxu1 %v5418_v3  ;;  %v11821_v18 = vld [vmem:[#allocation7 + $0x108] ss:$12 sps:$4 sm:$0xff]  }
 0x5b2   :  { %10527 = vmatpush3.bf16.msra.mxu1 %v11760_v1  ;;  %6630 = vmatprep.mubr.bf16.mxu1 %v9922_v23  ;;  %v11825_v1 = vld [vmem:[#allocation7 + $0x120] ss:$12 sps:$4 sm:$0xff]  }
 0x5b3   :  { %5943 = vmatprep.subr.bf16.mxu0 %v11763_v21  ;;  %10528 = vmatprep.subr.bf16.mxu1 %v11764_v22  ;;  %v11831_v21 = vld [vmem:[#allocation7 + $0x13c] ss:$12 sps:$4 sm:$0xff]   ;;  %v11829_v22 = vld [vmem:[#allocation7 + $0x138] ss:$12 sps:$4 sm:$0xff]  }
 0x5b5   :  { %5944 = vmatpush1.bf16.msra.mxu0 %v11761_v24  ;;  %v11835_v24 = vld [vmem:[#allocation7 + $0x154] ss:$12 sps:$4 sm:$0xff]  }
 0x5b6   :  { %10529 = vmatpush3.bf16.msra.mxu1 %v11765_v4  ;;  %5945 = vmatprep.subr.bf16.mxu0 %v11768_v25  ;;  %v11833_v4 = vld [vmem:[#allocation7 + $0x150] ss:$12 sps:$4 sm:$0xff]   ;;  %v11836_v25 = vld [vmem:[#allocation7 + $0x260] ss:$12 sps:$4 sm:$0xff]  }
 0x5b7   :  { %10530 = vmatprep.subr.bf16.mxu1 %v11769_v26  ;;  %v11839_v26 = vld [vmem:[#allocation7 + $0x16c] ss:$12 sps:$4 sm:$0xff]  }
 0x5b9   :  { %5946 = vmatpush1.bf16.msra.mxu0 %v11766_v27  ;;  %v11837_v27 = vld [vmem:[#allocation7 + $0x168] ss:$12 sps:$4 sm:$0xff]  }
 0x5ba   :  { %10531 = vmatpush3.bf16.msra.mxu1 %v11770_v47  ;;  %6512 = vmatprep.subr.bf16.mxu0 %v11773_v31  ;;  %v11840_v47 = vld [vmem:[#allocation7 + $0x278] ss:$12 sps:$4 sm:$0xff]  }
 0x5bb   :  { %10532 = vmatprep.subr.bf16.mxu1 %v11774_v32  ;;  %v11843_v31 = vld [vmem:[#allocation7 + $0x184] ss:$12 sps:$4 sm:$0xff]   ;;  %v11841_v32 = vld [vmem:[#allocation7 + $0x180] ss:$12 sps:$4 sm:$0xff]  }
 0x5bc   :  { %5956 = vmatmul.mubr.bf16.vlgmr.msra.gmra.mrb[28].mxu0 %v5418_v3  ;;  %v11828_v3 = vld [vmem:[#allocation7 + $0x230] ss:$12 sps:$4 sm:$0xff]  }
 0x5bd   :  { %6513 = vmatpush1.bf16.msra.mxu0 %v11771_v33  ;;  %6544 = vmatprep.mubr.bf16.mxu0 %v9922_v23  ;;  %v11832_v23 = vld [vmem:[#allocation7 + $0x248] ss:$12 sps:$4 sm:$0xff]   ;;  %v11844_v33 = vld [vmem:[#allocation7 + $0x290] ss:$12 sps:$4 sm:$0xff]  }
 0x5be   :  { %10533 = vmatpush3.bf16.msra.mxu1 %v11775_v35  ;;  %6514 = vmatprep.subr.bf16.mxu0 %v11778_v36  ;;  %v11847_v35 = vld [vmem:[#allocation7 + $0x19c] ss:$12 sps:$4 sm:$0xff]  }
 0x5bf   :  { %10534 = vmatprep.subr.bf16.mxu1 %v11779_v39  ;;  %v11849_v36 = vld [vmem:[#allocation7 + $0x608] ss:$12 sps:$4 sm:$0xff]  }
 0x5c0   :  { %v12802_v39 = vld [vmem:[#allocation2] sm:$0xee] }
 0x5c1   :  { %6515 = vmatpush1.bf16.msra.mxu0 %v11776_v40  ;;  %v10012_v40 = vcombine.high %v12802_v39, %v12744_v17 }
 0x5c2   :  { %10535 = vmatpush3.bf16.msra.mxu1 %v11780_v55  ;;  %6516 = vmatprep.subr.bf16.mxu0 %v11783_v41  ;;  %v11845_v55 = vld [vmem:[#allocation7 + $0x198] ss:$12 sps:$4 sm:$0xff]   ;;  %v11850_v41 = vld [vmem:[#allocation7 + $0x548] ss:$12 sps:$4 sm:$0xff]  }
 0x5c3   :  { %10536 = vmatprep.subr.bf16.mxu1 %v11784_v42  ;;  %v12811_v42 = vcombine.low %v12752_v28, %v12777_v53  ;;  %v11858_v28 = vld [vmem:[#allocation7 + $0x1c8] ss:$12 sps:$4 sm:$0xff]  }
 0x5c4   :  { %v11870_v53 = vld [vmem:[#allocation7 + $0x1fc] ss:$12 sps:$4 sm:$0xff]  }
 0x5c5   :  { %6517 = vmatpush1.bf16.msra.mxu0 %v11781_v43  ;;  %v11855_v43 = vld [vmem:[#allocation7 + $0x1b4] ss:$12 sps:$4 sm:$0xff]  }
 0x5c6   :  { %10537 = vmatpush3.bf16.msra.mxu1 %v11785_v45  ;;  %6518 = vmatprep.subr.bf16.mxu0 %v11788_v46  ;;  %v11856_v45 = vld [vmem:[#allocation7 + $0x620] ss:$12 sps:$4 sm:$0xff]   ;;  %v12813_v46 = vrot.slane %v10012_v40, 1  ;;  %v11908_v40 = vld [vmem:[#allocation7 + $0x728] ss:$12 sps:$4 sm:$0xff]  }
 0x5c7   :  { %10538 = vmatprep.subr.bf16.mxu1 %v11789_v29  ;;  %v11853_v29 = vld [vmem:[#allocation7 + $0x1b0] ss:$12 sps:$4 sm:$0xff]  }
 0x5c9   :  { %6519 = vmatpush1.bf16.msra.mxu0 %v11786_v63  ;;  %v11857_v63 = vld [vmem:[#allocation7 + $0x560] ss:$12 sps:$4 sm:$0xff]  }
 0x5ca   :  { %10539 = vmatpush3.bf16.msra.mxu1 %v11790_v62  ;;  %6520 = vmatprep.subr.bf16.mxu0 %v11793_v49  ;;  %v11860_v62 = vld [vmem:[#allocation7 + $0x1cc] ss:$12 sps:$4 sm:$0xff]  }
 0x5cb   :  { %10540 = vmatprep.subr.bf16.mxu1 %v11794_v50  ;;  %v11861_v49 = vld [vmem:[#allocation7 + $0x638] ss:$12 sps:$4 sm:$0xff]  }
 0x5cc   :  { %v11862_v50 = vld [vmem:[#allocation7 + $0x578] ss:$12 sps:$4 sm:$0xff]  }
 0x5cd   :  { %6521 = vmatpush1.bf16.msra.mxu0 %v11791_v51  ;;  %v11865_v51 = vld [vmem:[#allocation7 + $0x1e4] ss:$12 sps:$4 sm:$0xff]  }
 0x5ce   :  { %10541 = vmatpush3.bf16.msra.mxu1 %v11795_v19  ;;  %6522 = vmatprep.subr.bf16.mxu0 %v11798_v52  ;;  %v11866_v19 = vld [vmem:[#allocation7 + $0x650] ss:$12 sps:$4 sm:$0xff]   ;;  %v11863_v52 = vld [vmem:[#allocation7 + $0x1e0] ss:$12 sps:$4 sm:$0xff]  }
 0x5cf   :  { %6639 = vmatprep.subr.bf16.mxu1 %v12241_v0 }
 0x5d1   :  { %6523 = vmatpush1.bf16.msra.mxu0 %v11796_v8  ;;  %6631 = vmatmul.mubr.bf16.vlgmr.msra.gmra.mrb[80].mxu1 %v12781_v56  ;;  %v11867_v8 = vld [vmem:[#allocation7 + $0x590] ss:$12 sps:$4 sm:$0xff]  }
 0x5d2   :  { %6640 = vmatpush1.bf16.msra.mxu1 %v11799_v54  ;;  %10010 = vmatprep.mubr.msk.bf16.mxu1 %vm1232_vm7, %v12786_v58  ;;  %v11871_v54 = vld [vmem:[#allocation7 + $0x668] ss:$12 sps:$4 sm:$0xff]  }
 0x5d3   :  { %6524 = vmatprep.subr.bf16.mxu0 %v11803_v57  ;;  %6641 = vmatprep.subr.bf16.mxu1 %v12241_v0  ;;  %v11872_v57 = vld [vmem:[#allocation7 + $0x5a8] ss:$12 sps:$4 sm:$0xff]  }
 0x5d5   :  { %6525 = vmatpush1.bf16.msra.mxu0 %v11801_v59  ;;  %v11876_v59 = vld [vmem:[#allocation7 + $0x680] ss:$12 sps:$4 sm:$0xff]  }
 0x5d6   :  { %6642 = vmatpush1.bf16.msra.mxu1 %v11804_v7  ;;  %6526 = vmatprep.subr.bf16.mxu0 %v11807_v5  ;;  %v11873_v7 = vld [vmem:[#allocation7 + $0x210] ss:$12 sps:$4 sm:$0xff]   ;;  %v11877_v5 = vld [vmem:[#allocation7 + $0x5c0] ss:$12 sps:$4 sm:$0xff]  }
 0x5d7   :  { %6643 = vmatprep.subr.bf16.mxu1 %v12241_v0 }
 0x5d9   :  { %6527 = vmatpush1.bf16.msra.mxu0 %v11805_v48  ;;  %v11880_v48 = vld [vmem:[#allocation7 + $0x22c] ss:$12 sps:$4 sm:$0xff]  }
 0x5da   :  { %6644 = vmatpush1.bf16.msra.mxu1 %v11808_v11  ;;  %6528 = vmatprep.subr.bf16.mxu0 %v11811_v38  ;;  %v11881_v11 = vld [vmem:[#allocation7 + $0x698] ss:$12 sps:$4 sm:$0xff]   ;;  %v11878_v38 = vld [vmem:[#allocation7 + $0x228] ss:$12 sps:$4 sm:$0xff]  }
 0x5db   :  { %6645 = vmatprep.subr.bf16.mxu1 %v12241_v0 }
 0x5dd   :  { %6529 = vmatpush1.bf16.msra.mxu0 %v11809_v61  ;;  %v11882_v61 = vld [vmem:[#allocation7 + $0x5d8] ss:$12 sps:$4 sm:$0xff]  }
 0x5de   :  { %6646 = vmatpush1.bf16.msra.mxu1 %v11812_v2  ;;  %6530 = vmatprep.subr.bf16.mxu0 %v11815_v34  ;;  %v11885_v2 = vld [vmem:[#allocation7 + $0x244] ss:$12 sps:$4 sm:$0xff]  }
 0x5df   :  { %6647 = vmatprep.subr.bf16.mxu1 %v12241_v0  ;;  %v11886_v34 = vld [vmem:[#allocation7 + $0x6b0] ss:$12 sps:$4 sm:$0xff]  }
 0x5e1   :  { %6531 = vmatpush1.bf16.msra.mxu0 %v11813_v10  ;;  %v11883_v10 = vld [vmem:[#allocation7 + $0x240] ss:$12 sps:$4 sm:$0xff]  }
 0x5e2   :  { %6648 = vmatpush1.bf16.msra.mxu1 %v11816_v12  ;;  %6532 = vmatprep.subr.bf16.mxu0 %v11819_v13  ;;  %v11887_v12 = vld [vmem:[#allocation7 + $0x5f0] ss:$12 sps:$4 sm:$0xff]  }
 0x5e3   :  { %6649 = vmatprep.subr.bf16.mxu1 %v12241_v0  ;;  %v11890_v13 = vld [vmem:[#allocation7 + $0x25c] ss:$12 sps:$4 sm:$0xff]  }
 0x5e5   :  { %6533 = vmatpush1.bf16.msra.mxu0 %v11817_v14  ;;  %v10011_v14 = vcombine.low %v12802_v39, %v12744_v17  ;;  %v11895_v17 = vld [vmem:[#allocation7 + $0x274] ss:$12 sps:$4 sm:$0xff]   ;;  %v11905_v39 = vld [vmem:[#allocation7 + $0x558] ss:$12 sps:$4 sm:$0xff]  }
 0x5e6   :  { %6650 = vmatpush1.bf16.msra.mxu1 %v11820_v9  ;;  %6534 = vmatprep.subr.bf16.mxu0 %v11823_v6  ;;  %v12819_v9 = vld [vmem:[#allocation2 + $0x8] sm:$0xee] }
 0x5e7   :  { %6651 = vmatprep.subr.bf16.mxu1 %v12241_v0  ;;  %v10014_v6 = vcombine.high %v12819_v9, %v12754_v30 }
 0x5e9   :  { %6535 = vmatpush1.bf16.msra.mxu0 %v11821_v18  ;;  %v4639_v18 = vld [vmem:[%s13071_s8] sm:$0x1] }
 0x5ea   :  { %6652 = vmatpush1.bf16.msra.mxu1 %v11824_v44  ;;  %6536 = vmatprep.subr.bf16.mxu0 %v11827_v60  ;;  %v11888_v44 = vld [vmem:[#allocation7 + $0x258] ss:$12 sps:$4 sm:$0xff]   ;;  %v11891_v60 = vld [vmem:[#allocation7 + $0x6c8] ss:$12 sps:$4 sm:$0xff]  }
 0x5eb   :  { %6653 = vmatprep.subr.bf16.mxu1 %v12241_v0 }
 0x5ed   :  { %6537 = vmatpush1.bf16.msra.mxu0 %v11825_v1  ;;  %v12826_v1 = vrot.slane %v10011_v14, 1 }
 0x5ee   :  { %6654 = vmatpush1.bf16.msra.mxu1 %v11828_v3  ;;  %6538 = vmatprep.subr.bf16.mxu0 %v11831_v21 }
 0x5ef   :  { %6655 = vmatprep.subr.bf16.mxu1 %v12241_v0 }
 0x5f1   :  { %6539 = vmatpush1.bf16.msra.mxu0 %v11829_v22 }
 0x5f2   :  { %6656 = vmatpush1.bf16.msra.mxu1 %v11832_v23  ;;  %6540 = vmatprep.subr.bf16.mxu0 %v11835_v24  ;;  %v12829_v23 = vrot.slane %v10014_v6, 1  ;;  %v11952_v6 = vld [vmem:[#allocation7 + $0x67c] ss:$12 sps:$4 sm:$0xff]  }
 0x5f3   :  { %6657 = vmatprep.subr.bf16.mxu1 %v12241_v0 }
 0x5f5   :  { %6541 = vmatpush1.bf16.msra.mxu0 %v11833_v4  ;;  %v11893_v4 = vld [vmem:[#allocation7 + $0x270] ss:$12 sps:$4 sm:$0xff]  }
 0x5f6   :  { %6658 = vmatpush1.bf16.msra.mxu1 %v11836_v25  ;;  %6542 = vmatprep.subr.bf16.mxu0 %v11839_v26  ;;  %v11896_v26 = vld [vmem:[#allocation7 + $0x6e0] ss:$12 sps:$4 sm:$0xff]  }
 0x5f7   :  { %6659 = vmatprep.subr.bf16.mxu1 %v12241_v0 }
 0x5f9   :  { %6543 = vmatpush1.bf16.msra.mxu0 %v11837_v27  ;;  %v11899_v27 = vld [vmem:[#allocation7 + $0x28c] ss:$12 sps:$4 sm:$0xff]  }
 0x5fa   :  { %6660 = vmatpush1.bf16.msra.mxu1 %v11840_v47  ;;  %6555 = vmatprep.subr.bf16.mxu0 %v11843_v31  ;;  %v11897_v47 = vld [vmem:[#allocation7 + $0x288] ss:$12 sps:$4 sm:$0xff]   ;;  %v11900_v31 = vld [vmem:[#allocation7 + $0x6f8] ss:$12 sps:$4 sm:$0xff]  }
 0x5fb   :  { %6661 = vmatprep.subr.bf16.mxu1 %v12241_v0 }
 0x5fc   :  { %6545 = vmatmul.mubr.bf16.vlgmr.msra.gmra.mrb[28].mxu0 %v12781_v56  ;;  %v11868_v56 = vld [vmem:[#allocation7 + $0x1f8] ss:$12 sps:$4 sm:$0xff]  }
 0x5fd   :  { %6556 = vmatpush1.bf16.msra.mxu0 %v11841_v32  ;;  %10009 = vmatprep.mubr.msk.bf16.mxu0 %vm1232_vm7, %v12786_v58  ;;  %v11875_v58 = vld [vmem:[#allocation7 + $0x214] ss:$12 sps:$4 sm:$0xff]   ;;  %v11903_v32 = vld [vmem:[#allocation7 + $0x544] ss:$12 sps:$4 sm:$0xff]  }
 0x5fe   :  { %6662 = vmatpush1.bf16.msra.mxu1 %v11844_v33  ;;  %6557 = vmatprep.subr.bf16.mxu0 %v11847_v35  ;;  %v11901_v33 = vld [vmem:[#allocation7 + $0x540] ss:$12 sps:$4 sm:$0xff]   ;;  %v11904_v35 = vld [vmem:[#allocation7 + $0x710] ss:$12 sps:$4 sm:$0xff]  }
 0x5ff   :  { %10548 = vmatprep.subr.bf16.mxu1 %v11849_v36  ;;  %v11907_v36 = vld [vmem:[#allocation7 + $0x55c] ss:$12 sps:$4 sm:$0xff]  }
 0x601   :  { %6558 = vmatpush1.bf16.msra.mxu0 %v11845_v55  ;;  %6672 = vmatmul.mubr.bf16.vlgmr.msra.gmra.mrb[84].mxu1 %v12811_v42  ;;  %v11911_v55 = vld [vmem:[#allocation7 + $0x574] ss:$12 sps:$4 sm:$0xff]  }
 0x602   :  { %10549 = vmatpush3.bf16.msra.mxu1 %v11850_v41  ;;  %7380 = vmatprep.mubr.bf16.mxu1 %v12813_v46  ;;  %v11909_v41 = vld [vmem:[#allocation7 + $0x570] ss:$12 sps:$4 sm:$0xff]  }
 0x603   :  { %6559 = vmatprep.subr.bf16.mxu0 %v11855_v43  ;;  %10550 = vmatprep.subr.bf16.mxu1 %v11856_v45  ;;  %v11912_v43 = vld [vmem:[#allocation7 + $0x740] ss:$12 sps:$4 sm:$0xff]  }
 0x604   :  { %v11915_v45 = vld [vmem:[#allocation7 + $0x58c] ss:$12 sps:$4 sm:$0xff]  }
 0x605   :  { %6560 = vmatpush1.bf16.msra.mxu0 %v11853_v29  ;;  %v11919_v29 = vld [vmem:[#allocation7 + $0x5a4] ss:$12 sps:$4 sm:$0xff]  }
 0x606   :  { %10551 = vmatpush3.bf16.msra.mxu1 %v11857_v63  ;;  %6561 = vmatprep.subr.bf16.mxu0 %v11860_v62  ;;  %v11917_v63 = vld [vmem:[#allocation7 + $0x5a0] ss:$12 sps:$4 sm:$0xff]   ;;  %v11920_v62 = vld [vmem:[#allocation7 + $0x770] ss:$12 sps:$4 sm:$0xff]  }
 0x607   :  { %10552 = vmatprep.subr.bf16.mxu1 %v11861_v49  ;;  %v11923_v49 = vld [vmem:[#allocation7 + $0x5bc] ss:$12 sps:$4 sm:$0xff]  }
 0x609   :  { %6562 = vmatpush1.bf16.msra.mxu0 %v11858_v28  ;;  %v11921_v28 = vld [vmem:[#allocation7 + $0x5b8] ss:$12 sps:$4 sm:$0xff]  }
 0x60a   :  { %10553 = vmatpush3.bf16.msra.mxu1 %v11862_v50  ;;  %6563 = vmatprep.subr.bf16.mxu0 %v11865_v51  ;;  %v11924_v50 = vld [vmem:[#allocation7 + $0x788] ss:$12 sps:$4 sm:$0xff]  }
 0x60b   :  { %10554 = vmatprep.subr.bf16.mxu1 %v11866_v19  ;;  %v11927_v51 = vld [vmem:[#allocation7 + $0x5d4] ss:$12 sps:$4 sm:$0xff]   ;;  %v11925_v19 = vld [vmem:[#allocation7 + $0x5d0] ss:$12 sps:$4 sm:$0xff]  }
 0x60d   :  { %6564 = vmatpush1.bf16.msra.mxu0 %v11863_v52  ;;  %v11928_v52 = vld [vmem:[#allocation7 + $0x7a0] ss:$12 sps:$4 sm:$0xff]  }
 0x60e   :  { %10555 = vmatpush3.bf16.msra.mxu1 %v11867_v8  ;;  %6565 = vmatprep.subr.bf16.mxu0 %v11870_v53  ;;  %v11931_v8 = vld [vmem:[#allocation7 + $0x5ec] ss:$12 sps:$4 sm:$0xff]   ;;  %v11929_v53 = vld [vmem:[#allocation7 + $0x5e8] ss:$12 sps:$4 sm:$0xff]  }
 0x60f   :  { %10556 = vmatprep.subr.bf16.mxu1 %v11871_v54  ;;  %v11932_v54 = vld [vmem:[#allocation7 + $0x7b8] ss:$12 sps:$4 sm:$0xff]  }
 0x611   :  { %6566 = vmatpush1.bf16.msra.mxu0 %v11868_v56  ;;  %v11935_v56 = vld [vmem:[#allocation7 + $0x604] ss:$12 sps:$4 sm:$0xff]  }
 0x612   :  { %10557 = vmatpush3.bf16.msra.mxu1 %v11872_v57  ;;  %6567 = vmatprep.subr.bf16.mxu0 %v11875_v58  ;;  %v11933_v57 = vld [vmem:[#allocation7 + $0x600] ss:$12 sps:$4 sm:$0xff]   ;;  %v11936_v58 = vld [vmem:[#allocation7 + $0x7d0] ss:$12 sps:$4 sm:$0xff]  }
 0x613   :  { %10558 = vmatprep.subr.bf16.mxu1 %v11876_v59  ;;  %v11939_v59 = vld [vmem:[#allocation7 + $0x61c] ss:$12 sps:$4 sm:$0xff]  }
 0x615   :  { %6568 = vmatpush1.bf16.msra.mxu0 %v11873_v7  ;;  %v10013_v7 = vcombine.low %v12819_v9, %v12754_v30  ;;  %v11949_v30 = vld [vmem:[#allocation7 + $0x664] ss:$12 sps:$4 sm:$0xff]   ;;  %v11947_v9 = vld [vmem:[#allocation7 + $0x660] ss:$12 sps:$4 sm:$0xff]  }
 0x616   :  { %10559 = vmatpush3.bf16.msra.mxu1 %v11877_v5  ;;  %6569 = vmatprep.subr.bf16.mxu0 %v11880_v48  ;;  %v11937_v5 = vld [vmem:[#allocation7 + $0x618] ss:$12 sps:$4 sm:$0xff]   ;;  %v11943_v48 = vld [vmem:[#allocation7 + $0x634] ss:$12 sps:$4 sm:$0xff]  }
 0x617   :  { %10560 = vmatprep.subr.bf16.mxu1 %v11881_v11  ;;  %v12850_v11 = vrot.slane %v10013_v7, 1 }
 0x619   :  { %6570 = vmatpush1.bf16.msra.mxu0 %v11878_v38  ;;  %v11941_v38 = vld [vmem:[#allocation7 + $0x630] ss:$12 sps:$4 sm:$0xff]  }
 0x61a   :  { %10561 = vmatpush3.bf16.msra.mxu1 %v11882_v61  ;;  %6571 = vmatprep.subr.bf16.mxu0 %v11885_v2  ;;  %v11946_v61 = vld [vmem:[#allocation7 + $0x64c] ss:$12 sps:$4 sm:$0xff]  }
 0x61b   :  { %10562 = vmatprep.subr.bf16.mxu1 %v11886_v34 }
 0x61d   :  { %6572 = vmatpush1.bf16.msra.mxu0 %v11883_v10 }
 0x61e   :  { %10563 = vmatpush3.bf16.msra.mxu1 %v11887_v12  ;;  %6573 = vmatprep.subr.bf16.mxu0 %v11890_v13 }
 0x61f   :  { %v4722_v3 = vpop.f32.mrb[24].mxu0  ;;  %7389 = vmatprep.subr.bf16.mxu1 %v12241_v0 }
 0x620   :  { %v4723_v21 = vadd.f32 %v4722_v3, %v4639_v18  ;;  %v10867_v22 = vpop.f32.mrb[25].mxu0  ;;  %v11950_v18 = vld [vmem:[#allocation7 + $0x678] ss:$12 sps:$4 sm:$0xff]  }
 0x621   :  { %6574 = vmatpush1.bf16.msra.mxu0 %v11888_v44  ;;  %7381 = vmatmul.mubr.bf16.vlgmr.msra.gmra.mrb[88].mxu1 %v12826_v1  ;;  %v4725_v24 = vpop.f32.mrb[26].mxu0  ;;  %v11955_v44 = vld [vmem:[#allocation7 + $0x694] ss:$12 sps:$4 sm:$0xff]   ;;  %v11958_v3 = vld [vmem:[#allocation7 + $0x6ac] ss:$12 sps:$4 sm:$0xff]  }
 0x622   :  { %7390 = vmatpush1.bf16.msra.mxu1 %v11891_v60  ;;  %10100 = vmatprep.mubr.msk.bf16.mxu1 %vm1232_vm7, %v12829_v23  ;;  %v10868_v25 = vpop.f32.mrb[27].mxu0  ;;  %4729 = vst.msk [vmem:[#allocation10] sm:$0x1] %vm4728_vm10, %v4723_v21  ;;  %v11953_v60 = vld [vmem:[#allocation7 + $0x690] ss:$12 sps:$4 sm:$0xff]  }
 0x623   :  { %6575 = vmatprep.subr.bf16.mxu0 %v11895_v17  ;;  %7391 = vmatprep.subr.bf16.mxu1 %v12241_v0  ;;  %v11956_v17 = vld [vmem:[#allocation7 + $0x6a8] ss:$12 sps:$4 sm:$0xff]   ;;  %v11961_v21 = vld [vmem:[#allocation7 + $0x6c4] ss:$12 sps:$4 sm:$0xff]   ;;  %v11959_v22 = vld [vmem:[#allocation7 + $0x6c0] ss:$12 sps:$4 sm:$0xff]  }
 0x624   :  { %v11964_v24 = vld [vmem:[#allocation7 + $0x6dc] ss:$12 sps:$4 sm:$0xff]   ;;  %v11967_v25 = vld [vmem:[#allocation7 + $0x6f4] ss:$12 sps:$4 sm:$0xff]  }
 0x625   :  { %6576 = vmatpush1.bf16.msra.mxu0 %v11893_v4  ;;  %v11962_v4 = vld [vmem:[#allocation7 + $0x6d8] ss:$12 sps:$4 sm:$0xff]  }
 0x626   :  { %7392 = vmatpush1.bf16.msra.mxu1 %v11896_v26  ;;  %6577 = vmatprep.subr.bf16.mxu0 %v11899_v27  ;;  %v11965_v26 = vld [vmem:[#allocation7 + $0x6f0] ss:$12 sps:$4 sm:$0xff]   ;;  %v11970_v27 = vld [vmem:[#allocation7 + $0x70c] ss:$12 sps:$4 sm:$0xff]  }
 0x627   :  { %7393 = vmatprep.subr.bf16.mxu1 %v12241_v0 }
 0x629   :  { %6578 = vmatpush1.bf16.msra.mxu0 %v11897_v47  ;;  %v11968_v47 = vld [vmem:[#allocation7 + $0x708] ss:$12 sps:$4 sm:$0xff]  }
 0x62a   :  { %7394 = vmatpush1.bf16.msra.mxu1 %v11900_v31  ;;  %7262 = vmatprep.subr.bf16.mxu0 %v11903_v32  ;;  %v11973_v31 = vld [vmem:[#allocation7 + $0x724] ss:$12 sps:$4 sm:$0xff]   ;;  %v11971_v32 = vld [vmem:[#allocation7 + $0x720] ss:$12 sps:$4 sm:$0xff]  }
 0x62b   :  { %7395 = vmatprep.subr.bf16.mxu1 %v12241_v0 }
 0x62c   :  { %6588 = vmatmul.mubr.bf16.vlgmr.msra.gmra.mrb[28].mxu0 %v12811_v42  ;;  %v11913_v42 = vld [vmem:[#allocation7 + $0x588] ss:$12 sps:$4 sm:$0xff]  }
 0x62d   :  { %7263 = vmatpush1.bf16.msra.mxu0 %v11901_v33  ;;  %7294 = vmatprep.mubr.bf16.mxu0 %v12813_v46  ;;  %v11916_v46 = vld [vmem:[#allocation7 + $0x758] ss:$12 sps:$4 sm:$0xff]   ;;  %v11976_v33 = vld [vmem:[#allocation7 + $0x73c] ss:$12 sps:$4 sm:$0xff]  }
 0x62e   :  { %7396 = vmatpush1.bf16.msra.mxu1 %v11904_v35  ;;  %7264 = vmatprep.subr.bf16.mxu0 %v11907_v36  ;;  %v11979_v35 = vld [vmem:[#allocation7 + $0x754] ss:$12 sps:$4 sm:$0xff]   ;;  %v11982_v36 = vld [vmem:[#allocation7 + $0x76c] ss:$12 sps:$4 sm:$0xff]  }
 0x62f   :  { %7397 = vmatprep.subr.bf16.mxu1 %v12241_v0 }
 0x631   :  { %7265 = vmatpush1.bf16.msra.mxu0 %v11905_v39 }
 0x632   :  { %7398 = vmatpush1.bf16.msra.mxu1 %v11908_v40  ;;  %7266 = vmatprep.subr.bf16.mxu0 %v11911_v55 }
 0x633   :  { %7399 = vmatprep.subr.bf16.mxu1 %v12241_v0 }
 0x635   :  { %7267 = vmatpush1.bf16.msra.mxu0 %v11909_v41  ;;  %v11980_v41 = vld [vmem:[#allocation7 + $0x768] ss:$12 sps:$4 sm:$0xff]  }
 0x636   :  { %7400 = vmatpush1.bf16.msra.mxu1 %v11912_v43  ;;  %7268 = vmatprep.subr.bf16.mxu0 %v11915_v45  ;;  %v11985_v45 = vld [vmem:[#allocation7 + $0x784] ss:$12 sps:$4 sm:$0xff]  }
 0x637   :  { %7401 = vmatprep.subr.bf16.mxu1 %v12241_v0 }
 0x639   :  { %7269 = vmatpush1.bf16.msra.mxu0 %v11913_v42 }
 0x63a   :  { %7402 = vmatpush1.bf16.msra.mxu1 %v11916_v46  ;;  %7270 = vmatprep.subr.bf16.mxu0 %v11919_v29  ;;  %v11983_v29 = vld [vmem:[#allocation7 + $0x780] ss:$12 sps:$4 sm:$0xff]  }
 0x63b   :  { %7403 = vmatprep.subr.bf16.mxu1 %v12241_v0 }
 0x63d   :  { %7271 = vmatpush1.bf16.msra.mxu0 %v11917_v63  ;;  %v11988_v63 = vld [vmem:[#allocation7 + $0x79c] ss:$12 sps:$4 sm:$0xff]  }
 0x63e   :  { %7404 = vmatpush1.bf16.msra.mxu1 %v11920_v62  ;;  %7272 = vmatprep.subr.bf16.mxu0 %v11923_v49  ;;  %v11986_v62 = vld [vmem:[#allocation7 + $0x798] ss:$12 sps:$4 sm:$0xff]   ;;  %v11991_v49 = vld [vmem:[#allocation7 + $0x7b4] ss:$12 sps:$4 sm:$0xff]  }
 0x63f   :  { %7405 = vmatprep.subr.bf16.mxu1 %v12241_v0 }
 0x641   :  { %7273 = vmatpush1.bf16.msra.mxu0 %v11921_v28  ;;  %v11989_v28 = vld [vmem:[#allocation7 + $0x7b0] ss:$12 sps:$4 sm:$0xff]  }
 0x642   :  { %7406 = vmatpush1.bf16.msra.mxu1 %v11924_v50  ;;  %7274 = vmatprep.subr.bf16.mxu0 %v11927_v51  ;;  %v11994_v50 = vld [vmem:[#allocation7 + $0x7cc] ss:$12 sps:$4 sm:$0xff]   ;;  %v11992_v51 = vld [vmem:[#allocation7 + $0x7c8] ss:$12 sps:$4 sm:$0xff]  }
 0x643   :  { %7407 = vmatprep.subr.bf16.mxu1 %v12241_v0 }
 0x645   :  { %7275 = vmatpush1.bf16.msra.mxu0 %v11925_v19 }
 0x646   :  { %7408 = vmatpush1.bf16.msra.mxu1 %v11928_v52  ;;  %7276 = vmatprep.subr.bf16.mxu0 %v11931_v8 }
 0x647   :  { %7409 = vmatprep.subr.bf16.mxu1 %v12241_v0 }
 0x649   :  { %7277 = vmatpush1.bf16.msra.mxu0 %v11929_v53 }
 0x64a   :  { %7410 = vmatpush1.bf16.msra.mxu1 %v11932_v54  ;;  %7278 = vmatprep.subr.bf16.mxu0 %v11935_v56 }
 0x64b   :  { %7411 = vmatprep.subr.bf16.mxu1 %v12241_v0  ;;  %v11944_v0 = vld [vmem:[#allocation7 + $0x648] ss:$12 sps:$4 sm:$0xff]  }
 0x64d   :  { %7279 = vmatpush1.bf16.msra.mxu0 %v11933_v57 }
 0x64e   :  { %7412 = vmatpush1.bf16.msra.mxu1 %v11936_v58  ;;  %7280 = vmatprep.subr.bf16.mxu0 %v11939_v59 }
 0x651   :  { %7281 = vmatpush1.bf16.msra.mxu0 %v11937_v5  ;;  %7422 = vmatmul.mubr.bf16.vlgmr.msra.gmra.mrb[92].mxu1 %v12850_v11 }
 0x652   :  { %7282 = vmatprep.subr.bf16.mxu0 %v11943_v48 }
 0x654   :  { %v10520_v2 = vpop.f32.mrb[72].mxu1 }
 0x655   :  { %7283 = vmatpush1.bf16.msra.mxu0 %v11941_v38  ;;  %v10521_v34 = vpop.f32.mrb[73].mxu1 }
 0x656   :  { %v10522_v10 = vadd.f32 %v10521_v34, %v10520_v2  ;;  %v10523_v12 = vpop.f32.mrb[74].mxu1  ;;  %7284 = vmatprep.subr.bf16.mxu0 %v11946_v61 }
 0x657   :  { %v10524_v13 = vpop.f32.mrb[75].mxu1 }
 0x658   :  { %v10525_v14 = vadd.f32 %v10524_v13, %v10523_v12  ;;  %v11996_v13 = vld [vmem:[#allocation9 + $0xb0] sm:$0xff]  }
 0x659   :  { %7285 = vmatpush1.bf16.msra.mxu0 %v11944_v0 }
 0x65a   :  { %7286 = vmatprep.subr.bf16.mxu0 %v11949_v30  ;;  %v11995_v30 = vld [vmem:[#allocation9 + $0xf0] sm:$0xff]  }
 0x65b   :  { %10570 = vmatprep.subr.bf16.mxu1 %v11995_v30 }
 0x65c   :  { %10571 = vmatpush3.bf16.msra.mxu1 %v11996_v13  ;;  %v12014_v13 = vld [vmem:[#allocation9 + $0x128] sm:$0xff]  }
 0x65d   :  { %7287 = vmatpush1.bf16.msra.mxu0 %v11947_v9  ;;  %v12000_v9 = vld [vmem:[#allocation9 + $0x80] sm:$0xff]  }
 0x65e   :  { %7288 = vmatprep.subr.bf16.mxu0 %v11952_v6  ;;  %v11998_v6 = vld [vmem:[#allocation9 + $0xb8] sm:$0xff]  }
 0x661   :  { %7289 = vmatpush1.bf16.msra.mxu0 %v11950_v18  ;;  %v12003_v18 = vld [vmem:[#allocation9 + $0x88] sm:$0xff]  }
 0x662   :  { %7290 = vmatprep.subr.bf16.mxu0 %v11955_v44  ;;  %v11999_v44 = vld [vmem:[#allocation9 + $0x100] sm:$0xff]  }
 0x665   :  { %7291 = vmatpush1.bf16.msra.mxu0 %v11953_v60  ;;  %v12001_v60 = vld [vmem:[#allocation9 + $0xc0] sm:$0xff]  }
 0x666   :  { %7292 = vmatprep.subr.bf16.mxu0 %v11958_v3  ;;  %v12006_v3 = vld [vmem:[#allocation9 + $0x90] sm:$0xff]  }
 0x669   :  { %7293 = vmatpush1.bf16.msra.mxu0 %v11956_v17  ;;  %v12002_v17 = vld [vmem:[#allocation9 + $0x108] sm:$0xff]  }
 0x66a   :  { %7305 = vmatprep.subr.bf16.mxu0 %v11961_v21  ;;  %v12004_v21 = vld [vmem:[#allocation9 + $0xc8] sm:$0xff]  }
 0x66c   :  { %7295 = vmatmul.mubr.bf16.vlgmr.msra.gmra.mrb[28].mxu0 %v12826_v1  ;;  %v11974_v1 = vld [vmem:[#allocation7 + $0x738] ss:$12 sps:$4 sm:$0xff]  }
 0x66d   :  { %7306 = vmatpush1.bf16.msra.mxu0 %v11959_v22  ;;  %10099 = vmatprep.mubr.msk.bf16.mxu0 %vm1232_vm7, %v12829_v23  ;;  %v11977_v23 = vld [vmem:[#allocation7 + $0x750] ss:$12 sps:$4 sm:$0xff]  }
 0x66e   :  { %7307 = vmatprep.subr.bf16.mxu0 %v11964_v24  ;;  %v12005_v22 = vld [vmem:[#allocation9 + $0x110] sm:$0xff]  }
 0x66f   :  { %v12007_v24 = vld [vmem:[#allocation9 + $0xd0] sm:$0xff]  }
 0x671   :  { %7308 = vmatpush1.bf16.msra.mxu0 %v11962_v4  ;;  %v7436_v4 = vld [vmem:[%s13067_s4] sm:$0x7] }
 0x672   :  { %7309 = vmatprep.subr.bf16.mxu0 %v11967_v25 }
 0x675   :  { %7310 = vmatpush1.bf16.msra.mxu0 %v11965_v26 }
 0x676   :  { %7311 = vmatprep.subr.bf16.mxu0 %v11970_v27  ;;  %v7449_v27 = vrot.slane %v7436_v4, %v12380_v37 }
 0x679   :  { %7312 = vmatpush1.bf16.msra.mxu0 %v11968_v47 }
 0x67a   :  { %7313 = vmatprep.subr.bf16.mxu0 %v11973_v31 }
 0x67d   :  { %7314 = vmatpush1.bf16.msra.mxu0 %v11971_v32 }
 0x67e   :  { %7315 = vmatprep.subr.bf16.mxu0 %v11976_v33 }
 0x681   :  { %7316 = vmatpush1.bf16.msra.mxu0 %v11974_v1 }
 0x682   :  { %7317 = vmatprep.subr.bf16.mxu0 %v11979_v35 }
 0x684   :  { %v6041_v39 = vpop.f32.mrb[76].mxu1 }
 0x685   :  { %v6042_v40 = vadd.f32 %v10522_v10, %v6041_v39  ;;  %v6043_v55 = vpop.f32.mrb[77].mxu1  ;;  %7318 = vmatpush1.bf16.msra.mxu0 %v11977_v23 }
 0x686   :  { %v6044_v43 = vpop.f32.mrb[78].mxu1  ;;  %7319 = vmatprep.subr.bf16.mxu0 %v11982_v36  ;;  %v7441_v55 = vrot.slane %v7436_v4, %v12369_v15 }
 0x687   :  { %v6045_v42 = vadd.f32 %v10525_v14, %v6044_v43  ;;  %v6046_v46 = vpop.f32.mrb[79].mxu1  ;;  %v11997_v14 = vld [vmem:[#allocation9 + $0xf8] sm:$0xff]  }
 0x688   :  { %10572 = vmatprep.subr.bf16.mxu1 %v11997_v14  ;;  %v12015_v14 = vld [vmem:[#allocation9 + $0xa8] sm:$0xff]  }
 0x689   :  { %7320 = vmatpush1.bf16.msra.mxu0 %v11980_v41  ;;  %10573 = vmatpush3.bf16.msra.mxu1 %v11998_v6  ;;  %v7445_v41 = vrot.slane %v7436_v4, %v12372_v16 }
 0x68a   :  { %7321 = vmatprep.subr.bf16.mxu0 %v11985_v45  ;;  %10574 = vmatprep.subr.bf16.mxu1 %v11999_v44 }
 0x68d   :  { %7322 = vmatpush1.bf16.msra.mxu0 %v11983_v29  ;;  %10575 = vmatpush3.bf16.msra.mxu1 %v12001_v60 }
 0x68e   :  { %7323 = vmatprep.subr.bf16.mxu0 %v11988_v63  ;;  %10576 = vmatprep.subr.bf16.mxu1 %v12002_v17 }
 0x691   :  { %7324 = vmatpush1.bf16.msra.mxu0 %v11986_v62  ;;  %10577 = vmatpush3.bf16.msra.mxu1 %v12004_v21 }
 0x692   :  { %7325 = vmatprep.subr.bf16.mxu0 %v11991_v49  ;;  %10578 = vmatprep.subr.bf16.mxu1 %v12005_v22 }
 0x695   :  { %7326 = vmatpush1.bf16.msra.mxu0 %v11989_v28  ;;  %10579 = vmatpush3.bf16.msra.mxu1 %v12007_v24 }
 0x696   :  { %7327 = vmatprep.subr.bf16.mxu0 %v11994_v50 }
 0x699   :  { %7328 = vmatpush1.bf16.msra.mxu0 %v11992_v51 }
 0x69a   :  { %10885 = vmatprep.subr.bf16.mxu0 %v12243_v20 }
 0x69c   :  { %7338 = vmatmul.mubr.bf16.vlgmr.msra.gmra.mrb[28].mxu0 %v12850_v11 }
 0x69d   :  { %10897 = vmatprep.mubr.msk.bf16.mxu0 %vm12244_vm9, %v12243_v20  ;;  %10886 = vmatpush3.bf16.msra.mxu0 %v12000_v9  ;;  %v12016_v9 = vld [vmem:[#allocation9 + $0xe8] sm:$0xff]  }
 0x69e   :  { %10887 = vmatprep.subr.bf16.mxu0 %v12243_v20 }
 0x6a1   :  { %10888 = vmatpush3.bf16.msra.mxu0 %v12003_v18 }
 0x6a2   :  { %10889 = vmatprep.subr.bf16.mxu0 %v12243_v20 }
 0x6a4   :  { %v10542_v19 = vpop.f32.mrb[80].mxu1 }
 0x6a5   :  { %v10543_v52 = vpop.f32.mrb[81].mxu1  ;;  %10890 = vmatpush3.bf16.msra.mxu0 %v12006_v3 }
 0x6a6   :  { %v10544_v8 = vadd.f32 %v10543_v52, %v10542_v19  ;;  %v10545_v53 = vpop.f32.mrb[82].mxu1  ;;  %10891 = vmatprep.subr.bf16.mxu0 %v12243_v20  ;;  %v12008_v52 = vld [vmem:[#allocation9 + $0x118] sm:$0xff]  }
 0x6a7   :  { %v10546_v54 = vpop.f32.mrb[83].mxu1  ;;  %10580 = vmatprep.subr.bf16.mxu1 %v12008_v52 }
 0x6a8   :  { %v10547_v56 = vadd.f32 %v10546_v54, %v10545_v53  ;;  %v6633_v57 = vadd.f32 %v10544_v8, %v6042_v40  ;;  %v12009_v8 = vld [vmem:[#allocation9 + $0x98] sm:$0xff]   ;;  %v12011_v54 = vld [vmem:[#allocation9 + $0x120] sm:$0xff]  }
 0x6a9   :  { %v12010_v53 = vld [vmem:[#allocation9 + $0xd8] sm:$0xff]   ;;  %10892 = vmatpush3.bf16.msra.mxu0 %v12009_v8 }
 0x6aa   :  { %v6636_v58 = vadd.f32 %v10547_v56, %v6045_v42  ;;  %10581 = vmatpush3.bf16.msra.mxu1 %v12010_v53  ;;  %10893 = vmatprep.subr.bf16.mxu0 %v12243_v20  ;;  %v12012_v56 = vld [vmem:[#allocation9 + $0xa0] sm:$0xff]   ;;  %v12020_v8 = vld [vmem:[#allocation9 + $0x138] sm:$0xff]   ;;  %v12021_v53 = vld [vmem:[#allocation9 + $0x1f0] sm:$0xff]  }
 0x6ab   :  { %10582 = vmatprep.subr.bf16.mxu1 %v12011_v54 }
 0x6ad   :  { %10894 = vmatpush3.bf16.msra.mxu0 %v12012_v56 }
 0x6ae   :  { %10895 = vmatprep.subr.bf16.mxu0 %v12243_v20 }
 0x6b1   :  { %10896 = vmatpush3.bf16.msra.mxu0 %v12015_v14 }
 0x6b2   :  { %10901 = vmatprep.subr.bf16.mxu0 %v12243_v20 }
 0x6d4   :  { %v6673_v59 = vpop.f32.mrb[84].mxu1 }
 0x6d5   :  { %v6674_v7 = vadd.f32 %v6673_v59, %v6633_v57  ;;  %v6675_v5 = vpop.f32.mrb[85].mxu1  ;;  %v12013_v57 = vld [vmem:[#allocation9 + $0xe0] sm:$0xff]  }
 0x6d6   :  { %v6676_v48 = vpop.f32.mrb[86].mxu1  ;;  %10583 = vmatpush3.bf16.msra.mxu1 %v12013_v57  ;;  %v12022_v57 = vld [vmem:[#allocation9 + $0x140] sm:$0xff]  }
 0x6d7   :  { %v6677_v38 = vadd.f32 %v6676_v48, %v6636_v58  ;;  %v6678_v61 = vpop.f32.mrb[87].mxu1  ;;  %10584 = vmatprep.subr.bf16.mxu1 %v12014_v13  ;;  %v12028_v13 = vld [vmem:[#allocation9 + $0x158] sm:$0xff]  }
 0x6da   :  { %10585 = vmatpush3.bf16.msra.mxu1 %v12016_v9  ;;  %v12029_v9 = vld [vmem:[#allocation9 + $0x40] sm:$0xff]  }
 0x6db   :  { %10869 = vmatprep.subr.bf16.mxu1 %v12243_v20 }
 0x6f4   :  { %v10564_v2 = vpop.f32.mrb[88].mxu1 }
 0x6f5   :  { %v10565_v34 = vpop.f32.mrb[89].mxu1 }
 0x6f6   :  { %v10566_v11 = vadd.f32 %v10565_v34, %v10564_v2  ;;  %v10567_v0 = vpop.f32.mrb[90].mxu1 }
 0x6f7   :  { %v10568_v10 = vpop.f32.mrb[91].mxu1 }
 0x6f8   :  { %v10569_v12 = vadd.f32 %v10568_v10, %v10567_v0 }
 0x724   :  { %v7423_v25 = vpop.f32.mrb[92].mxu1 }
 0x725   :  { %v7424_v26 = vadd.f32 %v10566_v11, %v7423_v25  ;;  %v7425_v47 = vpop.f32.mrb[93].mxu1 }
 0x726   :  { %v7426_v31 = vpop.f32.mrb[94].mxu1 }
 0x727   :  { %v7432_v32 = vadd.f32 %v7424_v26, %v6674_v7  ;;  %v7427_v33 = vadd.f32 %v10569_v12, %v7426_v31  ;;  %v7428_v1 = vpop.f32.mrb[95].mxu1 }
 0x729   :  { %v7455_v35 = vadd.f32 %v7449_v27, %v7432_v32  ;;  %v7435_v23 = vadd.f32 %v7427_v33, %v6677_v38 }
 0x72b   :  { %v7461_v36 = vmax.f32 %v7455_v35, 0.0  ;;  %v7458_v39 = vadd.f32 %v7449_v27, %v7435_v23 }
 0x72d   :  { %7467 = vst [vmem:[#allocation3 + $0x10] sm:$0xff] %v7461_v36  ;;  %v7464_v40 = vmax.f32 %v7458_v39, 0.0 }
 0x72f   :  { %7470 = vst [vmem:[#allocation3 + $0x28] sm:$0xf] %v7464_v40 }
 0x76f   :  { %v7339_v43 = vpop.f32.mrb[28].mxu0 }
 0x770   :  { %v7453_v45 = vadd.f32 %v7441_v55, %v7339_v43  ;;  %v7341_v42 = vpop.f32.mrb[29].mxu0 }
 0x771   :  { %v7454_v46 = vadd.f32 %v7445_v41, %v7341_v42  ;;  %v7343_v29 = vpop.f32.mrb[30].mxu0 }
 0x772   :  { %v7459_v63 = vmax.f32 %v7453_v45, 0.0  ;;  %v7456_v62 = vadd.f32 %v7441_v55, %v7343_v29  ;;  %v7345_v49 = vpop.f32.mrb[31].mxu0 }
 0x773   :  { %v7460_v28 = vmax.f32 %v7454_v46, 0.0  ;;  %v7457_v50 = vadd.f32 %v7445_v41, %v7345_v49  ;;  %v12017_v46 = vld [vmem:[#allocation9 + $0x1e0] sm:$0xff]  }
 0x774   :  { %7465 = vst [vmem:[#allocation3] sm:$0xff] %v7459_v63  ;;  %v7462_v51 = vmax.f32 %v7456_v62, 0.0 }
 0x775   :  { %7466 = vst [vmem:[#allocation3 + $0x8] sm:$0xff] %v7460_v28  ;;  %v7463_v19 = vmax.f32 %v7457_v50, 0.0  ;;  %v12018_v28 = vld [vmem:[#allocation9 + $0x130] sm:$0xff]  }
 0x776   :  { %7468 = vst [vmem:[#allocation3 + $0x18] sm:$0xf] %v7462_v51  ;;  %v12019_v51 = vld [vmem:[#allocation9 + $0x1e8] sm:$0xff]  }
 0x777   :  { %7469 = vst [vmem:[#allocation3 + $0x20] sm:$0xf] %v7463_v19 }
 0x77c   :  { %v7551_v58 = vld [vmem:[#allocation3 + $0x2] ss:$8 sm:$0x7]  ;;  %v7552_v59 = vld [vmem:[#allocation3 + $0x3] ss:$8 sm:$0x7] }
 0x77d   :  { %v11101_v7 = vpack.i.bf16 %v7552_v59, %v7551_v58  ;;  %v7471_v5 = vld [vmem:[#allocation3] ss:$8 sm:$0x7]  ;;  %v7472_v48 = vld [vmem:[#allocation3 + $0x1] ss:$8 sm:$0x7] }
 0x77e   :  { %v11106_v38 = vpack.i.bf16 %v7472_v48, %v7471_v5  ;;  %v12871_v61 = vld [vmem:[#allocation3 + $0x4] ss:$8 sm:$0x7]  ;;  %v12873_v2 = vld [vmem:[#allocation3 + $0x5] ss:$8 sm:$0x7] }
 0x77f   :  { %11102 = vrot.lane.b32.xlu0 %v11101_v7, %s12242_s21  ;;  %v12876_v34 = vld [vmem:[#allocation3 + $0x6] ss:$8 sm:$0x7]  ;;  %v12878_v11 = vld [vmem:[#allocation3 + $0x7] ss:$8 sm:$0x7]  ;;  %v11111_v0 = vpack.i.bf16 %v12873_v2, %v12871_v61 }
 0x780   :  { %11107 = vrot.lane.b32.xlu1 %v11106_v38, %s12242_s21  ;;  %v12883_v10 = vld [vmem:[#allocation3 + $0x18] ss:$8 sm:$0x7]  ;;  %v12885_v12 = vld [vmem:[#allocation3 + $0x19] ss:$8 sm:$0x7]  ;;  %v11116_v30 = vpack.i.bf16 %v12878_v11, %v12876_v34 }
 0x781   :  { %v12890_v6 = vld [vmem:[#allocation3 + $0x1a] ss:$8 sm:$0x7]  ;;  %v12892_v18 = vld [vmem:[#allocation3 + $0x1b] ss:$8 sm:$0x7]  ;;  %v11121_v44 = vpack.i.bf16 %v12885_v12, %v12883_v10 }
 0x782   :  { %v11126_v60 = vpack.i.bf16 %v12892_v18, %v12890_v6 }
 0x783   :  { %11112 = vrot.lane.b32.xlu0 %v11111_v0, %s12242_s21  ;;  %v12026_v0 = vld [vmem:[#allocation9 + $0x150] sm:$0xff]  }
 0x784   :  { %11117 = vrot.lane.b32.xlu1 %v11116_v30, %s12242_s21 }
 0x787   :  { %11122 = vrot.lane.b32.xlu0 %v11121_v44, %s12242_s21  ;;  %v12030_v44 = vld [vmem:[#allocation9 + $0x290] sm:$0xff]  }
 0x788   :  { %11127 = vrot.lane.b32.xlu1 %v11126_v60, %s12242_s21 }
 0x7f1   :  { %v11103_v3 = vpop.permute.xlu0 %11102 }
 0x7f2   :  { %v11105_v17 = vunpack.i.h.bf16 %v11103_v3  ;;  %v11104_v21 = vunpack.i.l.bf16 %v11103_v3  ;;  %v11108_v22 = vpop.permute.xlu1 %11107 }
 0x7f3   :  { %v11110_v24 = vunpack.i.h.bf16 %v11108_v22  ;;  %v11109_v4 = vunpack.i.l.bf16 %v11108_v22 }
 0x7f4   :  { %v7563_v25 = vrot.slane %v11105_v17, 1  ;;  %v7556_v26 = vrot.slane %v11104_v21, 1 }
 0x7f5   :  { %v7483_v27 = vrot.slane %v11110_v24, 1  ;;  %v7476_v47 = vrot.slane %v11109_v4, 1  ;;  %v11113_v43 = vpop.permute.xlu0 %11112 }
 0x7f6   :  { %v7564_v31 = vsel %vm2835_vm8, %v11105_v17, %v7563_v25  ;;  %v7557_v32 = vsel %vm2835_vm8, %v11104_v21, %v7556_v26  ;;  %v11115_v63 = vunpack.i.h.bf16 %v11113_v43  ;;  %v11114_v62 = vunpack.i.l.bf16 %v11113_v43  ;;  %v11118_v30 = vpop.permute.xlu1 %11117  ;;  %v12037_v43 = vld [vmem:[#allocation9 + $0x10] sm:$0xff]  }
 0x7f7   :  { %v7566_v33 = vmax.f32 %v7552_v59, %v7564_v31  ;;  %v7559_v1 = vmax.f32 %v7551_v58, %v7557_v32  ;;  %v7484_v35 = vsel %vm2835_vm8, %v11110_v24, %v7483_v27  ;;  %v7477_v23 = vsel %vm2835_vm8, %v11109_v4, %v7476_v47  ;;  %v12023_v58 = vld [vmem:[#allocation9 + $0x1f8] sm:$0xff]   ;;  %v12031_v24 = vld [vmem:[#allocation9] sm:$0xff]   ;;  %v12032_v27 = vld [vmem:[#allocation9 + $0x48] sm:$0xff]  }
 0x7f8   :  { %v7486_v36 = vmax.f32 %v7472_v48, %v7484_v35  ;;  %v7479_v39 = vmax.f32 %v7471_v5, %v7477_v23  ;;  %v8073_v19 = vrot.slane %v11115_v63, 1  ;;  %v8066_v52 = vrot.slane %v11114_v62, 1  ;;  %v12024_v5 = vld [vmem:[#allocation9 + $0x148] sm:$0xff]   ;;  %v12025_v48 = vld [vmem:[#allocation9 + $0x200] sm:$0xff]   ;;  %v12033_v47 = vld [vmem:[#allocation9 + $0x298] sm:$0xff]  }
 0x7f9   :  { %v7567_v40 = vmax.f32 %v7559_v1, %v7566_v33  ;;  %v11123_v60 = vpop.permute.xlu0 %11122  ;;  %v11120_v21 = vunpack.i.h.bf16 %v11118_v30  ;;  %v11119_v22 = vunpack.i.l.bf16 %v11118_v30  ;;  %v12034_v1 = vld [vmem:[#allocation9 + $0x8] sm:$0xff]   ;;  %v12054_v30 = vld [vmem:[#allocation9 + $0x38] sm:$0xff]  }
 0x7fa   :  { %v12907_v55 = vmax.f32 %v7479_v39, %v7486_v36  ;;  %v8074_v54 = vsel %vm2835_vm8, %v11115_v63, %v8073_v19  ;;  %v8067_v56 = vsel %vm2835_vm8, %v11114_v62, %v8066_v52  ;;  %v11125_v4 = vunpack.i.h.bf16 %v11123_v60  ;;  %v12035_v36 = vld [vmem:[#allocation9 + $0x50] sm:$0xff]   ;;  %v12036_v39 = vld [vmem:[#allocation9 + $0x2a0] sm:$0xff]  }
 0x7fb   :  { %v7576_v41 = vrot.slane %v7567_v40, %v12372_v16  ;;  %v7572_v49 = vrot.slane %v7567_v40, %v12369_v15  ;;  %v8076_v59 = vmax.f32 %v12873_v2, %v8074_v54  ;;  %v8069_v7 = vmax.f32 %v12871_v61, %v8067_v56  ;;  %v12027_v2 = vld [vmem:[#allocation9 + $0x208] sm:$0xff]   ;;  %v12042_v19 = vld [vmem:[#allocation9 + $0x2b0] sm:$0xff]  }
 0x7fc   :  { %v7500_v42 = vrot.slane %v12907_v55, %v12380_v37  ;;  %v7580_v14 = vrot.slane %v7567_v40, %v12380_v37  ;;  %v7496_v17 = vrot.slane %v12907_v55, %v12372_v16  ;;  %v11124_v25 = vunpack.i.l.bf16 %v11123_v60  ;;  %v12046_v54 = vld [vmem:[#allocation9 + $0x28] sm:$0xff]   ;;  %v12059_v60 = vld [vmem:[#allocation9 + $0x318] sm:$0xff]  }
 0x7fd   :  { %v7585_v45 = vpack.c.bf16 %v7576_v41, %v7576_v41  ;;  %v7584_v50 = vpack.c.bf16 %v7572_v49, %v7572_v49  ;;  %v12928_v38 = vmax.f32 %v8069_v7, %v8076_v59  ;;  %v8369_v32 = vrot.slane %v11120_v21, 1  ;;  %v12051_v7 = vld [vmem:[#allocation9 + $0x308] sm:$0xff]  }
 0x7fe   :  { %v7506_v29 = vpack.c.bf16 %v7500_v42, %v7500_v42  ;;  %v7586_v26 = vpack.c.bf16 %v7580_v14, %v7580_v14  ;;  %v7505_v31 = vpack.c.bf16 %v7496_v17, %v7496_v17  ;;  %v8362_v33 = vrot.slane %v11119_v22, 1  ;;  %v12056_v14 = vld [vmem:[#allocation9 + $0x1a0] sm:$0xff]  }
 0x7ff   :  { %7798 = vmatprep.mubr.bf16.mxu1 %v7585_v45  ;;  %v8090_v61 = vrot.slane %v12928_v38, %v12380_v37  ;;  %v8665_v35 = vrot.slane %v11125_v4, 1  ;;  %v8658_v23 = vrot.slane %v11124_v25, 1  ;;  %v8370_v40 = vsel %vm2835_vm8, %v11120_v21, %v8369_v32  ;;  %v12060_v21 = vld [vmem:[#allocation9 + $0x1a8] sm:$0xff]  }
 0x800   :  { %10898 = vmatmul.mubr.msk.bf16.vlgmr.msra.gmra.mrb[32].mxu0 %vm2835_vm8, %v7506_v29  ;;  %7799 = vmatmul.mubr.bf16.vlgmr.msra.gmra.mrb[96].mxu1 %v7584_v50  ;;  %v8363_v41 = vsel %vm2835_vm8, %v11119_v22, %v8362_v33  ;;  %v12039_v29 = vld [vmem:[#allocation9 + $0x2a8] sm:$0xff]   ;;  %v8372_v63 = vmax.f32 %v12878_v11, %v8370_v40  ;;  %v12040_v50 = vld [vmem:[#allocation9 + $0x18] sm:$0xff]   ;;  %v12071_v33 = vld [vmem:[#allocation9 + $0x330] sm:$0xff]  }
 0x801   :  { %10902 = vmatpush3.bf16.msra.mxu0 %v12017_v46  ;;  %10913 = vmatprep.mubr.msk.bf16.mxu0 %vm12244_vm9, %v12243_v20  ;;  %v8096_v3 = vpack.c.bf16 %v8090_v61, %v8090_v61  ;;  %v8666_v45 = vsel %vm2835_vm8, %v11125_v4, %v8665_v35  ;;  %v8659_v42 = vsel %vm2835_vm8, %v11124_v25, %v8658_v23  ;;  %v12038_v46 = vld [vmem:[#allocation9 + $0x58] sm:$0xff]   ;;  %v12044_v11 = vld [vmem:[#allocation9 + $0x68] sm:$0xff]   ;;  %v12055_v61 = vld [vmem:[#allocation9 + $0x310] sm:$0xff]  }
 0x802   :  { %10903 = vmatprep.subr.bf16.mxu0 %v12243_v20  ;;  %10870 = vmatpush3.bf16.msra.mxu1 %v12018_v28  ;;  %v8365_v62 = vmax.f32 %v12876_v34, %v8363_v41  ;;  %v8668_v49 = vmax.f32 %v12885_v12, %v8666_v45  ;;  %v8661_v28 = vmax.f32 %v12883_v10, %v8659_v42  ;;  %v12043_v34 = vld [vmem:[#allocation9 + $0x20] sm:$0xff]   ;;  %v12045_v12 = vld [vmem:[#allocation9 + $0x2b8] sm:$0xff]   ;;  %v12064_v25 = vld [vmem:[#allocation9 + $0x1b0] sm:$0xff]   ;;  %v11128_v45 = vpop.permute.xlu1 %11127 }
 0x803   :  { %10881 = vmatprep.mubr.msk.bf16.mxu1 %vm12244_vm9, %v12243_v20  ;;  %10871 = vmatprep.subr.bf16.mxu1 %v12243_v20  ;;  %v12061_v22 = vld [vmem:[#allocation9 + $0x2d8] sm:$0xff]   ;;  %v12063_v4 = vld [vmem:[#allocation9 + $0x320] sm:$0xff]   ;;  %v12069_v32 = vld [vmem:[#allocation9 + $0x2e8] sm:$0xff]  }
 0x804   :  { %v12955_v52 = vmax.f32 %v8365_v62, %v8372_v63  ;;  %v12072_v35 = vld [vmem:[#allocation9 + $0x1c0] sm:$0xff]   ;;  %v12073_v23 = vld [vmem:[#allocation9 + $0x2f0] sm:$0xff]   ;;  %v12076_v40 = vld [vmem:[#allocation9 + $0x1c8] sm:$0xff]   ;;  %v11130_v62 = vunpack.i.h.bf16 %v11128_v45 }
 0x805   :  { %10904 = vmatpush3.bf16.msra.mxu0 %v12019_v51  ;;  %v12041_v51 = vld [vmem:[#allocation9 + $0x60] sm:$0xff]   ;;  %v12077_v41 = vld [vmem:[#allocation9 + $0x2f8] sm:$0xff]   ;;  %v12078_v42 = vld [vmem:[#allocation9 + $0x188] sm:$0xff]  }
 0x806   :  { %10905 = vmatprep.subr.bf16.mxu0 %v12243_v20  ;;  %10872 = vmatpush3.bf16.msra.mxu1 %v12020_v8  ;;  %v12958_v8 = vmax.f32 %v8661_v28, %v8668_v49  ;;  %v8386_v10 = vrot.slane %v12955_v52, %v12380_v37  ;;  %v11129_v49 = vunpack.i.l.bf16 %v11128_v45  ;;  %v12081_v28 = vld [vmem:[#allocation9 + $0x190] sm:$0xff]   ;;  %v12114_v45 = vld [vmem:[#allocation9 + $0x378] sm:$0xff]  }
 0x807   :  { %10873 = vmatprep.subr.bf16.mxu1 %v12243_v20 }
 0x808   :  { %v8678_v56 = vrot.slane %v12958_v8, %v12372_v16  ;;  %v8392_v59 = vpack.c.bf16 %v8386_v10, %v8386_v10  ;;  %v12085_v10 = vld [vmem:[#allocation9 + $0x250] sm:$0xff]  }
 0x809   :  { %10906 = vmatpush3.bf16.msra.mxu0 %v12021_v53  ;;  %v12047_v53 = vld [vmem:[#allocation9 + $0x300] sm:$0xff]  }
 0x80a   :  { %10907 = vmatprep.subr.bf16.mxu0 %v12243_v20  ;;  %10874 = vmatpush3.bf16.msra.mxu1 %v12022_v57  ;;  %v12048_v57 = vld [vmem:[#allocation9 + $0x70] sm:$0xff]  }
 0x80b   :  { %10875 = vmatprep.subr.bf16.mxu1 %v12243_v20 }
 0x80d   :  { %10908 = vmatpush3.bf16.msra.mxu0 %v12023_v58  ;;  %v12049_v58 = vld [vmem:[#allocation9 + $0x2c0] sm:$0xff]  }
 0x80e   :  { %10909 = vmatprep.subr.bf16.mxu0 %v12243_v20  ;;  %10876 = vmatpush3.bf16.msra.mxu1 %v12024_v5  ;;  %v8687_v5 = vpack.c.bf16 %v8678_v56, %v8678_v56 }
 0x80f   :  { %10877 = vmatprep.subr.bf16.mxu1 %v12243_v20 }
 0x811   :  { %10910 = vmatpush3.bf16.msra.mxu0 %v12025_v48  ;;  %v12050_v48 = vld [vmem:[#allocation9 + $0x30] sm:$0xff]  }
 0x812   :  { %10911 = vmatprep.subr.bf16.mxu0 %v12243_v20  ;;  %10878 = vmatpush3.bf16.msra.mxu1 %v12026_v0  ;;  %v12052_v0 = vld [vmem:[#allocation9 + $0x78] sm:$0xff]  }
 0x813   :  { %10879 = vmatprep.subr.bf16.mxu1 %v12243_v20 }
 0x815   :  { %10912 = vmatpush3.bf16.msra.mxu0 %v12027_v2  ;;  %v12053_v2 = vld [vmem:[#allocation9 + $0x2c8] sm:$0xff]  }
 0x816   :  { %10917 = vmatprep.subr.bf16.mxu0 %v12243_v20  ;;  %10880 = vmatpush3.bf16.msra.mxu1 %v12028_v13  ;;  %v7492_v13 = vrot.slane %v12907_v55, %v12369_v15  ;;  %v12062_v55 = vld [vmem:[#allocation9 + $0x168] sm:$0xff]  }
 0x817   :  { %10599 = vmatprep.subr.bf16.mxu1 %v12029_v9  ;;  %v12057_v9 = vld [vmem:[#allocation9 + $0x2d0] sm:$0xff]  }
 0x818   :  { %10914 = vmatmul.mubr.msk.bf16.vlgmr.msra.gmra.mrb[36].mxu0 %vm2835_vm8, %v8096_v3  ;;  %v12058_v3 = vld [vmem:[#allocation9 + $0x160] sm:$0xff]   ;;  %v7504_v17 = vpack.c.bf16 %v7492_v13, %v7492_v13 }
 0x819   :  { %10918 = vmatpush3.bf16.msra.mxu0 %v12030_v44  ;;  %10929 = vmatprep.mubr.msk.bf16.mxu0 %vm12244_vm9, %v12243_v20  ;;  %v8086_v44 = vrot.slane %v12928_v38, %v12372_v16 }
 0x81a   :  { %10919 = vmatprep.subr.bf16.mxu0 %v12243_v20  ;;  %10882 = vmatmul.mubr.msk.bf16.vlgmr.msra.gmra.mrb[100].mxu1 %vm2835_vm8, %v7586_v26  ;;  %v12065_v26 = vld [vmem:[#allocation9 + $0x2e0] sm:$0xff]  }
 0x81b   :  { %10600 = vmatpush3.bf16.msra.mxu1 %v12031_v24  ;;  %8013 = vmatprep.mubr.bf16.mxu1 %v7505_v31  ;;  %v8095_v24 = vpack.c.bf16 %v8086_v44, %v8086_v44  ;;  %v12068_v31 = vld [vmem:[#allocation9 + $0x1b8] sm:$0xff]   ;;  %v12096_v44 = vld [vmem:[#allocation9 + $0x228] sm:$0xff]  }
 0x81c   :  { %10601 = vmatprep.subr.bf16.mxu1 %v12032_v27  ;;  %v12067_v27 = vld [vmem:[#allocation9 + $0x328] sm:$0xff]  }
 0x81d   :  { %10920 = vmatpush3.bf16.msra.mxu0 %v12033_v47  ;;  %v12066_v47 = vld [vmem:[#allocation9 + $0x170] sm:$0xff]  }
 0x81e   :  { %10921 = vmatprep.subr.bf16.mxu0 %v12243_v20 }
 0x81f   :  { %10602 = vmatpush3.bf16.msra.mxu1 %v12034_v1  ;;  %v12070_v1 = vld [vmem:[#allocation9 + $0x178] sm:$0xff]  }
 0x820   :  { %10603 = vmatprep.subr.bf16.mxu1 %v12035_v36  ;;  %v12075_v36 = vld [vmem:[#allocation9 + $0x338] sm:$0xff]  }
 0x821   :  { %10922 = vmatpush3.bf16.msra.mxu0 %v12036_v39  ;;  %v12074_v39 = vld [vmem:[#allocation9 + $0x180] sm:$0xff]  }
 0x822   :  { %10923 = vmatprep.subr.bf16.mxu0 %v12243_v20 }
 0x823   :  { %10604 = vmatpush3.bf16.msra.mxu1 %v12037_v43  ;;  %v8674_v43 = vrot.slane %v12958_v8, %v12369_v15 }
 0x824   :  { %10605 = vmatprep.subr.bf16.mxu1 %v12038_v46  ;;  %v12079_v46 = vld [vmem:[#allocation9 + $0x1d0] sm:$0xff]  }
 0x825   :  { %10924 = vmatpush3.bf16.msra.mxu0 %v12039_v29  ;;  %v12080_v29 = vld [vmem:[#allocation9 + $0x3f0] sm:$0xff]   ;;  %v8686_v63 = vpack.c.bf16 %v8674_v43, %v8674_v43 }
 0x826   :  { %10925 = vmatprep.subr.bf16.mxu0 %v12243_v20 }
 0x827   :  { %10606 = vmatpush3.bf16.msra.mxu1 %v12040_v50  ;;  %v12082_v50 = vld [vmem:[#allocation9 + $0x1d8] sm:$0xff]  }
 0x828   :  { %10607 = vmatprep.subr.bf16.mxu1 %v12041_v51  ;;  %v12083_v51 = vld [vmem:[#allocation9 + $0x3f8] sm:$0xff]  }
 0x829   :  { %10926 = vmatpush3.bf16.msra.mxu0 %v12042_v19  ;;  %v8961_v19 = vrot.slane %v11130_v62, 1 }
 0x82a   :  { %10927 = vmatprep.subr.bf16.mxu0 %v12243_v20 }
 0x82b   :  { %10608 = vmatpush3.bf16.msra.mxu1 %v12043_v34  ;;  %v8954_v34 = vrot.slane %v11129_v49, 1  ;;  %v8962_v56 = vsel %vm2835_vm8, %v11130_v62, %v8961_v19  ;;  %v12122_v62 = vld [vmem:[#allocation9 + $0x398] sm:$0xff]  }
 0x82c   :  { %10609 = vmatprep.subr.bf16.mxu1 %v12044_v11  ;;  %v12084_v11 = vld [vmem:[#allocation9 + $0x198] sm:$0xff]  }
 0x82d   :  { %10928 = vmatpush3.bf16.msra.mxu0 %v12045_v12  ;;  %v8082_v12 = vrot.slane %v12928_v38, %v12369_v15  ;;  %v8964_v38 = vmax.f32 %v12892_v18, %v8962_v56  ;;  %v12095_v18 = vld [vmem:[#allocation9 + $0x418] sm:$0xff]  }
 0x82e   :  { %10686 = vmatprep.subr.bf16.mxu0 %v12047_v53  ;;  %v12086_v53 = vld [vmem:[#allocation9 + $0x400] sm:$0xff]  }
 0x82f   :  { %10610 = vmatpush3.bf16.msra.mxu1 %v12046_v54  ;;  %v8382_v54 = vrot.slane %v12955_v52, %v12372_v16 }
 0x830   :  { %10930 = vmatmul.mubr.msk.bf16.vlgmr.msra.gmra.mrb[40].mxu0 %vm2835_vm8, %v8392_v59  ;;  %10611 = vmatprep.subr.bf16.mxu1 %v12048_v57  ;;  %v8955_v57 = vsel %vm2835_vm8, %v11129_v49, %v8954_v34  ;;  %v8094_v59 = vpack.c.bf16 %v8082_v12, %v8082_v12  ;;  %v12123_v49 = vld [vmem:[#allocation9 + $0x3e0] sm:$0xff]  }
 0x831   :  { %10687 = vmatpush3.bf16.msra.mxu0 %v12049_v58  ;;  %8900 = vmatprep.mubr.bf16.mxu0 %v8687_v5  ;;  %v12087_v58 = vld [vmem:[#allocation9 + $0x210] sm:$0xff]   ;;  %v12089_v5 = vld [vmem:[#allocation9 + $0x408] sm:$0xff]  }
 0x832   :  { %10688 = vmatprep.subr.bf16.mxu0 %v12051_v7  ;;  %v12088_v7 = vld [vmem:[#allocation9 + $0x258] sm:$0xff]  }
 0x833   :  { %10612 = vmatpush3.bf16.msra.mxu1 %v12050_v48  ;;  %v8957_v48 = vmax.f32 %v12890_v6, %v8955_v57  ;;  %v12094_v6 = vld [vmem:[#allocation9 + $0x268] sm:$0xff]  }
 0x834   :  { %10613 = vmatprep.subr.bf16.mxu1 %v12052_v0  ;;  %v8391_v0 = vpack.c.bf16 %v8382_v54, %v8382_v54 }
 0x835   :  { %10689 = vmatpush3.bf16.msra.mxu0 %v12053_v2  ;;  %v12090_v2 = vld [vmem:[#allocation9 + $0x218] sm:$0xff]   ;;  %v12986_v13 = vmax.f32 %v8957_v48, %v8964_v38 }
 0x836   :  { %10690 = vmatprep.subr.bf16.mxu0 %v12055_v61  ;;  %v12091_v61 = vld [vmem:[#allocation9 + $0x260] sm:$0xff]  }
 0x837   :  { %10614 = vmatpush3.bf16.msra.mxu1 %v12054_v30  ;;  %v12092_v30 = vld [vmem:[#allocation9 + $0x410] sm:$0xff]   ;;  %v8970_v19 = vrot.slane %v12986_v13, %v12369_v15 }
 0x838   :  { %10628 = vmatprep.subr.bf16.mxu1 %v12056_v14  ;;  %v12093_v14 = vld [vmem:[#allocation9 + $0x220] sm:$0xff]  }
 0x839   :  { %10691 = vmatpush3.bf16.msra.mxu0 %v12057_v9  ;;  %v8978_v9 = vrot.slane %v12986_v13, %v12380_v37  ;;  %v8982_v34 = vpack.c.bf16 %v8970_v19, %v8970_v19 }
 0x83a   :  { %10692 = vmatprep.subr.bf16.mxu0 %v12059_v60  ;;  %8014 = vmatmul.mubr.bf16.vlgmr.msra.gmra.mrb[104].mxu1 %v7504_v17  ;;  %v12097_v60 = vld [vmem:[#allocation9 + $0x270] sm:$0xff]  }
 0x83b   :  { %10629 = vmatpush3.bf16.msra.mxu1 %v12058_v3  ;;  %8308 = vmatprep.mubr.bf16.mxu1 %v8095_v24  ;;  %v8984_v3 = vpack.c.bf16 %v8978_v9, %v8978_v9  ;;  %v12098_v17 = vld [vmem:[#allocation9 + $0x230] sm:$0xff]   ;;  %v12101_v24 = vld [vmem:[#allocation9 + $0x280] sm:$0xff]  }
 0x83c   :  { %10630 = vmatprep.subr.bf16.mxu1 %v12060_v21  ;;  %v12099_v21 = vld [vmem:[#allocation9 + $0x278] sm:$0xff]   ;;  %v12131_v9 = vld [vmem:[%s13070_s7 + $0x20] sm:$0xff]  }
 0x83d   :  { %10693 = vmatpush3.bf16.msra.mxu0 %v12061_v22  ;;  %v12100_v22 = vld [vmem:[#allocation9 + $0x238] sm:$0xff]  }
 0x83e   :  { %10694 = vmatprep.subr.bf16.mxu0 %v12063_v4  ;;  %v12102_v4 = vld [vmem:[#allocation9 + $0x240] sm:$0xff]  }
 0x83f   :  { %10631 = vmatpush3.bf16.msra.mxu1 %v12062_v55  ;;  %v12103_v55 = vld [vmem:[#allocation9 + $0x288] sm:$0xff]  }
 0x840   :  { %10632 = vmatprep.subr.bf16.mxu1 %v12064_v25  ;;  %v12104_v25 = vld [vmem:[#allocation9 + $0x248] sm:$0xff]  }
 0x841   :  { %10695 = vmatpush3.bf16.msra.mxu0 %v12065_v26  ;;  %v8378_v26 = vrot.slane %v12955_v52, %v12369_v15  ;;  %v12109_v52 = vld [vmem:[#allocation9 + $0x360] sm:$0xff]   ;;  %v12128_v15 = vld [vmem:[%s13070_s7 + $0x8] sm:$0xff]  }
 0x842   :  { %10696 = vmatprep.subr.bf16.mxu0 %v12067_v27  ;;  %v12105_v27 = vld [vmem:[#allocation9 + $0x340] sm:$0xff]  }
 0x843   :  { %10633 = vmatpush3.bf16.msra.mxu1 %v12066_v47  ;;  %v8390_v47 = vpack.c.bf16 %v8378_v26, %v8378_v26  ;;  %v12134_v26 = vld [vmem:[%s13070_s7 + $0x38] sm:$0xff]  }
 0x844   :  { %10634 = vmatprep.subr.bf16.mxu1 %v12068_v31  ;;  %v12106_v31 = vld [vmem:[#allocation9 + $0x348] sm:$0xff]  }
 0x845   :  { %10697 = vmatpush3.bf16.msra.mxu0 %v12069_v32  ;;  %v12107_v32 = vld [vmem:[#allocation9 + $0x350] sm:$0xff]  }
 0x846   :  { %10698 = vmatprep.subr.bf16.mxu0 %v12071_v33  ;;  %v12108_v33 = vld [vmem:[#allocation9 + $0x358] sm:$0xff]  }
 0x847   :  { %10635 = vmatpush3.bf16.msra.mxu1 %v12070_v1  ;;  %v12110_v1 = vld [vmem:[#allocation9 + $0x368] sm:$0xff]  }
 0x848   :  { %10636 = vmatprep.subr.bf16.mxu1 %v12072_v35  ;;  %v8682_v35 = vrot.slane %v12958_v8, %v12380_v37  ;;  %v12117_v37 = vld [vmem:[#allocation9 + $0x3c8] sm:$0xff]  }
 0x849   :  { %10699 = vmatpush3.bf16.msra.mxu0 %v12073_v23  ;;  %v12111_v23 = vld [vmem:[#allocation9 + $0x3b0] sm:$0xff]   ;;  %v12118_v8 = vld [vmem:[#allocation9 + $0x388] sm:$0xff]  }
 0x84a   :  { %10700 = vmatprep.subr.bf16.mxu0 %v12075_v36  ;;  %v8974_v36 = vrot.slane %v12986_v13, %v12372_v16  ;;  %v12119_v16 = vld [vmem:[#allocation9 + $0x3d0] sm:$0xff]   ;;  %v12129_v13 = vld [vmem:[%s13070_s7 + $0x10] sm:$0xff]  }
 0x84b   :  { %10637 = vmatpush3.bf16.msra.mxu1 %v12074_v39  ;;  %v12112_v39 = vld [vmem:[#allocation9 + $0x370] sm:$0xff]  }
 0x84c   :  { %10638 = vmatprep.subr.bf16.mxu1 %v12076_v40  ;;  %v8688_v40 = vpack.c.bf16 %v8682_v35, %v8682_v35  ;;  %v8983_v43 = vpack.c.bf16 %v8974_v36, %v8974_v36 }
 0x84d   :  { %10701 = vmatpush3.bf16.msra.mxu0 %v12077_v41  ;;  %v12113_v41 = vld [vmem:[#allocation9 + $0x3b8] sm:$0xff]  }
 0x84e   :  { %10949 = vmatprep.subr.bf16.mxu0 %v12243_v20 }
 0x84f   :  { %10639 = vmatpush3.bf16.msra.mxu1 %v12078_v42  ;;  %v12115_v42 = vld [vmem:[#allocation9 + $0x3c0] sm:$0xff]  }
 0x850   :  { %8901 = vmatmul.mubr.bf16.vlgmr.msra.gmra.mrb[44].mxu0 %v8686_v63  ;;  %10640 = vmatprep.subr.bf16.mxu1 %v12079_v46  ;;  %v12116_v46 = vld [vmem:[#allocation9 + $0x380] sm:$0xff]   ;;  %v12121_v63 = vld [vmem:[#allocation9 + $0x3d8] sm:$0xff]  }
 0x851   :  { %10950 = vmatpush3.bf16.msra.mxu0 %v12080_v29  ;;  %10961 = vmatprep.mubr.msk.bf16.mxu0 %vm12244_vm9, %v12243_v20  ;;  %v12120_v29 = vld [vmem:[#allocation9 + $0x390] sm:$0xff]  }
 0x852   :  { %10951 = vmatprep.subr.bf16.mxu0 %v12243_v20 }
 0x853   :  { %10641 = vmatpush3.bf16.msra.mxu1 %v12081_v28  ;;  %v12124_v28 = vld [vmem:[#allocation9 + $0x3a0] sm:$0xff]  }
 0x854   :  { %10642 = vmatprep.subr.bf16.mxu1 %v12082_v50  ;;  %v12125_v50 = vld [vmem:[#allocation9 + $0x3e8] sm:$0xff]  }
 0x855   :  { %10952 = vmatpush3.bf16.msra.mxu0 %v12083_v51  ;;  %v12126_v51 = vld [vmem:[#allocation9 + $0x3a8] sm:$0xff]  }
 0x856   :  { %10953 = vmatprep.subr.bf16.mxu0 %v12243_v20 }
 0x857   :  { %10643 = vmatpush3.bf16.msra.mxu1 %v12084_v11 }
 0x858   :  { %10657 = vmatprep.subr.bf16.mxu1 %v12085_v10 }
 0x859   :  { %10954 = vmatpush3.bf16.msra.mxu0 %v12086_v53 }
 0x85a   :  { %10955 = vmatprep.subr.bf16.mxu0 %v12243_v20  ;;  %8309 = vmatmul.mubr.bf16.vlgmr.msra.gmra.mrb[108].mxu1 %v8094_v59 }
 0x85b   :  { %10658 = vmatpush3.bf16.msra.mxu1 %v12087_v58  ;;  %8604 = vmatprep.mubr.bf16.mxu1 %v8391_v0 }
 0x85c   :  { %10659 = vmatprep.subr.bf16.mxu1 %v12088_v7  ;;  %v12127_v7 = vld [vmem:[%s13070_s7] sm:$0xff]  }
 0x85d   :  { %10956 = vmatpush3.bf16.msra.mxu0 %v12089_v5 }
 0x85e   :  { %10957 = vmatprep.subr.bf16.mxu0 %v12243_v20 }
 0x85f   :  { %10660 = vmatpush3.bf16.msra.mxu1 %v12090_v2 }
 0x860   :  { %10661 = vmatprep.subr.bf16.mxu1 %v12091_v61 }
 0x861   :  { %10958 = vmatpush3.bf16.msra.mxu0 %v12092_v30 }
 0x862   :  { %10959 = vmatprep.subr.bf16.mxu0 %v12243_v20 }
 0x863   :  { %10662 = vmatpush3.bf16.msra.mxu1 %v12093_v14 }
 0x864   :  { %10663 = vmatprep.subr.bf16.mxu1 %v12094_v6 }
 0x865   :  { %10960 = vmatpush3.bf16.msra.mxu0 %v12095_v18  ;;  %v12130_v18 = vld [vmem:[%s13070_s7 + $0x18] sm:$0xff]  }
 0x866   :  { %10965 = vmatprep.subr.bf16.mxu0 %v12243_v20 }
 0x867   :  { %10664 = vmatpush3.bf16.msra.mxu1 %v12096_v44 }
 0x868   :  { %10962 = vmatmul.mubr.msk.bf16.vlgmr.msra.gmra.mrb[48].mxu0 %vm2835_vm8, %v8984_v3  ;;  %10665 = vmatprep.subr.bf16.mxu1 %v12097_v60 }
 0x869   :  { %10981 = vmatprep.mubr.msk.bf16.mxu0 %vm12244_vm9, %v12243_v20  ;;  %10966 = vmatpush3.bf16.msra.mxu0 %v12127_v7 }
 0x86a   :  { %10967 = vmatprep.subr.bf16.mxu0 %v12243_v20 }
 0x86b   :  { %10666 = vmatpush3.bf16.msra.mxu1 %v12098_v17 }
 0x86c   :  { %10667 = vmatprep.subr.bf16.mxu1 %v12099_v21  ;;  %v12132_v21 = vld [vmem:[%s13070_s7 + $0x28] sm:$0xff]  }
 0x86d   :  { %10968 = vmatpush3.bf16.msra.mxu0 %v12128_v15 }
 0x86e   :  { %10969 = vmatprep.subr.bf16.mxu0 %v12243_v20 }
 0x86f   :  { %10668 = vmatpush3.bf16.msra.mxu1 %v12100_v22  ;;  %v12133_v22 = vld [vmem:[%s13070_s7 + $0x30] sm:$0xff]  }
 0x870   :  { %10669 = vmatprep.subr.bf16.mxu1 %v12101_v24 }
 0x871   :  { %10970 = vmatpush3.bf16.msra.mxu0 %v12129_v13 }
 0x872   :  { %10971 = vmatprep.subr.bf16.mxu0 %v12243_v20 }
 0x873   :  { %10670 = vmatpush3.bf16.msra.mxu1 %v12102_v4 }
 0x874   :  { %10671 = vmatprep.subr.bf16.mxu1 %v12103_v55 }
 0x875   :  { %10972 = vmatpush3.bf16.msra.mxu0 %v12130_v18 }
 0x876   :  { %10973 = vmatprep.subr.bf16.mxu0 %v12243_v20 }
 0x877   :  { %10672 = vmatpush3.bf16.msra.mxu1 %v12104_v25 }
 0x878   :  { %10933 = vmatprep.subr.bf16.mxu1 %v12243_v20 }
 0x879   :  { %10974 = vmatpush3.bf16.msra.mxu0 %v12131_v9 }
 0x87a   :  { %8605 = vmatmul.mubr.bf16.vlgmr.msra.gmra.mrb[112].mxu1 %v8390_v47  ;;  %10975 = vmatprep.subr.bf16.mxu0 %v12243_v20 }
 0x87b   :  { %10934 = vmatpush3.bf16.msra.mxu1 %v12105_v27  ;;  %10945 = vmatprep.mubr.msk.bf16.mxu1 %vm12244_vm9, %v12243_v20 }
 0x87c   :  { %10935 = vmatprep.subr.bf16.mxu1 %v12243_v20 }
 0x87d   :  { %10976 = vmatpush3.bf16.msra.mxu0 %v12132_v21 }
 0x87e   :  { %10977 = vmatprep.subr.bf16.mxu0 %v12243_v20 }
 0x87f   :  { %10936 = vmatpush3.bf16.msra.mxu1 %v12106_v31 }
 0x880   :  { %10937 = vmatprep.subr.bf16.mxu1 %v12243_v20 }
 0x881   :  { %10978 = vmatpush3.bf16.msra.mxu0 %v12133_v22 }
 0x882   :  { %10979 = vmatprep.subr.bf16.mxu0 %v12243_v20 }
 0x883   :  { %10938 = vmatpush3.bf16.msra.mxu1 %v12107_v32 }
 0x884   :  { %10939 = vmatprep.subr.bf16.mxu1 %v12243_v20 }
 0x885   :  { %10980 = vmatpush3.bf16.msra.mxu0 %v12134_v26 }
 0x887   :  { %10940 = vmatpush3.bf16.msra.mxu1 %v12108_v33 }
 0x888   :  { %10941 = vmatprep.subr.bf16.mxu1 %v12243_v20 }
 0x88b   :  { %10942 = vmatpush3.bf16.msra.mxu1 %v12109_v52 }
 0x88c   :  { %10943 = vmatprep.subr.bf16.mxu1 %v12243_v20 }
 0x88f   :  { %10944 = vmatpush3.bf16.msra.mxu1 %v12110_v1 }
 0x890   :  { %10715 = vmatprep.subr.bf16.mxu1 %v12111_v23 }
 0x892   :  { %10946 = vmatmul.mubr.msk.bf16.vlgmr.msra.gmra.mrb[116].mxu1 %vm2835_vm8, %v8688_v40 }
 0x893   :  { %10716 = vmatpush3.bf16.msra.mxu1 %v12112_v39  ;;  %9196 = vmatprep.mubr.bf16.mxu1 %v8983_v43 }
 0x894   :  { %10717 = vmatprep.subr.bf16.mxu1 %v12113_v41 }
 0x897   :  { %10718 = vmatpush3.bf16.msra.mxu1 %v12114_v45 }
 0x898   :  { %10719 = vmatprep.subr.bf16.mxu1 %v12115_v42 }
 0x89b   :  { %10720 = vmatpush3.bf16.msra.mxu1 %v12116_v46 }
 0x89c   :  { %10721 = vmatprep.subr.bf16.mxu1 %v12117_v37 }
 0x89f   :  { %10722 = vmatpush3.bf16.msra.mxu1 %v12118_v8 }
 0x8a0   :  { %10723 = vmatprep.subr.bf16.mxu1 %v12119_v16 }
 0x8a3   :  { %10724 = vmatpush3.bf16.msra.mxu1 %v12120_v29 }
 0x8a4   :  { %10725 = vmatprep.subr.bf16.mxu1 %v12121_v63 }
 0x8a7   :  { %10726 = vmatpush3.bf16.msra.mxu1 %v12122_v62 }
 0x8a8   :  { %10727 = vmatprep.subr.bf16.mxu1 %v12123_v49 }
 0x8ab   :  { %10728 = vmatpush3.bf16.msra.mxu1 %v12124_v28 }
 0x8ac   :  { %10729 = vmatprep.subr.bf16.mxu1 %v12125_v50 }
 0x8af   :  { %10730 = vmatpush3.bf16.msra.mxu1 %v12126_v51 }
 0x8b2   :  { %9197 = vmatmul.mubr.bf16.vlgmr.msra.gmra.mrb[120].mxu1 %v8982_v34 }
 0x8d3   :  { %v8055_v11 = vpop.f32.mrb[32].mxu0  ;;  %v10586_v53 = vpop.f32.mrb[96].mxu1 }
 0x8d4   :  { %v10899_v12 = vpop.f32.mrb[33].mxu0  ;;  %v10587_v56 = vpop.f32.mrb[97].mxu1 }
 0x8d5   :  { %v8058_v10 = vpop.f32.mrb[34].mxu0  ;;  %v10588_v57 = vadd.f32 %v10587_v56, %v10586_v53  ;;  %v10589_v58 = vpop.f32.mrb[98].mxu1 }
 0x8d6   :  { %v10900_v54 = vpop.f32.mrb[35].mxu0  ;;  %v10590_v59 = vpop.f32.mrb[99].mxu1 }
 0x8d7   :  { %v9245_v59 = vld [vmem:[%s13069_s6] sm:$0x1]  ;;  %s12204_s6 = scalar_lea.vmem %s9362_s26, 32 }
 0x8d8   :  { %p12205_p10 = scmp.ne.s32.totalorder %s9362_s26, %s12204_s6  ;;  %p12210_p12 = scmp.lt.s32.totalorder %s12204_s6, %s12204_s6 }
 0x8da   :  { %p12211_p13 = por %p12210_p12, %p12209_p11 }
 0x8dc   :  { %p12212_p0 = pnand %p12211_p13, %p12205_p10 }
 0x8eb   :  { %v8350_v5 = vpop.f32.mrb[36].mxu0 }
 0x8ec   :  { %v10915_v38 = vpop.f32.mrb[37].mxu0 }
 0x8ed   :  { %v8353_v48 = vpop.f32.mrb[38].mxu0  ;;  %v7840_v0 = vpop.f32.mrb[100].mxu1 }
 0x8ee   :  { %v10916_v2 = vpop.f32.mrb[39].mxu0  ;;  %v7841_v61 = vadd.f32 %v10588_v57, %v7840_v0  ;;  %v10883_v30 = vpop.f32.mrb[101].mxu1  ;;  %v9265_v48 = vld [vmem:[%s13071_s8] sm:$0x1] }
 0x8ef   :  { %v7843_v14 = vpop.f32.mrb[102].mxu1 }
 0x8f0   :  { %v10884_v6 = vpop.f32.mrb[103].mxu1 }
 0x903   :  { %v8646_v44 = vpop.f32.mrb[40].mxu0 }
 0x904   :  { %v10931_v60 = vpop.f32.mrb[41].mxu0 }
 0x905   :  { %v8649_v3 = vpop.f32.mrb[42].mxu0 }
 0x906   :  { %v10932_v17 = vpop.f32.mrb[43].mxu0 }
 0x90d   :  { %v10615_v24 = vpop.f32.mrb[104].mxu1 }
 0x90e   :  { %v10616_v4 = vpop.f32.mrb[105].mxu1 }
 0x90f   :  { %v10617_v55 = vadd.f32 %v10616_v4, %v10615_v24  ;;  %v10618_v25 = vpop.f32.mrb[106].mxu1 }
 0x910   :  { %v10619_v27 = vpop.f32.mrb[107].mxu1 }
 0x911   :  { %v8016_v47 = vadd.f32 %v10617_v55, %v7841_v61 }
 0x913   :  { %v8056_v31 = vadd.f32 %v8055_v11, %v8016_v47 }
 0x923   :  { %v10702_v32 = vpop.f32.mrb[44].mxu0 }
 0x924   :  { %v10703_v33 = vpop.f32.mrb[45].mxu0 }
 0x925   :  { %v10704_v52 = vadd.f32 %v10703_v33, %v10702_v32  ;;  %v10705_v1 = vpop.f32.mrb[46].mxu0 }
 0x926   :  { %v10706_v35 = vpop.f32.mrb[47].mxu0 }
 0x92d   :  { %v10644_v23 = vpop.f32.mrb[108].mxu1 }
 0x92e   :  { %v10645_v36 = vpop.f32.mrb[109].mxu1 }
 0x92f   :  { %v10646_v39 = vadd.f32 %v10645_v36, %v10644_v23  ;;  %v10647_v40 = vpop.f32.mrb[110].mxu1 }
 0x930   :  { %v10648_v20 = vpop.f32.mrb[111].mxu1 }
 0x931   :  { %v8351_v41 = vadd.f32 %v10646_v39, %v8350_v5 }
 0x933   :  { %v8356_v43 = vadd.f32 %v8351_v41, %v8056_v31 }
 0x93b   :  { %v9238_v45 = vpop.f32.mrb[48].mxu0 }
 0x93c   :  { %v10963_v42 = vpop.f32.mrb[49].mxu0 }
 0x93d   :  { %v9241_v46 = vpop.f32.mrb[50].mxu0 }
 0x93e   :  { %v10964_v37 = vpop.f32.mrb[51].mxu0 }
 0x94d   :  { %v10673_v8 = vpop.f32.mrb[112].mxu1 }
 0x94e   :  { %v10674_v16 = vpop.f32.mrb[113].mxu1 }
 0x94f   :  { %v10675_v29 = vadd.f32 %v10674_v16, %v10673_v8  ;;  %v10676_v63 = vpop.f32.mrb[114].mxu1 }
 0x950   :  { %v10677_v62 = vpop.f32.mrb[115].mxu1 }
 0x951   :  { %v8647_v49 = vadd.f32 %v10675_v29, %v8646_v44 }
 0x953   :  { %v8652_v28 = vadd.f32 %v8647_v49, %v8356_v43 }
 0x965   :  { %v8942_v50 = vpop.f32.mrb[116].mxu1 }
 0x966   :  { %v8943_v51 = vadd.f32 %v10704_v52, %v8942_v50  ;;  %v10947_v19 = vpop.f32.mrb[117].mxu1 }
 0x967   :  { %v8945_v34 = vpop.f32.mrb[118].mxu1 }
 0x968   :  { %v8948_v11 = vadd.f32 %v8943_v51, %v8652_v28  ;;  %v10948_v12 = vpop.f32.mrb[119].mxu1 }
 0x985   :  { %v10731_v10 = vpop.f32.mrb[120].mxu1 }
 0x986   :  { %v10732_v53 = vpop.f32.mrb[121].mxu1 }
 0x987   :  { %v10733_v54 = vadd.f32 %v10732_v53, %v10731_v10  ;;  %v10734_v56 = vpop.f32.mrb[122].mxu1 }
 0x988   :  { %v10735_v57 = vpop.f32.mrb[123].mxu1 }
 0x989   :  { %v9239_v58 = vadd.f32 %v10733_v54, %v9238_v45 }
 0x98b   :  { %v9244_v7 = vadd.f32 %v9239_v58, %v8948_v11 }
 0x98d   :  { %v9246_v5 = vadd.f32 %v9245_v59, %v9244_v7 }
 0x98f   :  { %v9247_v15 = vmax.f32 %v9246_v5, 0.0 }
 0x991   :  { %v9248_v38 = vpack.c.bf16 %v9247_v15, %v9247_v15 }
 0x993   :  { %10982 = vmatmul.mubr.bf16.vlgmr.msra.gmra.mrb[52].mxu0 %v9248_v38 }
 0xa66   :  { %v9348_v0 = vpop.f32.mrb[52].mxu0 }
 0xa67   :  { %v9349_v2 = vadd.f32 %v9348_v0, %v9265_v48  ;;  %v10983_v61 = vpop.f32.mrb[53].mxu0 }
 0xa68   :  { %v9351_v30 = vpop.f32.mrb[54].mxu0 }
 0xa69   :  { %v10984_v13 = vpop.f32.mrb[55].mxu0  ;;  %9354 = vst.msk [vmem:[#allocation10 + $0x1] sm:$0x1] %vm4728_vm10, %v9349_v2 }
 0xa6a   :  { %12215 = shalt.err (!%p12212_p0)
}
 0xa6b   :  { %s12216_s8 = scalar_lea.hbm %s13072_s9, 32 }
 0xa6c   :  { %p12217_p1 = scmp.ne.s32.totalorder %s13072_s9, %s12216_s8  ;;  %p12220_p2 = scmp.lt.u32.totalorder %s12216_s8, %s13072_s9 }
 0xa6e   :  { %p12222_p3 = pnand %p12220_p2, %p12217_p1 }
 0xa70   :  { %12225 = shalt.err (!%p12222_p3)
}
 0xa71   :  { %9364 = dma.vmem_to_hbm [thread:$0]  %s9362_s26, 32, %s13072_s9, [#allocation6]  }
 0xa72   :  { %12230 = dma.done.wait [#allocation6], 32  }
 0xa73   :  { %12231 = vsyncadd [#allocation6], 4294967264 }
 0xa74   :  { %9368 = vsyncpa [#allocation5], 1 }
 0xa75   :  { %9369 = vsyncpa [#allocation8], 1 }
 0xa76   :  { %9370 = vsyncpa [#allocation6], 1 }

</bundles_post_ra>
